<compile_context>
chip_gen: v6e
topology: v6e:2x2x1
jax: 0.10.0
libtpu: 0.0.40
codegen_flags: <defaults>
</compile_context>

<pallas_src>
import math

import jax
import jax.numpy as jnp
from jax.experimental import pallas as pl
from jax.experimental.pallas import tpu as pltpu

_EPS = 1e-5


def make_attention(heads: int, d_model: int, seq_len: int, *,
                   causal: bool = False, compute_dtype=jnp.float32):
    assert d_model % heads == 0
    dim = d_model // heads
    scale = 1.0 / math.sqrt(dim)
    cdt = compute_dtype

    # Row layout of the packed (16, D) f32 vector slab.
    GQ, BQ, GK, BK, GV, BV, GX, BX, CQ, CK, CV, CX = range(12)

    def kernel(q_ref, k_ref, v_ref, vec_ref, w_in_ref, w_out_ref, o_ref):
        L, D, H = q_ref.shape[1], q_ref.shape[2], heads

        def layer_norm(x, g_row, b_row):
            g = vec_ref[g_row:g_row + 1, :]                    # (1, D)
            b = vec_ref[b_row:b_row + 1, :]                    # (1, D)
            mu = jnp.mean(x, axis=-1, keepdims=True)
            var = jnp.mean((x - mu) ** 2, axis=-1, keepdims=True)
            return (x - mu) * jax.lax.rsqrt(var + _EPS) * g + b

        def project(x_ref, w_idx, g_row, b_row, c_row):
            # LayerNorm (f32, VPU) -> full-width (L,D)@(D,D) GEMM (K=N=128).
            xn = layer_norm(x_ref[0], g_row, b_row)            # (L, D) f32
            w = w_in_ref[w_idx]                                # (D, D)
            return (jnp.dot(xn.astype(cdt), w,
                            preferred_element_type=jnp.float32)
                    + vec_ref[c_row:c_row + 1, :])             # (L, D) f32

        # q params already carry the 1/sqrt(dim) scale (folded at pack time).
        qp = project(q_ref, 0, GQ, BQ, CQ)
        kp = project(k_ref, 1, GK, BK, CK)
        vp = project(v_ref, 2, GV, BV, CV)

        qh = qp.reshape(L, H, dim)
        kh = kp.reshape(L, H, dim)
        vh = vp.reshape(L, H, dim)

        # Per-head scores, heads on the batch axis of one dot_general.
        s = jnp.einsum('qhd,khd->hqk', qh.astype(cdt), kh.astype(cdt),
                       preferred_element_type=jnp.float32)     # (H, L, L)
        if causal:
            qi = jax.lax.broadcasted_iota(jnp.int32, (L, L), 0)
            ki = jax.lax.broadcasted_iota(jnp.int32, (L, L), 1)
            s = jnp.where((ki <= qi)[None, :, :], s, -1e30)
        s = s - jnp.max(s, axis=-1, keepdims=True)
        p = jnp.exp(s)
        p = p / jnp.sum(p, axis=-1, keepdims=True)             # exact normalise
        ctx = jnp.einsum('hqk,khd->qhd', p.astype(cdt), vh.astype(cdt),
                         preferred_element_type=jnp.float32)   # (L, H, dim)

        # Head merge is a free reshape -> ONE full-width output GEMM.
        x = ctx.reshape(L, D)
        xn = layer_norm(x, GX, BX)
        o = (jnp.dot(xn.astype(cdt), w_out_ref[...],
                     preferred_element_type=jnp.float32)
             + vec_ref[CX:CX + 1, :])                          # (L, D)
        o_ref[0] = o.astype(o_ref.dtype)                       # lane-dense store

    def pack_params(params):
        """Consolidate the 16 parameter tensors into 3 lane-dense inputs."""
        gq, bq, wq, cq = params["q"]
        gk, bk, wk, ck = params["k"]
        gv, bv, wv, cv = params["v"]
        gx, bx, wx, cx = params["x"]
        rows = [gq * scale, bq * scale, gk, bk, gv, bv, gx, bx,
                cq * scale, ck, cv, cx]
        vec = jnp.concatenate([r.reshape(1, d_model) for r in rows], axis=0)
        vec = jnp.pad(vec, ((0, 16 - vec.shape[0]), (0, 0)))   # sublane align
        w_in = jnp.stack([wq, wk, wv], axis=0).astype(cdt)     # (3, D, D)
        w_out = wx.astype(cdt)                                 # (D, D)
        return vec.astype(jnp.float32), w_in, w_out

    def forward(q, k, v, params):
        B, L, D = q.shape
        assert L == seq_len and D == d_model
        vec, w_in, w_out = pack_params(params)

        act_spec = pl.BlockSpec((1, L, D), lambda b: (b, 0, 0))

        def const_spec(x):
            zeros = (0,) * x.ndim
            idx = lambda b, _z=zeros: _z
            # Single-buffer the resident, constant-index parameter blocks
            # (halves their VMEM footprint; critical under v7x's 64 MiB).
            try:
                return pl.BlockSpec(x.shape, idx, pipeline_mode=pl.Buffered(1))
            except (TypeError, ValueError):    # older JAX: default buffering
                return pl.BlockSpec(x.shape, idx)

        return pl.pallas_call(
            kernel,
            out_shape=jax.ShapeDtypeStruct((B, L, D), q.dtype),
            grid_spec=pltpu.PrefetchScalarGridSpec(
                num_scalar_prefetch=0,
                grid=(B,),
                in_specs=[act_spec, act_spec, act_spec,
                          const_spec(vec), const_spec(w_in), const_spec(w_out)],
                out_specs=act_spec,
            ),
            compiler_params=pltpu.CompilerParams(
                dimension_semantics=("parallel",),   # both v7x TCs get a batch
                # Re-derive per generation at production tile sizes
                # (v5e default 16 MiB, v6e 128 MiB physical, v7x 64 MiB).
                vmem_limit_bytes=32 * 1024 * 1024,
            ),
        )(q, k, v, vec, w_in, w_out)

    return forward


def _reference(q, k, v, params, heads, causal=False):
    """Plain-JAX reference matching the PyTorch forward."""
    B, L, D = q.shape
    dim = D // heads

    def proj(x, p):
        g, be, w, c = p
        mu = jnp.mean(x, axis=-1, keepdims=True)
        var = jnp.mean((x - mu) ** 2, axis=-1, keepdims=True)
        xn = (x - mu) / jnp.sqrt(var + _EPS) * g + be
        return xn @ w + c

    qp = proj(q, params["q"]).reshape(B, L, heads, dim).swapaxes(1, 2)
    kp = proj(k, params["k"]).reshape(B, L, heads, dim).swapaxes(1, 2)
    vp = proj(v, params["v"]).reshape(B, L, heads, dim).swapaxes(1, 2)
    s = jnp.einsum("bhqd,bhkd->bhqk", qp, kp) / math.sqrt(dim)
    if causal:
        mask = jnp.tril(jnp.ones((L, L), bool))
        s = jnp.where(mask[None, None], s, -1e30)
    p = jax.nn.softmax(s, axis=-1)
    x = jnp.einsum("bhqk,bhkd->bhqd", p, vp).swapaxes(1, 2).reshape(B, L, D)
    return proj(x, params["x"])


if __name__ == "__main__":
    # Pin f32 matmul passes so kernel (MXU) and reference (XLA) numerics match
    # tightly for the check; production runs use compute_dtype=bfloat16 instead
    # (full MXU rate, f32 accumulation) and would not set this.
    jax.config.update("jax_default_matmul_precision", "highest")

    # d_model = 128 -> every activation / weight block is lane-dense (128 lanes).
    B, L, HEADS, D_MODEL = 2, 8, 4, 128

    key = jax.random.PRNGKey(0)
    keys = jax.random.split(key, 16)

    def make_proj_params(k0, k1, k2, k3):
        gamma = 1.0 + 0.1 * jax.random.normal(k0, (1, D_MODEL), jnp.float32)
        beta = 0.05 * jax.random.normal(k1, (1, D_MODEL), jnp.float32)
        w = 0.1 * jax.random.normal(k2, (D_MODEL, D_MODEL), jnp.float32)  # (in, out)
        bias = 0.05 * jax.random.normal(k3, (1, D_MODEL), jnp.float32)
        return (gamma, beta, w, bias)

    params = {
        "q": make_proj_params(*keys[0:4]),
        "k": make_proj_params(*keys[4:8]),
        "v": make_proj_params(*keys[8:12]),
        "x": make_proj_params(*keys[12:16]),
    }

    kq, kk, kv = jax.random.split(jax.random.PRNGKey(1), 3)
    q = jax.random.normal(kq, (B, L, D_MODEL), jnp.float32)
    k = jax.random.normal(kk, (B, L, D_MODEL), jnp.float32)
    v = jax.random.normal(kv, (B, L, D_MODEL), jnp.float32)

    # att2-style cross attention (no mask).
    attn = make_attention(HEADS, D_MODEL, L, causal=False)
    out = jax.block_until_ready(attn(q, k, v, params))
    ref = _reference(q, k, v, params, HEADS, causal=False)
    assert out.shape == (B, L, D_MODEL)
    err = float(jnp.max(jnp.abs(out - ref)))
    assert err < 2e-3, f"cross-attention mismatch vs reference: max_abs_err={err}"

    # att1-style causal self attention.
    attn_c = make_attention(HEADS, D_MODEL, L, causal=True)
    out_c = jax.block_until_ready(attn_c(q, q, q, params))
    ref_c = _reference(q, q, q, params, HEADS, causal=True)
    err_c = float(jnp.max(jnp.abs(out_c - ref_c)))
    assert err_c < 2e-3, f"causal attention mismatch vs reference: max_abs_err={err_c}"

    print("KERNEL_OK")
</pallas_src>

<mosaic_0001>
module attributes {stable_mosaic.version = 11 : i64} {
  func.func @kernel(%arg0: i32, %arg1: memref<1x8x128xf32, #tpu.memory_space<vmem>>, %arg2: memref<1x8x128xf32, #tpu.memory_space<vmem>>, %arg3: memref<1x8x128xf32, #tpu.memory_space<vmem>>, %arg4: memref<16x128xf32, #tpu.memory_space<vmem>>, %arg5: memref<3x128x128xf32, #tpu.memory_space<vmem>>, %arg6: memref<128x128xf32, #tpu.memory_space<vmem>>, %arg7: memref<1x8x128xf32, #tpu.memory_space<vmem>>) attributes {dimension_semantics = [#tpu.dimension_semantics<parallel>], iteration_bounds = array<i64: 2>, scalar_prefetch = 0 : i64, scratch_operands = 0 : i64, tpu.core_type = #tpu.core_type<tc>, window_params = [{transform_indices = @transform_0, window_bounds = array<i64: 1, 8, 128>}, {transform_indices = @transform_1, window_bounds = array<i64: 1, 8, 128>}, {transform_indices = @transform_2, window_bounds = array<i64: 1, 8, 128>}, {pipeline_mode = #tpu.pipeline_mode<synchronous>, transform_indices = @transform_3, window_bounds = array<i64: 16, 128>}, {pipeline_mode = #tpu.pipeline_mode<synchronous>, transform_indices = @transform_4, window_bounds = array<i64: 3, 128, 128>}, {pipeline_mode = #tpu.pipeline_mode<synchronous>, transform_indices = @transform_5, window_bounds = array<i64: 128, 128>}, {transform_indices = @transform_6, window_bounds = array<i64: 1, 8, 128>}]} {
    %c0 = arith.constant 0 : index
    %c0_0 = arith.constant 0 : index
    %c0_1 = arith.constant 0 : index
    %0 = vector.load %arg1[%c0, %c0_0, %c0_1] : memref<1x8x128xf32, #tpu.memory_space<vmem>>, vector<1x8x128xf32>
    %1 = vector.shape_cast %0 : vector<1x8x128xf32> to vector<8x128xf32>
    %c0_2 = arith.constant 0 : index
    %c0_3 = arith.constant 0 : index
    %2 = vector.load %arg4[%c0_2, %c0_3] : memref<16x128xf32, #tpu.memory_space<vmem>>, vector<1x128xf32>
    %c1 = arith.constant 1 : index
    %c0_4 = arith.constant 0 : index
    %3 = vector.load %arg4[%c1, %c0_4] : memref<16x128xf32, #tpu.memory_space<vmem>>, vector<1x128xf32>
    %cst = arith.constant dense<0.000000e+00> : vector<8xf32>
    %4 = vector.multi_reduction <add>, %1, %cst [1] : vector<8x128xf32> to vector<8xf32>
    %5 = vector.shape_cast %4 : vector<8xf32> to vector<8x1xf32>
    %cst_5 = arith.constant 1.280000e+02 : f32
    %6 = vector.broadcast %cst_5 : f32 to vector<8x1xf32>
    %7 = arith.divf %5, %6 : vector<8x1xf32>
    %8 = vector.broadcast %7 : vector<8x1xf32> to vector<8x128xf32>
    %9 = arith.subf %1, %8 : vector<8x128xf32>
    %10 = arith.mulf %9, %9 : vector<8x128xf32>
    %cst_6 = arith.constant dense<0.000000e+00> : vector<8xf32>
    %11 = vector.multi_reduction <add>, %10, %cst_6 [1] : vector<8x128xf32> to vector<8xf32>
    %12 = vector.shape_cast %11 : vector<8xf32> to vector<8x1xf32>
    %cst_7 = arith.constant 1.280000e+02 : f32
    %13 = vector.broadcast %cst_7 : f32 to vector<8x1xf32>
    %14 = arith.divf %12, %13 : vector<8x1xf32>
    %15 = vector.broadcast %7 : vector<8x1xf32> to vector<8x128xf32>
    %16 = arith.subf %1, %15 : vector<8x128xf32>
    %cst_8 = arith.constant 9.99999974E-6 : f32
    %17 = vector.broadcast %cst_8 : f32 to vector<8x1xf32>
    %18 = arith.addf %14, %17 : vector<8x1xf32>
    %19 = math.rsqrt %18 : vector<8x1xf32>
    %20 = vector.broadcast %19 : vector<8x1xf32> to vector<8x128xf32>
    %21 = arith.mulf %16, %20 : vector<8x128xf32>
    %22 = vector.broadcast %2 : vector<1x128xf32> to vector<8x128xf32>
    %23 = arith.mulf %21, %22 : vector<8x128xf32>
    %24 = vector.broadcast %3 : vector<1x128xf32> to vector<8x128xf32>
    %25 = arith.addf %23, %24 : vector<8x128xf32>
    %c0_9 = arith.constant 0 : index
    %c0_10 = arith.constant 0 : index
    %c0_11 = arith.constant 0 : index
    %26 = vector.load %arg5[%c0_9, %c0_10, %c0_11] : memref<3x128x128xf32, #tpu.memory_space<vmem>>, vector<1x128x128xf32>
    %27 = vector.shape_cast %26 : vector<1x128x128xf32> to vector<128x128xf32>
    %cst_12 = arith.constant dense<0.000000e+00> : vector<8x128xf32>
    %28 = tpu.matmul %25, %27, %cst_12 {dimension_numbers = #tpu.dot_dimension_numbers<[1], [0], [0], [1], [0, 0, 1, 1], [], []>, precision = #tpu.contract_precision<fp32>} : vector<8x128xf32>, vector<128x128xf32>, vector<8x128xf32> -> vector<8x128xf32>
    %c8 = arith.constant 8 : index
    %c0_13 = arith.constant 0 : index
    %29 = vector.load %arg4[%c8, %c0_13] : memref<16x128xf32, #tpu.memory_space<vmem>>, vector<1x128xf32>
    %30 = vector.broadcast %29 : vector<1x128xf32> to vector<8x128xf32>
    %31 = arith.addf %28, %30 : vector<8x128xf32>
    %c0_14 = arith.constant 0 : index
    %c0_15 = arith.constant 0 : index
    %c0_16 = arith.constant 0 : index
    %32 = vector.load %arg2[%c0_14, %c0_15, %c0_16] : memref<1x8x128xf32, #tpu.memory_space<vmem>>, vector<1x8x128xf32>
    %33 = vector.shape_cast %32 : vector<1x8x128xf32> to vector<8x128xf32>
    %c2 = arith.constant 2 : index
    %c0_17 = arith.constant 0 : index
    %34 = vector.load %arg4[%c2, %c0_17] : memref<16x128xf32, #tpu.memory_space<vmem>>, vector<1x128xf32>
    %c3 = arith.constant 3 : index
    %c0_18 = arith.constant 0 : index
    %35 = vector.load %arg4[%c3, %c0_18] : memref<16x128xf32, #tpu.memory_space<vmem>>, vector<1x128xf32>
    %cst_19 = arith.constant dense<0.000000e+00> : vector<8xf32>
    %36 = vector.multi_reduction <add>, %33, %cst_19 [1] : vector<8x128xf32> to vector<8xf32>
    %37 = vector.shape_cast %36 : vector<8xf32> to vector<8x1xf32>
    %cst_20 = arith.constant 1.280000e+02 : f32
    %38 = vector.broadcast %cst_20 : f32 to vector<8x1xf32>
    %39 = arith.divf %37, %38 : vector<8x1xf32>
    %40 = vector.broadcast %39 : vector<8x1xf32> to vector<8x128xf32>
    %41 = arith.subf %33, %40 : vector<8x128xf32>
    %42 = arith.mulf %41, %41 : vector<8x128xf32>
    %cst_21 = arith.constant dense<0.000000e+00> : vector<8xf32>
    %43 = vector.multi_reduction <add>, %42, %cst_21 [1] : vector<8x128xf32> to vector<8xf32>
    %44 = vector.shape_cast %43 : vector<8xf32> to vector<8x1xf32>
    %cst_22 = arith.constant 1.280000e+02 : f32
    %45 = vector.broadcast %cst_22 : f32 to vector<8x1xf32>
    %46 = arith.divf %44, %45 : vector<8x1xf32>
    %47 = vector.broadcast %39 : vector<8x1xf32> to vector<8x128xf32>
    %48 = arith.subf %33, %47 : vector<8x128xf32>
    %cst_23 = arith.constant 9.99999974E-6 : f32
    %49 = vector.broadcast %cst_23 : f32 to vector<8x1xf32>
    %50 = arith.addf %46, %49 : vector<8x1xf32>
    %51 = math.rsqrt %50 : vector<8x1xf32>
    %52 = vector.broadcast %51 : vector<8x1xf32> to vector<8x128xf32>
    %53 = arith.mulf %48, %52 : vector<8x128xf32>
    %54 = vector.broadcast %34 : vector<1x128xf32> to vector<8x128xf32>
    %55 = arith.mulf %53, %54 : vector<8x128xf32>
    %56 = vector.broadcast %35 : vector<1x128xf32> to vector<8x128xf32>
    %57 = arith.addf %55, %56 : vector<8x128xf32>
    %c1_24 = arith.constant 1 : index
    %c0_25 = arith.constant 0 : index
    %c0_26 = arith.constant 0 : index
    %58 = vector.load %arg5[%c1_24, %c0_25, %c0_26] : memref<3x128x128xf32, #tpu.memory_space<vmem>>, vector<1x128x128xf32>
    %59 = vector.shape_cast %58 : vector<1x128x128xf32> to vector<128x128xf32>
    %cst_27 = arith.constant dense<0.000000e+00> : vector<8x128xf32>
    %60 = tpu.matmul %57, %59, %cst_27 {dimension_numbers = #tpu.dot_dimension_numbers<[1], [0], [0], [1], [0, 0, 1, 1], [], []>, precision = #tpu.contract_precision<fp32>} : vector<8x128xf32>, vector<128x128xf32>, vector<8x128xf32> -> vector<8x128xf32>
    %c9 = arith.constant 9 : index
    %c0_28 = arith.constant 0 : index
    %61 = vector.load %arg4[%c9, %c0_28] : memref<16x128xf32, #tpu.memory_space<vmem>>, vector<1x128xf32>
    %62 = vector.broadcast %61 : vector<1x128xf32> to vector<8x128xf32>
    %63 = arith.addf %60, %62 : vector<8x128xf32>
    %c0_29 = arith.constant 0 : index
    %c0_30 = arith.constant 0 : index
    %c0_31 = arith.constant 0 : index
    %64 = vector.load %arg3[%c0_29, %c0_30, %c0_31] : memref<1x8x128xf32, #tpu.memory_space<vmem>>, vector<1x8x128xf32>
    %65 = vector.shape_cast %64 : vector<1x8x128xf32> to vector<8x128xf32>
    %c4 = arith.constant 4 : index
    %c0_32 = arith.constant 0 : index
    %66 = vector.load %arg4[%c4, %c0_32] : memref<16x128xf32, #tpu.memory_space<vmem>>, vector<1x128xf32>
    %c5 = arith.constant 5 : index
    %c0_33 = arith.constant 0 : index
    %67 = vector.load %arg4[%c5, %c0_33] : memref<16x128xf32, #tpu.memory_space<vmem>>, vector<1x128xf32>
    %cst_34 = arith.constant dense<0.000000e+00> : vector<8xf32>
    %68 = vector.multi_reduction <add>, %65, %cst_34 [1] : vector<8x128xf32> to vector<8xf32>
    %69 = vector.shape_cast %68 : vector<8xf32> to vector<8x1xf32>
    %cst_35 = arith.constant 1.280000e+02 : f32
    %70 = vector.broadcast %cst_35 : f32 to vector<8x1xf32>
    %71 = arith.divf %69, %70 : vector<8x1xf32>
    %72 = vector.broadcast %71 : vector<8x1xf32> to vector<8x128xf32>
    %73 = arith.subf %65, %72 : vector<8x128xf32>
    %74 = arith.mulf %73, %73 : vector<8x128xf32>
    %cst_36 = arith.constant dense<0.000000e+00> : vector<8xf32>
    %75 = vector.multi_reduction <add>, %74, %cst_36 [1] : vector<8x128xf32> to vector<8xf32>
    %76 = vector.shape_cast %75 : vector<8xf32> to vector<8x1xf32>
    %cst_37 = arith.constant 1.280000e+02 : f32
    %77 = vector.broadcast %cst_37 : f32 to vector<8x1xf32>
    %78 = arith.divf %76, %77 : vector<8x1xf32>
    %79 = vector.broadcast %71 : vector<8x1xf32> to vector<8x128xf32>
    %80 = arith.subf %65, %79 : vector<8x128xf32>
    %cst_38 = arith.constant 9.99999974E-6 : f32
    %81 = vector.broadcast %cst_38 : f32 to vector<8x1xf32>
    %82 = arith.addf %78, %81 : vector<8x1xf32>
    %83 = math.rsqrt %82 : vector<8x1xf32>
    %84 = vector.broadcast %83 : vector<8x1xf32> to vector<8x128xf32>
    %85 = arith.mulf %80, %84 : vector<8x128xf32>
    %86 = vector.broadcast %66 : vector<1x128xf32> to vector<8x128xf32>
    %87 = arith.mulf %85, %86 : vector<8x128xf32>
    %88 = vector.broadcast %67 : vector<1x128xf32> to vector<8x128xf32>
    %89 = arith.addf %87, %88 : vector<8x128xf32>
    %c2_39 = arith.constant 2 : index
    %c0_40 = arith.constant 0 : index
    %c0_41 = arith.constant 0 : index
    %90 = vector.load %arg5[%c2_39, %c0_40, %c0_41] : memref<3x128x128xf32, #tpu.memory_space<vmem>>, vector<1x128x128xf32>
    %91 = vector.shape_cast %90 : vector<1x128x128xf32> to vector<128x128xf32>
    %cst_42 = arith.constant dense<0.000000e+00> : vector<8x128xf32>
    %92 = tpu.matmul %89, %91, %cst_42 {dimension_numbers = #tpu.dot_dimension_numbers<[1], [0], [0], [1], [0, 0, 1, 1], [], []>, precision = #tpu.contract_precision<fp32>} : vector<8x128xf32>, vector<128x128xf32>, vector<8x128xf32> -> vector<8x128xf32>
    %c10 = arith.constant 10 : index
    %c0_43 = arith.constant 0 : index
    %93 = vector.load %arg4[%c10, %c0_43] : memref<16x128xf32, #tpu.memory_space<vmem>>, vector<1x128xf32>
    %94 = vector.broadcast %93 : vector<1x128xf32> to vector<8x128xf32>
    %95 = arith.addf %92, %94 : vector<8x128xf32>
    %96 = vector.shape_cast %31 : vector<8x128xf32> to vector<8x4x32xf32>
    %97 = vector.shape_cast %63 : vector<8x128xf32> to vector<8x4x32xf32>
    %98 = vector.shape_cast %95 : vector<8x128xf32> to vector<8x4x32xf32>
    "tpu.trace_start"() <{level = 10 : i32, message = "qhd,khd->hqk"}> : () -> ()
    %cst_44 = arith.constant dense<0.000000e+00> : vector<4x8x8xf32>
    %99 = tpu.matmul %96, %97, %cst_44 {dimension_numbers = #tpu.dot_dimension_numbers<[2], [2], [0], [0], [0, 1, 0, 0, 1, 0], [1], [1]>, precision = #tpu.contract_precision<fp32>} : vector<8x4x32xf32>, vector<8x4x32xf32>, vector<4x8x8xf32> -> vector<4x8x8xf32>
    "tpu.trace_stop"() : () -> ()
    %cst_45 = arith.constant dense<0xFF800000> : vector<4x8xf32>
    %100 = vector.multi_reduction <maximumf>, %99, %cst_45 [2] : vector<4x8x8xf32> to vector<4x8xf32>
    %101 = vector.shape_cast %100 : vector<4x8xf32> to vector<4x8x1xf32>
    %102 = vector.broadcast %101 : vector<4x8x1xf32> to vector<4x8x8xf32>
    %103 = arith.subf %99, %102 : vector<4x8x8xf32>
    %104 = math.exp %103 : vector<4x8x8xf32>
    %cst_46 = arith.constant dense<0.000000e+00> : vector<4x8xf32>
    %105 = vector.multi_reduction <add>, %104, %cst_46 [2] : vector<4x8x8xf32> to vector<4x8xf32>
    %106 = vector.shape_cast %105 : vector<4x8xf32> to vector<4x8x1xf32>
    %107 = vector.broadcast %106 : vector<4x8x1xf32> to vector<4x8x8xf32>
    %108 = arith.divf %104, %107 : vector<4x8x8xf32>
    "tpu.trace_start"() <{level = 10 : i32, message = "hqk,khd->qhd"}> : () -> ()
    %cst_47 = arith.constant dense<0.000000e+00> : vector<4x32x8xf32>
    %109 = tpu.matmul %98, %108, %cst_47 {dimension_numbers = #tpu.dot_dimension_numbers<[0], [2], [2], [1], [0, 1, 0, 2, 1, 1], [1], [0]>, precision = #tpu.contract_precision<fp32>} : vector<8x4x32xf32>, vector<4x8x8xf32>, vector<4x32x8xf32> -> vector<4x32x8xf32>
    %110 = tpu.transpose %109, [2, 0, 1] : vector<4x32x8xf32> -> vector<8x4x32xf32>
    "tpu.trace_stop"() : () -> ()
    %111 = vector.shape_cast %110 : vector<8x4x32xf32> to vector<8x128xf32>
    %c6 = arith.constant 6 : index
    %c0_48 = arith.constant 0 : index
    %112 = vector.load %arg4[%c6, %c0_48] : memref<16x128xf32, #tpu.memory_space<vmem>>, vector<1x128xf32>
    %c7 = arith.constant 7 : index
    %c0_49 = arith.constant 0 : index
    %113 = vector.load %arg4[%c7, %c0_49] : memref<16x128xf32, #tpu.memory_space<vmem>>, vector<1x128xf32>
    %cst_50 = arith.constant dense<0.000000e+00> : vector<8xf32>
    %114 = vector.multi_reduction <add>, %111, %cst_50 [1] : vector<8x128xf32> to vector<8xf32>
    %115 = vector.shape_cast %114 : vector<8xf32> to vector<8x1xf32>
    %cst_51 = arith.constant 1.280000e+02 : f32
    %116 = vector.broadcast %cst_51 : f32 to vector<8x1xf32>
    %117 = arith.divf %115, %116 : vector<8x1xf32>
    %118 = vector.broadcast %117 : vector<8x1xf32> to vector<8x128xf32>
    %119 = arith.subf %111, %118 : vector<8x128xf32>
    %120 = arith.mulf %119, %119 : vector<8x128xf32>
    %cst_52 = arith.constant dense<0.000000e+00> : vector<8xf32>
    %121 = vector.multi_reduction <add>, %120, %cst_52 [1] : vector<8x128xf32> to vector<8xf32>
    %122 = vector.shape_cast %121 : vector<8xf32> to vector<8x1xf32>
    %cst_53 = arith.constant 1.280000e+02 : f32
    %123 = vector.broadcast %cst_53 : f32 to vector<8x1xf32>
    %124 = arith.divf %122, %123 : vector<8x1xf32>
    %125 = vector.broadcast %117 : vector<8x1xf32> to vector<8x128xf32>
    %126 = arith.subf %111, %125 : vector<8x128xf32>
    %cst_54 = arith.constant 9.99999974E-6 : f32
    %127 = vector.broadcast %cst_54 : f32 to vector<8x1xf32>
    %128 = arith.addf %124, %127 : vector<8x1xf32>
    %129 = math.rsqrt %128 : vector<8x1xf32>
    %130 = vector.broadcast %129 : vector<8x1xf32> to vector<8x128xf32>
    %131 = arith.mulf %126, %130 : vector<8x128xf32>
    %132 = vector.broadcast %112 : vector<1x128xf32> to vector<8x128xf32>
    %133 = arith.mulf %131, %132 : vector<8x128xf32>
    %134 = vector.broadcast %113 : vector<1x128xf32> to vector<8x128xf32>
    %135 = arith.addf %133, %134 : vector<8x128xf32>
    %c0_55 = arith.constant 0 : index
    %c0_56 = arith.constant 0 : index
    %136 = vector.load %arg6[%c0_55, %c0_56] : memref<128x128xf32, #tpu.memory_space<vmem>>, vector<128x128xf32>
    %cst_57 = arith.constant dense<0.000000e+00> : vector<8x128xf32>
    %137 = tpu.matmul %135, %136, %cst_57 {dimension_numbers = #tpu.dot_dimension_numbers<[1], [0], [0], [1], [0, 0, 1, 1], [], []>, precision = #tpu.contract_precision<fp32>} : vector<8x128xf32>, vector<128x128xf32>, vector<8x128xf32> -> vector<8x128xf32>
    %c11 = arith.constant 11 : index
    %c0_58 = arith.constant 0 : index
    %138 = vector.load %arg4[%c11, %c0_58] : memref<16x128xf32, #tpu.memory_space<vmem>>, vector<1x128xf32>
    %139 = vector.broadcast %138 : vector<1x128xf32> to vector<8x128xf32>
    %140 = arith.addf %137, %139 : vector<8x128xf32>
    %c0_59 = arith.constant 0 : index
    %c0_60 = arith.constant 0 : index
    %c0_61 = arith.constant 0 : index
    %141 = vector.load %arg7[%c0_59, %c0_60, %c0_61] : memref<1x8x128xf32, #tpu.memory_space<vmem>>, vector<1x8x128xf32>
    %142 = vector.shape_cast %141 : vector<1x8x128xf32> to vector<8x128xf32>
    %143 = vector.shape_cast %140 : vector<8x128xf32> to vector<1x8x128xf32>
    tpu.vector_store %arg7[%c0_59, %c0_60, %c0_61], %143 {strides = array<i32>} : memref<1x8x128xf32, #tpu.memory_space<vmem>>, vector<1x8x128xf32>,
    return
  }
  func.func @transform_0(%arg0: i32) -> (i32, i32, i32) {
    %c0_i32 = arith.constant 0 : i32
    %c0_i32_0 = arith.constant 0 : i32
    %c0_i32_1 = arith.constant 0 : i32
    return %arg0, %c0_i32, %c0_i32_0 : i32, i32, i32
  }
  func.func @transform_1(%arg0: i32) -> (i32, i32, i32) {
    %c0_i32 = arith.constant 0 : i32
    %c0_i32_0 = arith.constant 0 : i32
    %c0_i32_1 = arith.constant 0 : i32
    return %arg0, %c0_i32, %c0_i32_0 : i32, i32, i32
  }
  func.func @transform_2(%arg0: i32) -> (i32, i32, i32) {
    %c0_i32 = arith.constant 0 : i32
    %c0_i32_0 = arith.constant 0 : i32
    %c0_i32_1 = arith.constant 0 : i32
    return %arg0, %c0_i32, %c0_i32_0 : i32, i32, i32
  }
  func.func @transform_3(%arg0: i32) -> (i32, i32) {
    %c0_i32 = arith.constant 0 : i32
    %c0_i32_0 = arith.constant 0 : i32
    %c0_i32_1 = arith.constant 0 : i32
    return %c0_i32, %c0_i32_0 : i32, i32
  }
  func.func @transform_4(%arg0: i32) -> (i32, i32, i32) {
    %c0_i32 = arith.constant 0 : i32
    %c0_i32_0 = arith.constant 0 : i32
    %c0_i32_1 = arith.constant 0 : i32
    %c0_i32_2 = arith.constant 0 : i32
    return %c0_i32, %c0_i32_0, %c0_i32_1 : i32, i32, i32
  }
  func.func @transform_5(%arg0: i32) -> (i32, i32) {
    %c0_i32 = arith.constant 0 : i32
    %c0_i32_0 = arith.constant 0 : i32
    %c0_i32_1 = arith.constant 0 : i32
    return %c0_i32, %c0_i32_0 : i32, i32
  }
  func.func @transform_6(%arg0: i32) -> (i32, i32, i32) {
    %c0_i32 = arith.constant 0 : i32
    %c0_i32_0 = arith.constant 0 : i32
    %c0_i32_1 = arith.constant 0 : i32
    return %arg0, %c0_i32, %c0_i32_0 : i32, i32, i32
  }
}

</mosaic_0001>

<bundles_post_ra>
// kernel: tpu_custom_call.1
= control target key start
LH: loop header
LB: loop body
LE: loop exit
PB: predicated region body
PF: predicated region fallthrough
CT: control target
= control target key end

     0   :  { %s12939_s0 = inlined_call_operand.hbm [shape: f32[2,8,128], index: 0, kind: input, shape index: {}]   ;;  %s12940_s1 = inlined_call_operand.hbm [shape: f32[2,8,128], index: 1, kind: input, shape index: {}]   ;;  %s12941_s2 = inlined_call_operand.hbm [shape: f32[2,8,128], index: 2, kind: input, shape index: {}]   ;;  %s12942_s3 = inlined_call_operand.hbm [shape: f32[16,128], index: 3, kind: input, shape index: {}]   ;;  %s12943_s4 = inlined_call_operand.hbm [shape: f32[3,128,128], index: 4, kind: input, shape index: {}]   ;;  %s12944_s5 = inlined_call_operand.hbm [shape: f32[128,128], index: 5, kind: input, shape index: {}]   ;;  %s12945_s6 = inlined_call_operand.hbm [shape: f32[2,8,128], index: 6, kind: output, shape index: {}]  }
   0x1   :  { %12967 = sst [smem:[#allocation23_spill]] %s12940_s1 }
   0x2   :  { %12968 = sst [smem:[#allocation24_spill]] %s12942_s3 }
   0x3   :  { %11 = vsyncpa [#allocation3], 0 }
   0x4   :  { %13 = vsyncpa [#allocation3 + $0x1], 0 }
   0x5   :  { %14 = vsyncpa [#allocation6], 0 }
   0x6   :  { %16 = vsyncpa [#allocation6 + $0x1], 0 }
   0x7   :  { %17 = vsyncpa [#allocation9], 0 }
   0x8   :  { %18 = vsyncpa [#allocation12], 0 }
   0x9   :  { %19 = vsyncpa [#allocation4], 0 }
   0xa   :  { %21 = vsyncpa [#allocation4 + $0x1], 0  ;;  %s10596_s21 = smov 0   ;;  %s10598_s22 = smov 0  }
   0xb   :  { %s10600_s23 = smov 0   ;;  %s10602_s24 = smov 0  }
   0xc LB: > { %12969 = sst [smem:[#allocation19_spill]] %s10543_s24  ;;  %s10617_s25 = sadd.s32 4294967295, %s10543_s24   ;;  %s10543_s24 = sphi %s10602_s24, %s13004_s24   ;;  %s10539_s23 = sphi %s10600_s23, %s13008_s23   ;;  %s10535_s22 = sphi %s10598_s22, %s13007_s22   ;;  %s10531_s21 = sphi %s10596_s21, %s13006_s21  }
   0xd   : > { %s8203_s26 = sadd.s32 4294967294, %s10543_s24   ;;  %p47_p0 = scmp.ne.s32.totalorder %s10535_s22, %s10531_s21 }
   0xe   : > { %p12951_p1 = scmp.eq.s32.totalorder %s10617_s25, 0  ;;  %p186_p2 = scmp.eq.s32.totalorder %s10617_s25, 1 }
   0xf   : > { %p192_p3 = scmp.eq.s32.totalorder %s8203_s26, 1  ;;  %p8204_p5 = scmp.ge.s32.totalorder %s10543_s24, 1 }
  0x10   : > { %p10626_p4 = por %p12951_p1, %p47_p0  ;;  %p199_p7 = scmp.lt.s32.totalorder %s10543_s24, 3 }
  0x11   : > { %p10631_p6 = por %p192_p3, %p47_p0  ;;  %s10545_s30 = smov [#allocation8]  }
  0x12   : > { %s12970_s27 = scalar_select %p10626_p4, 1, 0 }
  0x13   : > { %s12971_s28 = scalar_select %p10631_p6, 1, 0 }
  0x14   : > { %p10636_p8 = pnand %p8204_p5, %p199_p7  ;;  %s211_s7 = sshll.u32 %s10545_s30, 4  ;;  %s212_s7 = int_to_ptr.vmem [resolvable:$true] %s211_s7 }
  0x15   : > { %12972 = sst [smem:[#allocation20_spill]] %s12971_s28  ;;  %s10650_s9 = sadd.s32 1, %s10543_s24  }
  0x16   : > { %s12973_s29 = scalar_select %p10636_p8, 1, 0 }
  0x17   : > { %p10205_p9 = pneg %p10636_p8  ;;  %12975 = sst [smem:[#allocation21_spill]] %s10650_s9 }
  0x18   : > { %s34_s10 = sadd.s32 1, %s10539_s23  ;;  %s31_s11 = ssub.s32 %s10543_s24, %s10650_s9 }
  0x19   : > { %p10645_p11 = pnand %p10205_p9, %p12951_p1  ;;  %s10316_s12 = scalar_lea.vmem %s212_s7, 256 }
  0x1a   : > { %p10317_p13 = scmp.ne.s32.totalorder %s212_s7, %s10316_s12  ;;  %p10324_p5 = scmp.lt.s32.totalorder %s212_s7, %s212_s7 }
  0x1b   : > { %s12974_s8 = scalar_select %p10645_p11, 1, 0 }
  0x1c   : > { %p12952_p12 = pneg %p10645_p11  ;;  %p10325_p7 = scmp.lt.s32.totalorder %s10316_s12, %s10316_s12 }
  0x1e   : > { %p10319_p0 = pnand %p10317_p13, %p12952_p12  ;;  %p10326_p9 = por %p10325_p7, %p10324_p5 }
  0x20   : > { %p10320_p3 = pneg %p10319_p0 }
  0x22   : > { %p10327_p10 = pnand %p10326_p9, %p10320_p3 }
  0x24   : > { %10330 = shalt.err (!%p10327_p10)
}
  0x25   : > { %s12947_s13 = smov 128   ;;  %s12949_s14 = smov 8  }
  0x26   : > { %s12976_s3 = sld [smem:[#allocation24_spill]]  ;;  %p32_p10 = scmp.eq.s32.totalorder %s31_s11, 0 }
  0x27   : > { %p41_p13 = scmp.ne.s32.totalorder %s10539_s23, %s10535_s22  ;;  %p42_p0 = scmp.eq.s32.totalorder %s10543_s24, 0 }
  0x28   : > { %p10232_p3 = scmp.lt.s32.totalorder %s10543_s24, 2  ;;  %s12946_s19 = sand.u32 1, %s10539_s23  }
  0x29   : > { %s10673_s17 = scalar_select %p32_p10, %s10539_s23, %s34_s10  }
  0x2a   : > { %p43_p5 = por %p42_p0, %p41_p13  ;;  %p10677_p7 = por %p186_p2, %p41_p13 }
  0x2b   : > { %12977 = sst [smem:[#allocation22_spill]] %s10673_s17  ;;  %s10683_s20 = sshll.u32 %s10543_s24, 7 }
  0x2c   : > { %10208 = dma.hbm_to_vmem [thread:$0]  (!%p10645_p11), %s12976_s3, 256, %s212_s7, [#allocation9], %s12947_s13, %s12947_s13, %s12949_s14  }
  0x2d   : > { %s12978_s18 = scalar_select %p10677_p7, 1, 0 }
  0x2e   : > { %s10687_s26 = sshll.u32 %s12946_s19, 3  ;;  %p10689_p9 = pnand %p10232_p3, %p43_p5 }
  0x2f   : > { %s269_s7 = sand.u32 1, %s10543_s24   ;;  %s12980_s1 = sld [smem:[#allocation23_spill]] }
  0x30   : > { %s273_s15 = scalar_lea.vmem [#allocation5], %s10687_s26  ;;  %s10701_s19 = scalar_lea.sflag [#allocation6], %s269_s7 }
  0x31   : > { %s280_s16 = sshll.u32 %s273_s15, 4  ;;  %p10707_p10 = pneg %p10689_p9  ;;  %s281_s16 = int_to_ptr.vmem [resolvable:$true] %s280_s16 }
  0x35   : > { %s10698_s12 = scalar_lea.hbm %s12980_s1, %s10683_s20  ;;  %s10336_s3 = scalar_lea.hbm %s12980_s1, 256 }
  0x36   : > { %s10331_s13 = scalar_lea.hbm %s10698_s12, 128  ;;  %p10337_p3 = scmp.lt.s32.totalorder %s10698_s12, %s12980_s1 }
  0x37   : > { %p10332_p2 = scmp.ne.s32.totalorder %s10698_s12, %s10331_s13  ;;  %p10338_p5 = scmp.lt.s32.totalorder %s10336_s3, %s10331_s13 }
  0x39   : > { %p10334_p13 = pnand %p10707_p10, %p10332_p2  ;;  %p10339_p1 = por %p10338_p5, %p10337_p3 }
  0x3b   : > { %p10335_p0 = pneg %p10334_p13 }
  0x3d   : > { %p10340_p12 = pnand %p10339_p1, %p10335_p0 }
  0x3f   : > { %10343 = shalt.err (!%p10340_p12)
}
  0x40   : > { %s10344_s7 = scalar_lea.vmem %s281_s16, 128  ;;  %s10548_s9 = smov [#allocation5]  }
  0x41   : > { %p10345_p6 = scmp.ne.s32.totalorder %s281_s16, %s10344_s7  ;;  %s10349_s24 = sshll.u32 %s10548_s9, 4  ;;  %s10350_s24 = int_to_ptr.vmem [resolvable:$false] %s10349_s24 }
  0x42   : > { %s10351_s28 = scalar_lea.vmem %s10350_s24, 256  ;;  %p10352_p2 = scmp.lt.s32.totalorder %s281_s16, %s10350_s24 }
  0x43   : > { %p10347_p7 = pnand %p10345_p6, %p10707_p10  ;;  %p10353_p13 = scmp.lt.s32.totalorder %s10351_s28, %s10344_s7 }
  0x45   : > { %p10348_p4 = pneg %p10347_p7  ;;  %p10354_p8 = por %p10353_p13, %p10352_p2 }
  0x47   : > { %p10355_p11 = pnand %p10354_p8, %p10348_p4 }
  0x49   : > { %10358 = shalt.err (!%p10355_p11)
}
  0x4a   : > { %10221 = dma.hbm_to_vmem [thread:$0]  (!%p10689_p9), %s10698_s12, 128, %s281_s16, %s10701_s19  }
  0x4b   : > { %s10549_s3 = smov [#allocation10]   ;;  %s10550_s17 = smov [#allocation11]  }
  0x4c   : > { %s224_s13 = sshll.u32 %s10549_s3, 4  ;;  %s237_s10 = sshll.u32 %s10550_s17, 4  ;;  %s225_s13 = int_to_ptr.vmem [resolvable:$true] %s224_s13  ;;  %s238_s10 = int_to_ptr.vmem [resolvable:$true] %s237_s10 }
  0x4d   : > { %s10370_s11 = scalar_lea.vmem %s225_s13, 6144  ;;  %p12982_p6 = scmp.ne.s32.totalorder %s12974_s8, 0 }
  0x4e   : > { %p10371_p1 = scmp.ne.s32.totalorder %s225_s13, %s10370_s11  ;;  %p10378_p3 = scmp.lt.s32.totalorder %s225_s13, %s225_s13 }
  0x4f   : > { %p12983_p12 = pneg %p12982_p6  ;;  %p10379_p4 = scmp.lt.s32.totalorder %s10370_s11, %s10370_s11 }
  0x51   : > { %p10373_p7 = pnand %p10371_p1, %p12983_p12  ;;  %p10380_p8 = por %p10379_p4, %p10378_p3 }
  0x53   : > { %p10374_p0 = pneg %p10373_p7 }
  0x55   : > { %p10381_p11 = pnand %p10380_p8, %p10374_p0 }
  0x57   : > { %10384 = shalt.err (!%p10381_p11)
}
  0x58   : > { %s12984_s24 = smov 8   ;;  %s12985_s28 = smov 128  }
  0x59   : > { %10211 = dma.hbm_to_vmem [thread:$0]  (!%p12982_p6), %s12943_s4, 6144, %s225_s13, [#allocation9], %s12985_s28, %s12985_s28, %s12984_s24  }
  0x5a   : > { %s10396_s16 = scalar_lea.vmem %s238_s10, 2048  ;;  %p12986_p2 = pmov %p12983_p12 }
  0x5b   : > { %p10397_p5 = scmp.ne.s32.totalorder %s238_s10, %s10396_s16  ;;  %p10404_p12 = scmp.lt.s32.totalorder %s238_s10, %s238_s10 }
  0x5c   : > { %p10405_p7 = scmp.lt.s32.totalorder %s10396_s16, %s10396_s16 }
  0x5d   : > { %p10399_p13 = pnand %p10397_p5, %p12986_p2 }
  0x5e   : > { %p10406_p0 = por %p10405_p7, %p10404_p12 }
  0x5f   : > { %p10400_p1 = pneg %p10399_p13 }
  0x61   : > { %p10407_p3 = pnand %p10406_p0, %p10400_p1 }
  0x63   : > { %10410 = shalt.err (!%p10407_p3)
}
  0x64   : > { %10214 = dma.hbm_to_vmem [thread:$0]  (!%p12982_p6), %s12944_s5, 2048, %s238_s10, [#allocation12], %s12985_s28, %s12985_s28, %s12984_s24  }
  0x65   : > { %s10752_s17 = scalar_lea.hbm %s12939_s0, %s10683_s20  ;;  %s255_s8 = scalar_lea.vmem [#allocation2], %s10687_s26 }
  0x66   : > { %s262_s11 = sshll.u32 %s255_s8, 4  ;;  %s10759_s16 = scalar_lea.hbm %s12941_s2, %s10683_s20  ;;  %s263_s11 = int_to_ptr.vmem [resolvable:$true] %s262_s11 }
  0x67   : > { %s12987_s15 = sand.u32 1, %s10539_s23   ;;  %s10411_s1 = scalar_lea.hbm %s10752_s17, 128 }
  0x68   : > { %s252_s7 = scalar_lea.sflag [#allocation3], %s12987_s15  ;;  %p10412_p6 = scmp.ne.s32.totalorder %s10752_s17, %s10411_s1 }
  0x69   : > { %s10416_s28 = scalar_lea.hbm %s12939_s0, 256  ;;  %p10417_p11 = scmp.lt.s32.totalorder %s10752_s17, %s12939_s0 }
  0x6a   : > { %p10414_p4 = pnand %p10412_p6, %p10707_p10  ;;  %p10418_p5 = scmp.lt.s32.totalorder %s10416_s28, %s10411_s1 }
  0x6c   : > { %p10415_p8 = pneg %p10414_p4  ;;  %p10419_p2 = por %p10418_p5, %p10417_p11 }
  0x6e   : > { %p10420_p13 = pnand %p10419_p2, %p10415_p8 }
  0x70   : > { %10423 = shalt.err (!%p10420_p13)
}
  0x71   : > { %s10424_s20 = scalar_lea.vmem %s263_s11, 128  ;;  %s10551_s8 = smov [#allocation2]  }
  0x72   : > { %p10425_p1 = scmp.ne.s32.totalorder %s263_s11, %s10424_s20  ;;  %s10429_s9 = sshll.u32 %s10551_s8, 4  ;;  %s10430_s9 = int_to_ptr.vmem [resolvable:$false] %s10429_s9 }
  0x73   : > { %s10431_s12 = scalar_lea.vmem %s10430_s9, 256  ;;  %p10432_p0 = scmp.lt.s32.totalorder %s263_s11, %s10430_s9 }
  0x74   : > { %p10427_p12 = pnand %p10425_p1, %p10707_p10  ;;  %p10433_p3 = scmp.lt.s32.totalorder %s10431_s12, %s10424_s20 }
  0x76   : > { %p10428_p7 = pneg %p10427_p12  ;;  %p10434_p6 = por %p10433_p3, %p10432_p0 }
  0x78   : > { %p10435_p4 = pnand %p10434_p6, %p10428_p7 }
  0x7a   : > { %10438 = shalt.err (!%p10435_p4)
}
  0x7b   : > { %10218 = dma.hbm_to_vmem [thread:$0]  (!%p10689_p9), %s10752_s17, 128, %s263_s11, %s252_s7  }
  0x7c   : > { %s291_s1 = scalar_lea.vmem [#allocation7], %s10687_s26  ;;  %s10439_s10 = scalar_lea.hbm %s10759_s16, 128 }
  0x7d   : > { %s298_s15 = sshll.u32 %s291_s1, 4  ;;  %p10440_p8 = scmp.ne.s32.totalorder %s10759_s16, %s10439_s10  ;;  %s299_s15 = int_to_ptr.vmem [resolvable:$true] %s298_s15 }
  0x7e   : > { %s10444_s3 = scalar_lea.hbm %s12941_s2, 256  ;;  %p10445_p2 = scmp.lt.s32.totalorder %s10759_s16, %s12941_s2 }
  0x7f   : > { %p10442_p11 = pnand %p10440_p8, %p10707_p10  ;;  %p10446_p13 = scmp.lt.s32.totalorder %s10444_s3, %s10439_s10 }
  0x81   : > { %p10443_p5 = pneg %p10442_p11  ;;  %p10447_p1 = por %p10446_p13, %p10445_p2 }
  0x83   : > { %p10448_p12 = pnand %p10447_p1, %p10443_p5 }
  0x85   : > { %10451 = shalt.err (!%p10448_p12)
}
  0x86   : > { %s10452_s26 = scalar_lea.vmem %s299_s15, 128  ;;  %s10552_s17 = smov [#allocation7]  }
  0x87   : > { %p10453_p7 = scmp.ne.s32.totalorder %s299_s15, %s10452_s26  ;;  %s10457_s11 = sshll.u32 %s10552_s17, 4  ;;  %s10458_s11 = int_to_ptr.vmem [resolvable:$false] %s10457_s11 }
  0x88   : > { %s10459_s7 = scalar_lea.vmem %s10458_s11, 256  ;;  %p10460_p6 = scmp.lt.s32.totalorder %s299_s15, %s10458_s11 }
  0x89   : > { %p10455_p0 = pnand %p10453_p7, %p10707_p10  ;;  %p10461_p4 = scmp.lt.s32.totalorder %s10459_s7, %s10452_s26 }
  0x8b   : > { %p10456_p3 = pneg %p10455_p0  ;;  %p10462_p8 = por %p10461_p4, %p10460_p6 }
  0x8d   : > { %p10463_p11 = pnand %p10462_p8, %p10456_p3 }
  0x8f   : > { %10466 = shalt.err (!%p10463_p11)
}
  0x90   : > { %10224 = dma.hbm_to_vmem [thread:$0]  (!%p10689_p9), %s10759_s16, 128, %s299_s15, %s10701_s19  }
  0x91   : > { %p12988_p5 = scmp.ne.s32.totalorder %s12973_s29, 0 }
  0x92   : > { %s10800_s14 = sand.u32 (!%p12988_p5), 1, %s10535_s22   ;;  %p12989_p10 = scmp.ne.s32.totalorder (!%p12988_p5), %s12970_s27, 0 }
  0x93   : > { %307 = sbr.rel (%p12988_p5) target bundleno = 2873 (0xb39), region = 44  ;;  %s10803_s8 = sshll.u32 (!%p12988_p5), %s10800_s14, 3 }
  0x94   : > { %s310_s9 = scalar_lea.sflag (!%p12988_p5), [#allocation3], %s10800_s14  ;;  %s313_s12 = scalar_lea.vmem (!%p12988_p5), [#allocation2], %s10803_s8 }
  0x98   : > { %10510 = dma.done.wait (%p12989_p10), %s310_s9, 128  }
  0x99   : > { %10512 = vsyncadd (%p12989_p10), %s310_s9, 4294967168  ;;  %s318_s29 = sand.u32 1, %s10617_s25   ;;  %s322_s30 = scalar_lea.vmem [#allocation5], %s10803_s8 }
  0x9a   : > { %s319_s19 = scalar_lea.sflag [#allocation6], %s318_s29 }
  0x9b   : > { %10514 = dma.done.wait (%p12989_p10), %s319_s19, 256  }
  0x9c   : > { %10516 = vsyncadd (%p12989_p10), %s319_s19, 4294967040  ;;  %s331_s16 = scalar_lea.vmem [#allocation7], %s10803_s8  ;;  %p12990_p9 = scmp.eq.s32.totalorder %s10617_s25, 0 }
  0x9e   : > { %10518 = dma.done.wait (%p12990_p9), [#allocation9], 6400   ;;  %p12991_p2 = pmov %p12990_p9 }
  0xa0   : > { %10520 = vsyncadd (%p12991_p2), [#allocation9], 4294960896  ;;  %p12992_p13 = pmov %p12991_p2 }
  0xa1   : > { %p12993_p1 = pmov %p12991_p2 }
  0xa2   : > { %10522 = dma.done.wait (%p12992_p13), [#allocation12], 2048  }
  0xa3   : > { %10524 = vsyncadd (%p12993_p1), [#allocation12], 4294965248  ;;  %v1069_v0 = vld [vmem:[%s322_s30] sm:$0xff]  ;;  %v382_v1 = vld [vmem:[%s313_s12] sm:$0xff]  ;;  %v10553_v5 = vmov 0.0   ;;  %vm10554_vm0 = vmmov 0  }
  0xa4   : > { %1072 = vadd.xlane.f32.xlu1 %v1069_v0  ;;  %385 = vadd.xlane.f32.xlu0 %v382_v1  ;;  %v422_v2 = vld [vmem:[#allocation10 + $0x78] sm:$0xff]  ;;  %v421_v3 = vld [vmem:[#allocation10 + $0x70] sm:$0xff]  ;;  %v420_v4 = vld [vmem:[#allocation10 + $0x68] sm:$0xff]  ;;  %s10555_s27 = smov 96   ;;  %s10556_s1 = smov 64   ;;  %vm2598_vm1 = vcmask 261120  }
  0xa5   : > { %8924 = vmatprep.subr.mxu1 %v10553_v5  ;;  %v10827_v6 = vand.u32 4294901760, %v422_v2  ;;  %v10829_v7 = vand.u32 4294901760, %v421_v3  ;;  %v10831_v8 = vand.u32 4294901760, %v420_v4  ;;  %8889 = vmatprep.subr.mxu0 %v10553_v5  ;;  %v419_v29 = vld [vmem:[#allocation10 + $0x60] sm:$0xff]  ;;  %v418_v31 = vld [vmem:[#allocation10 + $0x58] sm:$0xff]  ;;  %v417_v34 = vld [vmem:[#allocation10 + $0x50] sm:$0xff] }
  0xa6   : > { %v10872_v30 = vand.u32 4294901760, %v419_v29  ;;  %v10877_v33 = vand.u32 4294901760, %v418_v31  ;;  %v10885_v37 = vand.u32 4294901760, %v417_v34  ;;  %v416_v38 = vld [vmem:[#allocation10 + $0x48] sm:$0xff]  ;;  %v415_v43 = vld [vmem:[#allocation10 + $0x40] sm:$0xff]  ;;  %v414_v49 = vld [vmem:[#allocation10 + $0x38] sm:$0xff]  ;;  %8956 = vmatprep.mubr.msk.f32.mxu1 %vm10554_vm0, %v10553_v5  ;;  %8921 = vmatprep.mubr.msk.f32.mxu0 %vm10554_vm0, %v10553_v5 }
  0xa7   : > { %v10835_v9 = vsub.f32 %v422_v2, %v10827_v6  ;;  %v10838_v10 = vsub.f32 %v421_v3, %v10829_v7  ;;  %v10841_v11 = vsub.f32 %v420_v4, %v10831_v8  ;;  %8890 = vmatpush3.msra.mxu0 %v10827_v6  ;;  %v10896_v42 = vand.u32 4294901760, %v416_v38  ;;  %v413_v55 = vld [vmem:[#allocation10 + $0x30] sm:$0xff]  ;;  %v412_v61 = vld [vmem:[#allocation10 + $0x28] sm:$0xff]  ;;  %v411_v3 = vld [vmem:[#allocation10 + $0x20] sm:$0xff]  ;;  %s10557_s15 = smov 32   ;;  %s8238_s10 = sshll.u32 %s10617_s25, 7 }
  0xa8   : > { %8891 = vmatprep.subr.mxu0 %v10553_v5  ;;  %v10875_v32 = vsub.f32 %v419_v29, %v10872_v30  ;;  %v10883_v36 = vsub.f32 %v418_v31, %v10877_v33  ;;  %v10894_v41 = vsub.f32 %v417_v34, %v10885_v37  ;;  %v10908_v48 = vand.u32 4294901760, %v415_v43  ;;  %v410_v4 = vld [vmem:[#allocation10 + $0x18] sm:$0xff]  ;;  %s381_s24 = scalar_lea.vmem [#allocation13], %s10803_s8  ;;  %s8059_s20 = scalar_lea.hbm %s12945_s6, %s8238_s10 }
  0xa9   : > { %v522_v12 = vand.u32 4294901760, %v10835_v9  ;;  %v529_v13 = vand.u32 4294901760, %v10838_v10  ;;  %v536_v14 = vand.u32 4294901760, %v10841_v11  ;;  %8892 = vmatpush3.msra.mxu0 %v10829_v7  ;;  %v10905_v47 = vsub.f32 %v416_v38, %v10896_v42  ;;  %s8061_s28 = sshll.u32 %s381_s24, 4  ;;  %s8048_s26 = scalar_lea.sflag [#allocation4], %s10800_s14  ;;  %s8062_s28 = int_to_ptr.vmem [resolvable:$true] %s8061_s28 }
  0xaa   : > { %8893 = vmatprep.subr.mxu0 %v10553_v5  ;;  %v543_v35 = vand.u32 4294901760, %v10875_v32  ;;  %v550_v40 = vand.u32 4294901760, %v10883_v36  ;;  %v557_v46 = vand.u32 4294901760, %v10894_v41  ;;  %v10915_v53 = vand.u32 4294901760, %v414_v49  ;;  %s10467_s17 = scalar_lea.vmem %s8062_s28, 128  ;;  %p12999_p7 = scmp.ne.s32.totalorder %s12978_s18, 0 }
  0xab   : > { %v523_v15 = vsub.f32 %v10835_v9, %v522_v12  ;;  %v530_v16 = vsub.f32 %v10838_v10, %v529_v13  ;;  %v537_v17 = vsub.f32 %v10841_v11, %v536_v14  ;;  %8894 = vmatpush3.msra.mxu0 %v10831_v8  ;;  %v564_v52 = vand.u32 4294901760, %v10905_v47  ;;  %p10468_p12 = scmp.ne.s32.totalorder %s8062_s28, %s10467_s17  ;;  %s10560_s11 = smov [#allocation13]  }
  0xac   : > { %8895 = vmatprep.subr.mxu0 %v10553_v5  ;;  %v544_v39 = vsub.f32 %v10875_v32, %v543_v35  ;;  %v551_v45 = vsub.f32 %v10883_v36, %v550_v40  ;;  %v558_v51 = vsub.f32 %v10894_v41, %v557_v46  ;;  %v10919_v54 = vsub.f32 %v415_v43, %v10908_v48  ;;  %s10471_s7 = sshll.u32 %s10560_s11, 4  ;;  %s10472_s7 = int_to_ptr.vmem [resolvable:$false] %s10471_s7 }
  0xad   : > { %v524_v18 = vand.u32 4294901760, %v523_v15  ;;  %v531_v19 = vand.u32 4294901760, %v530_v16  ;;  %v538_v20 = vand.u32 4294901760, %v537_v17  ;;  %8896 = vmatpush3.msra.mxu0 %v10872_v30  ;;  %v565_v57 = vsub.f32 %v10905_v47, %v564_v52  ;;  %p10469_p0 = pnand %p10468_p12, %p12999_p7  ;;  %s10473_s25 = scalar_lea.vmem %s10472_s7, 256 }
  0xae   : > { %8897 = vmatprep.subr.mxu0 %v10553_v5  ;;  %v545_v44 = vand.u32 4294901760, %v544_v39  ;;  %v552_v50 = vand.u32 4294901760, %v551_v45  ;;  %v559_v56 = vand.u32 4294901760, %v558_v51  ;;  %v10926_v58 = vsub.f32 %v414_v49, %v10915_v53  ;;  %p10474_p6 = scmp.lt.s32.totalorder %s8062_s28, %s10472_s7  ;;  %p10475_p4 = scmp.lt.s32.totalorder %s10473_s25, %s10467_s17 }
  0xaf   : > { %8925 = vmatpush3.msra.mxu1 %v524_v18  ;;  %8898 = vmatpush3.msra.mxu0 %v10877_v33  ;;  %v10928_v59 = vand.u32 4294901760, %v413_v55  ;;  %v571_v60 = vand.u32 4294901760, %v10919_v54  ;;  %v566_v62 = vand.u32 4294901760, %v565_v57  ;;  %v10942_v2 = vand.u32 4294901760, %v412_v61  ;;  %v409_v18 = vld [vmem:[#allocation10 + $0x10] sm:$0xff]  ;;  %p10470_p3 = pneg %p10469_p0 }
  0xb0   : > { %8926 = vmatprep.subr.mxu1 %v10553_v5  ;;  %8899 = vmatprep.subr.mxu0 %v10553_v5  ;;  %v578_v63 = vand.u32 4294901760, %v10926_v58  ;;  %v10950_v16 = vand.u32 4294901760, %v411_v3  ;;  %v10952_v17 = vand.u32 4294901760, %v410_v4  ;;  %vm4547_vm2 = vcmask 64512   ;;  %p10476_p8 = por %p10475_p4, %p10474_p6 }
  0xb1   : > { %8927 = vmatpush3.msra.mxu1 %v531_v19  ;;  %8900 = vmatpush3.msra.mxu0 %v10885_v37  ;;  %v572_v15 = vsub.f32 %v10919_v54, %v571_v60  ;;  %v408_v19 = vld [vmem:[#allocation10 + $0x8] sm:$0xff]  ;;  %vm7357_vm3 = vcmask 523264   ;;  %vm7359_vm4 = vcmask 785408  }
  0xb2   : > { %8928 = vmatprep.subr.mxu1 %v10553_v5  ;;  %8901 = vmatprep.subr.mxu0 %v10553_v5  ;;  %v10969_v29 = vsub.f32 %v410_v4, %v10952_v17  ;;  %v10972_v31 = vand.u32 4294901760, %v408_v19  ;;  %p10477_p11 = pnand %p10476_p8, %p10470_p3 }
  0xb3   : > { %8929 = vmatpush3.msra.mxu1 %v538_v20  ;;  %8902 = vmatpush3.msra.mxu0 %v10896_v42  ;;  %v579_v20 = vsub.f32 %v10926_v58, %v578_v63 }
  0xb4   : > { %8930 = vmatprep.subr.mxu1 %v10553_v5  ;;  %8903 = vmatprep.subr.mxu0 %v10553_v5  ;;  %v606_v45 = vand.u32 4294901760, %v10969_v29  ;;  %v10987_v49 = vsub.f32 %v408_v19, %v10972_v31 }
  0xb5   : > { %8931 = vmatpush3.msra.mxu1 %v545_v44  ;;  %8904 = vmatpush3.msra.mxu0 %v10908_v48  ;;  %v580_v34 = vand.u32 4294901760, %v579_v20 }
  0xb6   : > { %8932 = vmatprep.subr.mxu1 %v10553_v5  ;;  %8905 = vmatprep.subr.mxu0 %v10553_v5 }
  0xb7   : > { %8933 = vmatpush3.msra.mxu1 %v552_v50  ;;  %8906 = vmatpush3.msra.mxu0 %v10915_v53 }
  0xb8   : > { %8934 = vmatprep.subr.mxu1 %v10553_v5  ;;  %8907 = vmatprep.subr.mxu0 %v10553_v5 }
  0xb9   : > { %8935 = vmatpush3.msra.mxu1 %v559_v56  ;;  %8908 = vmatpush3.msra.mxu0 %v10928_v59 }
  0xba   : > { %8936 = vmatprep.subr.mxu1 %v10553_v5  ;;  %8909 = vmatprep.subr.mxu0 %v10553_v5 }
  0xbb   : > { %8937 = vmatpush3.msra.mxu1 %v566_v62  ;;  %8910 = vmatpush3.msra.mxu0 %v10942_v2  ;;  %v620_v62 = vand.u32 4294901760, %v10987_v49 }
  0xbc   : > { %8938 = vmatprep.subr.mxu1 %v10553_v5  ;;  %8911 = vmatprep.subr.mxu0 %v10553_v5 }
  0xbd   : > { %8912 = vmatpush3.msra.mxu0 %v10950_v16 }
  0xbe   : > { %8913 = vmatprep.subr.mxu0 %v10553_v5 }
  0xbf   : > { %8914 = vmatpush3.msra.mxu0 %v10952_v17 }
  0xc0   : > { %8915 = vmatprep.subr.mxu0 %v10553_v5 }
 0x12d   : > { %v1073_v21 = vpop.xlane.xlu1 %1072  ;;  %v386_v22 = vpop.xlane.xlu0 %385 }
 0x12e   : > { %v1074_v23 = vmul.f32 0.0078125, %v1073_v21  ;;  %v388_v24 = vmul.f32 0.0078125, %v386_v22  ;;  %v10959_v22 = vsub.f32 %v412_v61, %v10942_v2  ;;  %v607_v61 = vsub.f32 %v10969_v29, %v606_v45 }
 0x130   : > { %v10864_v25 = vsub.f32 %v1069_v0, %v1074_v23  ;;  %v10866_v26 = vsub.f32 %v382_v1, %v388_v24  ;;  %v10937_v0 = vld [vmem:[%s331_s16] sm:$0xff]  ;;  %v10940_v1 = vsub.f32 %v413_v55, %v10928_v59  ;;  %v10962_v23 = vand.u32 4294901760, %v409_v18 }
 0x131   : > { %v407_v24 = vld [vmem:[#allocation10] sm:$0xff]  ;;  %v592_v39 = vand.u32 4294901760, %v10959_v22  ;;  %v608_v20 = vand.u32 4294901760, %v607_v61 }
 0x132   : > { %v1076_v27 = vmul.f32 %v10864_v25, %v10864_v25  ;;  %v390_v28 = vmul.f32 %v10866_v26, %v10866_v26  ;;  %v585_v21 = vand.u32 4294901760, %v10940_v1  ;;  %v10979_v43 = vsub.f32 %v409_v18, %v10962_v23  ;;  %8916 = vmatpush3.msra.mxu0 %v10962_v23 }
 0x133   : > { %v10990_v50 = vand.u32 4294901760, %v407_v24  ;;  %v593_v55 = vsub.f32 %v10959_v22, %v592_v39  ;;  %8917 = vmatprep.subr.mxu0 %v10553_v5 }
 0x134   : > { %1077 = vadd.xlane.f32.xlu1 %v1076_v27  ;;  %391 = vadd.xlane.f32.xlu0 %v390_v28  ;;  %v573_v27 = vand.u32 4294901760, %v572_v15  ;;  %v10966_v28 = vsub.f32 %v411_v3, %v10950_v16  ;;  %v586_v38 = vsub.f32 %v10940_v1, %v585_v21  ;;  %v613_v56 = vand.u32 4294901760, %v10979_v43 }
 0x135   : > { %v11006_v3 = vsub.f32 %v407_v24, %v10990_v50  ;;  %v594_v4 = vand.u32 4294901760, %v593_v55  ;;  %v621_v24 = vsub.f32 %v10987_v49, %v620_v62  ;;  %8918 = vmatpush3.msra.mxu0 %v10972_v31 }
 0x136   : > { %8939 = vmatpush3.msra.mxu1 %v573_v27  ;;  %v599_v44 = vand.u32 4294901760, %v10966_v28  ;;  %v587_v51 = vand.u32 4294901760, %v586_v38  ;;  %v614_v18 = vsub.f32 %v10979_v43, %v613_v56  ;;  %8919 = vmatprep.subr.mxu0 %v10553_v5 }
 0x137   : > { %8940 = vmatprep.subr.mxu1 %v10553_v5  ;;  %v627_v19 = vand.u32 4294901760, %v11006_v3  ;;  %8920 = vmatpush3.msra.mxu0 %v10990_v50  ;;  %v622_v38 = vand.u32 4294901760, %v621_v24 }
 0x138   : > { %1759 = vadd.xlane.f32.xlu0 %v10937_v0  ;;  %8941 = vmatpush3.msra.mxu1 %v580_v34  ;;  %v600_v57 = vsub.f32 %v10966_v28, %v599_v44  ;;  %v615_v27 = vand.u32 4294901760, %v614_v18 }
 0x139   : > { %8942 = vmatprep.subr.mxu1 %v10553_v5  ;;  %v628_v34 = vsub.f32 %v11006_v3, %v627_v19  ;;  %8959 = vmatprep.subr.mxu0 %v10553_v5 }
 0x13a   : > { %8943 = vmatpush3.msra.mxu1 %v587_v51  ;;  %v601_v15 = vand.u32 4294901760, %v600_v57 }
 0x13b   : > { %8944 = vmatprep.subr.mxu1 %v10553_v5  ;;  %v629_v51 = vand.u32 4294901760, %v628_v34 }
 0x13c   : > { %8945 = vmatpush3.msra.mxu1 %v594_v4 }
 0x13d   : > { %8946 = vmatprep.subr.mxu1 %v10553_v5 }
 0x13e   : > { %8947 = vmatpush3.msra.mxu1 %v601_v15  ;;  %v8223_v15 = vld [vmem:[#allocation8] ss:$0 sm:$0xff] }
 0x13f   : > { %8948 = vmatprep.subr.mxu1 %v10553_v5 }
 0x140   : > { %8949 = vmatpush3.msra.mxu1 %v608_v20  ;;  %v8224_v20 = vld [vmem:[#allocation8 + $0x1] ss:$0 sm:$0xff] }
 0x141   : > { %8950 = vmatprep.subr.mxu1 %v10553_v5 }
 0x142   : > { %8951 = vmatpush3.msra.mxu1 %v615_v27 }
 0x143   : > { %8952 = vmatprep.subr.mxu1 %v10553_v5 }
 0x144   : > { %8953 = vmatpush3.msra.mxu1 %v622_v38 }
 0x145   : > { %8954 = vmatprep.subr.mxu1 %v10553_v5 }
 0x146   : > { %8955 = vmatpush3.msra.mxu1 %v629_v51 }
 0x147   : > { %8994 = vmatprep.subr.mxu1 %v10553_v5 }
 0x1bd   : > { %v392_v55 = vpop.xlane.xlu0 %391 }
 0x1be   : > { %v393_v57 = vmul.f32 0.0078125, %v392_v55 }
 0x1c0   : > { %v394_v61 = vadd.f32 1e-05, %v393_v57 }
 0x1c2   : > { %10281 = vrsqrt.f32 %v394_v61 }
 0x1cf   : > { %v10282_v4 = vpop.eup %10281 }
 0x1d0   : > { %v396_v18 = vmul.f32 %v10282_v4, %v10866_v26  ;;  %v1099_v4 = vld [vmem:[#allocation10 + $0xa8] sm:$0xff] }
 0x1d2   : > { %v401_v24 = vmul.f32 %v8223_v15, %v396_v18 }
 0x1d4   : > { %v406_v27 = vadd.f32 %v8224_v20, %v401_v24  ;;  %v1098_v24 = vld [vmem:[#allocation10 + $0xa0] sm:$0xff] }
 0x1d6   : > { %v11038_v34 = vand.u32 4294901760, %v406_v27 }
 0x1d8   : > { %8957 = vmatmul.mubr.f32.vlgmr.msra.gmra.mxu1 %v11038_v34  ;;  %v11042_v38 = vsub.f32 %v406_v27, %v11038_v34 }
 0x1d9   : > { %8995 = vmatpush3.msra.mxu1 %v10827_v6  ;;  %9026 = vmatprep.mubr.msk.f32.mxu1 %vm10554_vm0, %v10553_v5 }
 0x1da   : > { %8996 = vmatprep.subr.mxu1 %v10553_v5  ;;  %v511_v51 = vand.u32 4294901760, %v11042_v38 }
 0x1db   : > { %8997 = vmatpush3.msra.mxu1 %v10829_v7 }
 0x1dc   : > { %8998 = vmatprep.subr.mxu1 %v10553_v5  ;;  %v512_v26 = vsub.f32 %v11042_v38, %v511_v51 }
 0x1dd   : > { %8999 = vmatpush3.msra.mxu1 %v10831_v8 }
 0x1de   : > { %9000 = vmatprep.subr.mxu1 %v10553_v5  ;;  %v513_v55 = vand.u32 4294901760, %v512_v26 }
 0x1df   : > { %9001 = vmatpush3.msra.mxu1 %v10872_v30 }
 0x1e0   : > { %9002 = vmatprep.subr.mxu1 %v10553_v5  ;;  %8922 = vmatmul.mubr.f32.vlgmr.msra.gmra.mxu0 %v513_v55  ;;  %v11274_v55 = vand.u32 4294901760, %v1098_v24 }
 0x1e1   : > { %8960 = vmatpush3.msra.mxu0 %v10835_v9  ;;  %9003 = vmatpush3.msra.mxu1 %v10877_v33  ;;  %v1107_v9 = vld [vmem:[#allocation10 + $0xe8] sm:$0xff] }
 0x1e2   : > { %8961 = vmatprep.subr.mxu0 %v10553_v5  ;;  %9004 = vmatprep.subr.mxu1 %v10553_v5 }
 0x1e3   : > { %8962 = vmatpush3.msra.mxu0 %v10838_v10  ;;  %9005 = vmatpush3.msra.mxu1 %v10885_v37 }
 0x1e4   : > { %8963 = vmatprep.subr.mxu0 %v10553_v5  ;;  %9006 = vmatprep.subr.mxu1 %v10553_v5 }
 0x1e5   : > { %8964 = vmatpush3.msra.mxu0 %v10841_v11  ;;  %9007 = vmatpush3.msra.mxu1 %v10896_v42  ;;  %v1106_v11 = vld [vmem:[#allocation10 + $0xe0] sm:$0xff] }
 0x1e6   : > { %8965 = vmatprep.subr.mxu0 %v10553_v5  ;;  %9008 = vmatprep.subr.mxu1 %v10553_v5 }
 0x1e7   : > { %8966 = vmatpush3.msra.mxu0 %v10875_v32  ;;  %9009 = vmatpush3.msra.mxu1 %v10908_v48  ;;  %v11167_v32 = vand.u32 4294901760, %v1106_v11 }
 0x1e8   : > { %8967 = vmatprep.subr.mxu0 %v10553_v5  ;;  %9010 = vmatprep.subr.mxu1 %v10553_v5 }
 0x1e9   : > { %8968 = vmatpush3.msra.mxu0 %v10883_v36  ;;  %9011 = vmatpush3.msra.mxu1 %v10915_v53 }
 0x1ea   : > { %8969 = vmatprep.subr.mxu0 %v10553_v5  ;;  %9012 = vmatprep.subr.mxu1 %v10553_v5 }
 0x1eb   : > { %8970 = vmatpush3.msra.mxu0 %v10894_v41  ;;  %9013 = vmatpush3.msra.mxu1 %v10928_v59 }
 0x1ec   : > { %8971 = vmatprep.subr.mxu0 %v10553_v5  ;;  %9014 = vmatprep.subr.mxu1 %v10553_v5 }
 0x1ed   : > { %8972 = vmatpush3.msra.mxu0 %v10905_v47  ;;  %9015 = vmatpush3.msra.mxu1 %v10942_v2  ;;  %v11187_v47 = vsub.f32 %v1106_v11, %v11167_v32 }
 0x1ee   : > { %8973 = vmatprep.subr.mxu0 %v10553_v5  ;;  %9016 = vmatprep.subr.mxu1 %v10553_v5 }
 0x1ef   : > { %8974 = vmatpush3.msra.mxu0 %v10919_v54  ;;  %9017 = vmatpush3.msra.mxu1 %v10950_v16 }
 0x1f0   : > { %8975 = vmatprep.subr.mxu0 %v10553_v5  ;;  %9018 = vmatprep.subr.mxu1 %v10553_v5 }
 0x1f1   : > { %8976 = vmatpush3.msra.mxu0 %v10926_v58  ;;  %9019 = vmatpush3.msra.mxu1 %v10952_v17 }
 0x1f2   : > { %8977 = vmatprep.subr.mxu0 %v10553_v5  ;;  %9020 = vmatprep.subr.mxu1 %v10553_v5 }
 0x1f3   : > { %8978 = vmatpush3.msra.mxu0 %v10940_v1  ;;  %9021 = vmatpush3.msra.mxu1 %v10962_v23  ;;  %v1230_v1 = vand.u32 4294901760, %v11187_v47 }
 0x1f4   : > { %8979 = vmatprep.subr.mxu0 %v10553_v5  ;;  %9022 = vmatprep.subr.mxu1 %v10553_v5 }
 0x1f5   : > { %8980 = vmatpush3.msra.mxu0 %v10959_v22  ;;  %9023 = vmatpush3.msra.mxu1 %v10972_v31 }
 0x1f6   : > { %8981 = vmatprep.subr.mxu0 %v10553_v5  ;;  %9024 = vmatprep.subr.mxu1 %v10553_v5 }
 0x1f7   : > { %8982 = vmatpush3.msra.mxu0 %v10966_v28  ;;  %9025 = vmatpush3.msra.mxu1 %v10990_v50 }
 0x1f8   : > { %8983 = vmatprep.subr.mxu0 %v10553_v5  ;;  %9027 = vmatmul.mubr.f32.vlgmr.msra.gmra.mxu1 %v511_v51 }
 0x1f9   : > { %9064 = vmatprep.subr.mxu1 %v10553_v5  ;;  %8984 = vmatpush3.msra.mxu0 %v10969_v29 }
 0x1fa   : > { %9065 = vmatpush3.msra.mxu1 %v10827_v6  ;;  %8985 = vmatprep.subr.mxu0 %v10553_v5  ;;  %v1109_v6 = vld [vmem:[#allocation10 + $0xf8] sm:$0xff] }
 0x1fb   : > { %9066 = vmatprep.subr.mxu1 %v10553_v5  ;;  %8986 = vmatpush3.msra.mxu0 %v10979_v43  ;;  %v1097_v43 = vld [vmem:[#allocation10 + $0x98] sm:$0xff] }
 0x1fc   : > { %9067 = vmatpush3.msra.mxu1 %v10829_v7  ;;  %8987 = vmatprep.subr.mxu0 %v10553_v5  ;;  %v1108_v7 = vld [vmem:[#allocation10 + $0xf0] sm:$0xff]  ;;  %v11287_v11 = vand.u32 4294901760, %v1097_v43 }
 0x1fd   : > { %9068 = vmatprep.subr.mxu1 %v10553_v5  ;;  %8988 = vmatpush3.msra.mxu0 %v10987_v49  ;;  %v11147_v10 = vand.u32 4294901760, %v1108_v7 }
 0x1fe   : > { %9069 = vmatpush3.msra.mxu1 %v10831_v8  ;;  %8989 = vmatprep.subr.mxu0 %v10553_v5  ;;  %v11140_v8 = vand.u32 4294901760, %v1109_v6 }
 0x1ff   : > { %9070 = vmatprep.subr.mxu1 %v10553_v5  ;;  %8990 = vmatpush3.msra.mxu0 %v11006_v3  ;;  %v1095_v3 = vld [vmem:[#allocation10 + $0x88] sm:$0xff] }
 0x200   : > { %8991 = vmatprep.mubr.msk.f32.mxu0 %vm10554_vm0, %v10553_v5  ;;  %9071 = vmatpush3.msra.mxu1 %v10872_v30  ;;  %v11165_v30 = vsub.f32 %v1108_v7, %v11147_v10  ;;  %v1096_v7 = vld [vmem:[#allocation10 + $0x90] sm:$0xff] }
 0x201   : > { %8992 = vmatmul.mubr.f32.vlgmr.msra.gmra.mxu0 %v11042_v38  ;;  %9029 = vmatprep.subr.mxu0 %v10553_v5 }
 0x202   : > { %9072 = vmatprep.subr.mxu1 %v10553_v5  ;;  %9030 = vmatpush3.msra.mxu0 %v522_v12  ;;  %v1078_v12 = vpop.xlane.xlu1 %1077 }
 0x203   : > { %9073 = vmatpush3.msra.mxu1 %v10877_v33  ;;  %9031 = vmatprep.subr.mxu0 %v10553_v5  ;;  %v1105_v33 = vld [vmem:[#allocation10 + $0xd8] sm:$0xff] }
 0x204   : > { %9074 = vmatprep.subr.mxu1 %v10553_v5  ;;  %9032 = vmatpush3.msra.mxu0 %v529_v13  ;;  %v11155_v13 = vsub.f32 %v1109_v6, %v11140_v8  ;;  %v11180_v41 = vand.u32 4294901760, %v1105_v33 }
 0x205   : > { %9075 = vmatpush3.msra.mxu1 %v10885_v37  ;;  %9033 = vmatprep.subr.mxu0 %v10553_v5 }
 0x206   : > { %9076 = vmatprep.subr.mxu1 %v10553_v5  ;;  %9034 = vmatpush3.msra.mxu0 %v536_v14  ;;  %v11157_v14 = vand.u32 4294901760, %v1107_v9  ;;  %v1209_v36 = vand.u32 4294901760, %v11155_v13 }
 0x207   : > { %9077 = vmatpush3.msra.mxu1 %v10896_v42  ;;  %9035 = vmatprep.subr.mxu0 %v10553_v5  ;;  %v1103_v42 = vld [vmem:[#allocation10 + $0xc8] sm:$0xff] }
 0x208   : > { %9078 = vmatprep.subr.mxu1 %v10553_v5  ;;  %9036 = vmatpush3.msra.mxu0 %v543_v35  ;;  %v1079_v35 = vmul.f32 0.0078125, %v1078_v12  ;;  %v11176_v37 = vsub.f32 %v1107_v9, %v11157_v14  ;;  %v1210_v54 = vsub.f32 %v11155_v13, %v1209_v36 }
 0x209   : > { %9079 = vmatpush3.msra.mxu1 %v10908_v48  ;;  %9037 = vmatprep.subr.mxu0 %v10553_v5 }
 0x20a   : > { %9080 = vmatprep.subr.mxu1 %v10553_v5  ;;  %9038 = vmatpush3.msra.mxu0 %v550_v40  ;;  %v1104_v40 = vld [vmem:[#allocation10 + $0xd0] sm:$0xff]  ;;  %v1080_v48 = vadd.f32 1e-05, %v1079_v35  ;;  %v1223_v58 = vand.u32 4294901760, %v11176_v37  ;;  %v1211_v22 = vand.u32 4294901760, %v1210_v54  ;;  %v11298_v35 = vsub.f32 %v1098_v24, %v11274_v55 }
 0x20b   : > { %9081 = vmatpush3.msra.mxu1 %v10915_v53  ;;  %9039 = vmatprep.subr.mxu0 %v10553_v5  ;;  %v1102_v53 = vld [vmem:[#allocation10 + $0xc0] sm:$0xff] }
 0x20c   : > { %9082 = vmatprep.subr.mxu1 %v10553_v5  ;;  %9040 = vmatpush3.msra.mxu0 %v557_v46  ;;  %v1216_v46 = vand.u32 4294901760, %v11165_v30  ;;  %10283 = vrsqrt.f32 %v1080_v48 }
 0x20d   : > { %9083 = vmatpush3.msra.mxu1 %v10928_v59  ;;  %9041 = vmatprep.subr.mxu0 %v10553_v5  ;;  %v11200_v59 = vand.u32 4294901760, %v1103_v42 }
 0x20e   : > { %9084 = vmatprep.subr.mxu1 %v10553_v5  ;;  %9042 = vmatpush3.msra.mxu0 %v564_v52  ;;  %v11191_v52 = vand.u32 4294901760, %v1104_v40 }
 0x20f   : > { %9085 = vmatpush3.msra.mxu1 %v10942_v2  ;;  %9043 = vmatprep.subr.mxu0 %v10553_v5  ;;  %v11214_v2 = vand.u32 4294901760, %v1102_v53 }
 0x210   : > { %9086 = vmatprep.subr.mxu1 %v10553_v5  ;;  %9044 = vmatpush3.msra.mxu0 %v571_v60  ;;  %v11205_v60 = vsub.f32 %v1105_v33, %v11180_v41 }
 0x211   : > { %9087 = vmatpush3.msra.mxu1 %v10950_v16  ;;  %9045 = vmatprep.subr.mxu0 %v10553_v5  ;;  %v1101_v16 = vld [vmem:[#allocation10 + $0xb8] sm:$0xff]  ;;  %v11242_v61 = vsub.f32 %v1102_v53, %v11214_v2  ;;  %v1094_v53 = vld [vmem:[#allocation10 + $0x80] sm:$0xff] }
 0x212   : > { %9088 = vmatprep.subr.mxu1 %v10553_v5  ;;  %9046 = vmatpush3.msra.mxu0 %v578_v63  ;;  %v1217_v63 = vsub.f32 %v11165_v30, %v1216_v46  ;;  %v11234_v57 = vand.u32 4294901760, %v1101_v16 }
 0x213   : > { %9089 = vmatpush3.msra.mxu1 %v10952_v17  ;;  %9047 = vmatprep.subr.mxu0 %v10553_v5  ;;  %v11219_v17 = vsub.f32 %v1104_v40, %v11191_v52  ;;  %v1258_v51 = vand.u32 4294901760, %v11242_v61  ;;  %v11300_v40 = vand.u32 4294901760, %v1096_v7 }
 0x214   : > { %9090 = vmatprep.subr.mxu1 %v10553_v5  ;;  %9048 = vmatpush3.msra.mxu0 %v585_v21  ;;  %v1100_v21 = vld [vmem:[#allocation10 + $0xb0] sm:$0xff]  ;;  %v1218_v28 = vand.u32 4294901760, %v1217_v63  ;;  %v11259_v29 = vsub.f32 %v1101_v16, %v11234_v57  ;;  %v11310_v63 = vsub.f32 %v1097_v43, %v11287_v11  ;;  %v11312_v16 = vand.u32 4294901760, %v1095_v3 }
 0x215   : > { %9091 = vmatpush3.msra.mxu1 %v10962_v23  ;;  %9049 = vmatprep.subr.mxu0 %v10553_v5  ;;  %v1224_v23 = vsub.f32 %v11176_v37, %v1223_v58  ;;  %v1244_v15 = vand.u32 4294901760, %v11219_v17  ;;  %v1259_v12 = vsub.f32 %v11242_v61, %v1258_v51 }
 0x216   : > { %9092 = vmatprep.subr.mxu1 %v10553_v5  ;;  %9050 = vmatpush3.msra.mxu0 %v592_v39  ;;  %v11228_v39 = vsub.f32 %v1103_v42, %v11200_v59  ;;  %v11335_v43 = vsub.f32 %v1095_v3, %v11312_v16 }
 0x217   : > { %9093 = vmatpush3.msra.mxu1 %v10972_v31  ;;  %9051 = vmatprep.subr.mxu0 %v10553_v5  ;;  %v1237_v31 = vand.u32 4294901760, %v11205_v60  ;;  %v1225_v18 = vand.u32 4294901760, %v1224_v23  ;;  %v1286_v23 = vand.u32 4294901760, %v11298_v35 }
 0x218   : > { %9094 = vmatprep.subr.mxu1 %v10553_v5  ;;  %9052 = vmatpush3.msra.mxu0 %v599_v44  ;;  %v1231_v44 = vsub.f32 %v11187_v47, %v1230_v1  ;;  %v1251_v20 = vand.u32 4294901760, %v11228_v39 }
 0x219   : > { %9095 = vmatpush3.msra.mxu1 %v10990_v50  ;;  %9096 = vmatprep.mubr.msk.f32.mxu1 %vm10554_vm0, %v10553_v5  ;;  %v11244_v50 = vand.u32 4294901760, %v1100_v21  ;;  %v1238_v27 = vsub.f32 %v11205_v60, %v1237_v31  ;;  %v10284_v42 = vpop.eup %10283 }
 0x21a   : > { %9053 = vmatprep.subr.mxu0 %v10553_v5  ;;  %9097 = vmatmul.mubr.f32.vlgmr.msra.gmra.mxu1 %v11038_v34  ;;  %v1232_v38 = vand.u32 4294901760, %v1231_v44  ;;  %v1252_v6 = vsub.f32 %v11228_v39, %v1251_v20  ;;  %v11324_v44 = vand.u32 4294901760, %v1094_v53 }
 0x21b   : > { %9134 = vmatprep.subr.mxu1 %v10553_v5  ;;  %9054 = vmatpush3.msra.mxu0 %v606_v45  ;;  %v11261_v45 = vand.u32 4294901760, %v1099_v4  ;;  %v11266_v26 = vsub.f32 %v1100_v21, %v11244_v50  ;;  %v1239_v49 = vand.u32 4294901760, %v1238_v27  ;;  %v1260_v21 = vand.u32 4294901760, %v1259_v12  ;;  %v8227_v12 = vld [vmem:[#allocation8 + $0x3] ss:$0 sm:$0xff] }
 0x21c   : > { %9135 = vmatpush3.msra.mxu1 %v1211_v22  ;;  %9055 = vmatprep.subr.mxu0 %v10553_v5  ;;  %v1253_v48 = vand.u32 4294901760, %v1252_v6 }
 0x21d   : > { %9136 = vmatprep.subr.mxu1 %v10553_v5  ;;  %9056 = vmatpush3.msra.mxu0 %v613_v56  ;;  %v1245_v56 = vsub.f32 %v11219_v17, %v1244_v15  ;;  %v11285_v9 = vsub.f32 %v1099_v4, %v11261_v45  ;;  %v1272_v33 = vand.u32 4294901760, %v11266_v26  ;;  %v1082_v4 = vmul.f32 %v10284_v42, %v10864_v25 }
 0x21e   : > { %9137 = vmatpush3.msra.mxu1 %v1218_v28  ;;  %9057 = vmatprep.subr.mxu0 %v10553_v5  ;;  %v11322_v28 = vsub.f32 %v1096_v7, %v11300_v40  ;;  %v11345_v7 = vsub.f32 %v1094_v53, %v11324_v44  ;;  %v1307_v42 = vand.u32 4294901760, %v11335_v43 }
 0x21f   : > { %9138 = vmatprep.subr.mxu1 %v10553_v5  ;;  %9058 = vmatpush3.msra.mxu0 %v620_v62  ;;  %v1265_v62 = vand.u32 4294901760, %v11259_v29  ;;  %v1279_v54 = vand.u32 4294901760, %v11285_v9  ;;  %v1273_v22 = vsub.f32 %v11266_v26, %v1272_v33 }
 0x220   : > { %9139 = vmatpush3.msra.mxu1 %v1225_v18  ;;  %9059 = vmatprep.subr.mxu0 %v10553_v5  ;;  %v8226_v18 = vld [vmem:[#allocation8 + $0x2] ss:$0 sm:$0xff]  ;;  %v1300_v6 = vand.u32 4294901760, %v11322_v28 }
 0x221   : > { %9140 = vmatprep.subr.mxu1 %v10553_v5  ;;  %9060 = vmatpush3.msra.mxu0 %v627_v19  ;;  %v1246_v19 = vand.u32 4294901760, %v1245_v56  ;;  %v1280_v27 = vsub.f32 %v11285_v9, %v1279_v54  ;;  %v1274_v25 = vand.u32 4294901760, %v1273_v22  ;;  %v1287_v56 = vsub.f32 %v11298_v35, %v1286_v23 }
 0x222   : > { %9061 = vmatprep.mubr.msk.f32.mxu0 %vm10554_vm0, %v10553_v5  ;;  %9141 = vmatpush3.msra.mxu1 %v1232_v38  ;;  %v1293_v38 = vand.u32 4294901760, %v11310_v63  ;;  %v1301_v53 = vsub.f32 %v11322_v28, %v1300_v6 }
 0x223   : > { %9062 = vmatmul.mubr.f32.vlgmr.msra.gmra.mxu0 %v11038_v34  ;;  %9099 = vmatprep.subr.mxu0 %v10553_v5  ;;  %v1266_v34 = vsub.f32 %v11259_v29, %v1265_v62  ;;  %v1281_v3 = vand.u32 4294901760, %v1280_v27 }
 0x224   : > { %9142 = vmatprep.subr.mxu1 %v10553_v5  ;;  %9100 = vmatpush3.msra.mxu0 %v11140_v8 }
 0x225   : > { %9143 = vmatpush3.msra.mxu1 %v1239_v49  ;;  %9101 = vmatprep.subr.mxu0 %v10553_v5  ;;  %v1267_v24 = vand.u32 4294901760, %v1266_v34  ;;  %v1087_v49 = vmul.f32 %v8226_v18, %v1082_v4  ;;  %v1314_v34 = vand.u32 4294901760, %v11345_v7  ;;  %v1308_v4 = vsub.f32 %v11335_v43, %v1307_v42 }
 0x226   : > { %9144 = vmatprep.subr.mxu1 %v10553_v5  ;;  %9102 = vmatpush3.msra.mxu0 %v11147_v10  ;;  %v1302_v18 = vand.u32 4294901760, %v1301_v53 }
 0x227   : > { %9145 = vmatpush3.msra.mxu1 %v1246_v19  ;;  %9103 = vmatprep.subr.mxu0 %v10553_v5  ;;  %v1294_v19 = vsub.f32 %v11310_v63, %v1293_v38 }
 0x228   : > { %9146 = vmatprep.subr.mxu1 %v10553_v5  ;;  %9104 = vmatpush3.msra.mxu0 %v11157_v14 }
 0x229   : > { %9147 = vmatpush3.msra.mxu1 %v1253_v48  ;;  %9105 = vmatprep.subr.mxu0 %v10553_v5  ;;  %v1288_v48 = vand.u32 4294901760, %v1287_v56  ;;  %v1295_v22 = vand.u32 4294901760, %v1294_v19 }
 0x22a   : > { %9148 = vmatprep.subr.mxu1 %v10553_v5  ;;  %9106 = vmatpush3.msra.mxu0 %v11167_v32 }
 0x22b   : > { %9149 = vmatpush3.msra.mxu1 %v1260_v21  ;;  %9107 = vmatprep.subr.mxu0 %v10553_v5  ;;  %v1092_v21 = vadd.f32 %v8227_v12, %v1087_v49 }
 0x22c   : > { %9150 = vmatprep.subr.mxu1 %v10553_v5  ;;  %9108 = vmatpush3.msra.mxu0 %v11180_v41 }
 0x22d   : > { %9151 = vmatpush3.msra.mxu1 %v1267_v24  ;;  %9109 = vmatprep.subr.mxu0 %v10553_v5  ;;  %v1315_v24 = vsub.f32 %v11345_v7, %v1314_v34  ;;  %v11373_v27 = vand.u32 4294901760, %v1092_v21 }
 0x22e   : > { %9152 = vmatprep.subr.mxu1 %v10553_v5  ;;  %9110 = vmatpush3.msra.mxu0 %v11191_v52 }
 0x22f   : > { %9153 = vmatpush3.msra.mxu1 %v1274_v25  ;;  %9111 = vmatprep.subr.mxu0 %v10553_v5  ;;  %v1309_v25 = vand.u32 4294901760, %v1308_v4  ;;  %v1316_v56 = vand.u32 4294901760, %v1315_v24  ;;  %v11382_v49 = vsub.f32 %v1092_v21, %v11373_v27 }
 0x230   : > { %9154 = vmatprep.subr.mxu1 %v10553_v5  ;;  %9112 = vmatpush3.msra.mxu0 %v11200_v59 }
 0x231   : > { %9155 = vmatpush3.msra.mxu1 %v1281_v3  ;;  %9113 = vmatprep.subr.mxu0 %v10553_v5  ;;  %v1198_v12 = vand.u32 4294901760, %v11382_v49 }
 0x232   : > { %9156 = vmatprep.subr.mxu1 %v10553_v5  ;;  %9114 = vmatpush3.msra.mxu0 %v11214_v2 }
 0x233   : > { %9157 = vmatpush3.msra.mxu1 %v1288_v48  ;;  %9115 = vmatprep.subr.mxu0 %v10553_v5  ;;  %v1199_v3 = vsub.f32 %v11382_v49, %v1198_v12  ;;  %v1760_v48 = vpop.xlane.xlu0 %1759 }
 0x234   : > { %9158 = vmatprep.subr.mxu1 %v10553_v5  ;;  %9116 = vmatpush3.msra.mxu0 %v11234_v57  ;;  %v1761_v53 = vmul.f32 0.0078125, %v1760_v48 }
 0x235   : > { %9159 = vmatpush3.msra.mxu1 %v1295_v22  ;;  %9117 = vmatprep.subr.mxu0 %v10553_v5  ;;  %v1200_v19 = vand.u32 4294901760, %v1199_v3  ;;  %v1785_v22 = vld [vmem:[#allocation10 + $0x120] sm:$0xff] }
 0x236   : > { %9160 = vmatprep.subr.mxu1 %v10553_v5  ;;  %9118 = vmatpush3.msra.mxu0 %v11244_v50  ;;  %v11455_v21 = vsub.f32 %v10937_v0, %v1761_v53  ;;  %v1782_v53 = vld [vmem:[#allocation10 + $0x108] sm:$0xff] }
 0x237   : > { %9161 = vmatpush3.msra.mxu1 %v1302_v18  ;;  %9119 = vmatprep.subr.mxu0 %v10553_v5 }
 0x238   : > { %9162 = vmatprep.subr.mxu1 %v10553_v5  ;;  %9120 = vmatpush3.msra.mxu0 %v11261_v45  ;;  %v1763_v0 = vmul.f32 %v11455_v21, %v11455_v21 }
 0x239   : > { %9163 = vmatpush3.msra.mxu1 %v1309_v25  ;;  %9121 = vmatprep.subr.mxu0 %v10553_v5  ;;  %v1784_v25 = vld [vmem:[#allocation10 + $0x118] sm:$0xff] }
 0x23a   : > { %9164 = vmatprep.subr.mxu1 %v10553_v5  ;;  %9122 = vmatpush3.msra.mxu0 %v11274_v55  ;;  %v11660_v48 = vand.u32 4294901760, %v1784_v25 }
 0x23b   : > { %9165 = vmatpush3.msra.mxu1 %v1316_v56  ;;  %9166 = vmatprep.mubr.msk.f32.mxu1 %vm10554_vm0, %v10553_v5 }
 0x23c   : > { %9123 = vmatprep.subr.mxu0 %v10553_v5  ;;  %9167 = vmatmul.mubr.f32.vlgmr.msra.gmra.mxu1 %v11373_v27 }
 0x23d   : > { %9204 = vmatprep.subr.mxu1 %v10553_v5  ;;  %9124 = vmatpush3.msra.mxu0 %v11287_v11 }
 0x23e   : > { %9205 = vmatpush3.msra.mxu1 %v11140_v8  ;;  %9125 = vmatprep.subr.mxu0 %v10553_v5 }
 0x23f   : > { %9206 = vmatprep.subr.mxu1 %v10553_v5  ;;  %9126 = vmatpush3.msra.mxu0 %v11300_v40 }
 0x240   : > { %9207 = vmatpush3.msra.mxu1 %v11147_v10  ;;  %9127 = vmatprep.subr.mxu0 %v10553_v5 }
 0x241   : > { %9208 = vmatprep.subr.mxu1 %v10553_v5  ;;  %9128 = vmatpush3.msra.mxu0 %v11312_v16 }
 0x242   : > { %9209 = vmatpush3.msra.mxu1 %v11157_v14  ;;  %9129 = vmatprep.subr.mxu0 %v10553_v5 }
 0x243   : > { %9210 = vmatprep.subr.mxu1 %v10553_v5  ;;  %9130 = vmatpush3.msra.mxu0 %v11324_v44 }
 0x244   : > { %9131 = vmatprep.mubr.msk.f32.mxu0 %vm10554_vm0, %v10553_v5  ;;  %9211 = vmatpush3.msra.mxu1 %v11167_v32 }
 0x245   : > { %9132 = vmatmul.mubr.f32.vlgmr.msra.gmra.mxu0 %v1200_v19  ;;  %9169 = vmatprep.subr.mxu0 %v10553_v5 }
 0x246   : > { %9212 = vmatprep.subr.mxu1 %v10553_v5  ;;  %9170 = vmatpush3.msra.mxu0 %v11155_v13 }
 0x247   : > { %9213 = vmatpush3.msra.mxu1 %v11180_v41  ;;  %9171 = vmatprep.subr.mxu0 %v10553_v5 }
 0x248   : > { %9214 = vmatprep.subr.mxu1 %v10553_v5  ;;  %9172 = vmatpush3.msra.mxu0 %v11165_v30  ;;  %v1794_v30 = vld [vmem:[#allocation10 + $0x168] sm:$0xff] }
 0x249   : > { %9215 = vmatpush3.msra.mxu1 %v11191_v52  ;;  %9173 = vmatprep.subr.mxu0 %v10553_v5 }
 0x24a   : > { %9216 = vmatprep.subr.mxu1 %v10553_v5  ;;  %9174 = vmatpush3.msra.mxu0 %v11176_v37  ;;  %v11532_v37 = vand.u32 4294901760, %v1794_v30 }
 0x24b   : > { %9217 = vmatpush3.msra.mxu1 %v11200_v59  ;;  %9175 = vmatprep.subr.mxu0 %v10553_v5 }
 0x24c   : > { %9218 = vmatprep.subr.mxu1 %v10553_v5  ;;  %9176 = vmatpush3.msra.mxu0 %v11187_v47 }
 0x24d   : > { %9219 = vmatpush3.msra.mxu1 %v11214_v2  ;;  %9177 = vmatprep.subr.mxu0 %v10553_v5 }
 0x24e   : > { %9220 = vmatprep.subr.mxu1 %v10553_v5  ;;  %9178 = vmatpush3.msra.mxu0 %v11205_v60 }
 0x24f   : > { %9221 = vmatpush3.msra.mxu1 %v11234_v57  ;;  %9179 = vmatprep.subr.mxu0 %v10553_v5 }
 0x250   : > { %9222 = vmatprep.subr.mxu1 %v10553_v5  ;;  %9180 = vmatpush3.msra.mxu0 %v11219_v17 }
 0x251   : > { %9223 = vmatpush3.msra.mxu1 %v11244_v50  ;;  %9181 = vmatprep.subr.mxu0 %v10553_v5 }
 0x252   : > { %9224 = vmatprep.subr.mxu1 %v10553_v5  ;;  %9182 = vmatpush3.msra.mxu0 %v11228_v39 }
 0x253   : > { %9225 = vmatpush3.msra.mxu1 %v11261_v45  ;;  %9183 = vmatprep.subr.mxu0 %v10553_v5 }
 0x254   : > { %9226 = vmatprep.subr.mxu1 %v10553_v5  ;;  %9184 = vmatpush3.msra.mxu0 %v11242_v61 }
 0x255   : > { %9227 = vmatpush3.msra.mxu1 %v11274_v55  ;;  %9185 = vmatprep.subr.mxu0 %v10553_v5 }
 0x256   : > { %9228 = vmatprep.subr.mxu1 %v10553_v5  ;;  %9186 = vmatpush3.msra.mxu0 %v11259_v29 }
 0x257   : > { %9229 = vmatpush3.msra.mxu1 %v11287_v11  ;;  %9187 = vmatprep.subr.mxu0 %v10553_v5 }
 0x258   : > { %9230 = vmatprep.subr.mxu1 %v10553_v5  ;;  %9188 = vmatpush3.msra.mxu0 %v11266_v26 }
 0x259   : > { %9231 = vmatpush3.msra.mxu1 %v11300_v40  ;;  %9189 = vmatprep.subr.mxu0 %v10553_v5 }
 0x25a   : > { %9232 = vmatprep.subr.mxu1 %v10553_v5  ;;  %9190 = vmatpush3.msra.mxu0 %v11285_v9  ;;  %v1787_v9 = vld [vmem:[#allocation10 + $0x130] sm:$0xff] }
 0x25b   : > { %9233 = vmatpush3.msra.mxu1 %v11312_v16  ;;  %9191 = vmatprep.subr.mxu0 %v10553_v5 }
 0x25c   : > { %9234 = vmatprep.subr.mxu1 %v10553_v5  ;;  %9192 = vmatpush3.msra.mxu0 %v11298_v35 }
 0x25d   : > { %9235 = vmatpush3.msra.mxu1 %v11324_v44  ;;  %9236 = vmatprep.mubr.msk.f32.mxu1 %vm10554_vm0, %v10553_v5 }
 0x25e   : > { %9193 = vmatprep.subr.mxu0 %v10553_v5  ;;  %9237 = vmatmul.mubr.f32.vlgmr.msra.gmra.mxu1 %v1198_v12 }
 0x25f   : > { %9274 = vmatprep.subr.mxu1 %v10553_v5  ;;  %9194 = vmatpush3.msra.mxu0 %v11310_v63 }
 0x260   : > { %9275 = vmatpush3.msra.mxu1 %v11140_v8  ;;  %9195 = vmatprep.subr.mxu0 %v10553_v5  ;;  %v1796_v8 = vld [vmem:[#allocation10 + $0x178] sm:$0xff] }
 0x261   : > { %9276 = vmatprep.subr.mxu1 %v10553_v5  ;;  %1764 = vadd.xlane.f32.xlu1 %v1763_v0  ;;  %v11512_v13 = vand.u32 4294901760, %v1796_v8 }
 0x262   : > { %9196 = vmatpush3.msra.mxu0 %v11322_v28  ;;  %9277 = vmatpush3.msra.mxu1 %v11147_v10  ;;  %v1795_v10 = vld [vmem:[#allocation10 + $0x170] sm:$0xff] }
 0x263   : > { %9197 = vmatprep.subr.mxu0 %v10553_v5  ;;  %9278 = vmatprep.subr.mxu1 %v10553_v5 }
 0x264   : > { %9198 = vmatpush3.msra.mxu0 %v11335_v43  ;;  %9279 = vmatpush3.msra.mxu1 %v11157_v14  ;;  %v11519_v14 = vand.u32 4294901760, %v1795_v10 }
 0x265   : > { %9199 = vmatprep.subr.mxu0 %v10553_v5  ;;  %9280 = vmatprep.subr.mxu1 %v10553_v5 }
 0x266   : > { %9200 = vmatpush3.msra.mxu0 %v11345_v7  ;;  %9201 = vmatprep.mubr.msk.f32.mxu0 %vm10554_vm0, %v10553_v5 }
 0x267   : > { %9281 = vmatpush3.msra.mxu1 %v11167_v32  ;;  %9202 = vmatmul.mubr.f32.vlgmr.msra.gmra.mxu0 %v11382_v49  ;;  %v11527_v32 = vsub.f32 %v1796_v8, %v11512_v13  ;;  %v11648_v49 = vand.u32 4294901760, %v1785_v22 }
 0x268   : > { %9239 = vmatprep.subr.mxu0 %v10553_v5  ;;  %9282 = vmatprep.subr.mxu1 %v10553_v5 }
 0x269   : > { %9240 = vmatpush3.msra.mxu0 %v1209_v36  ;;  %9283 = vmatpush3.msra.mxu1 %v11180_v41  ;;  %v1793_v36 = vld [vmem:[#allocation10 + $0x160] sm:$0xff]  ;;  %v11537_v41 = vsub.f32 %v1795_v10, %v11519_v14  ;;  %v11670_v10 = vsub.f32 %v1785_v22, %v11648_v49 }
 0x26a   : > { %9241 = vmatprep.subr.mxu0 %v10553_v5  ;;  %9284 = vmatprep.subr.mxu1 %v10553_v5  ;;  %v11542_v47 = vand.u32 4294901760, %v1793_v36 }
 0x26b   : > { %9242 = vmatpush3.msra.mxu0 %v1216_v46  ;;  %9285 = vmatpush3.msra.mxu1 %v11191_v52  ;;  %v1792_v46 = vld [vmem:[#allocation10 + $0x158] sm:$0xff]  ;;  %v1896_v52 = vand.u32 4294901760, %v11527_v32 }
 0x26c   : > { %9243 = vmatprep.subr.mxu0 %v10553_v5  ;;  %9286 = vmatprep.subr.mxu1 %v10553_v5  ;;  %v11553_v60 = vand.u32 4294901760, %v1792_v46  ;;  %v11562_v17 = vsub.f32 %v1793_v36, %v11542_v47 }
 0x26d   : > { %9244 = vmatpush3.msra.mxu0 %v1223_v58  ;;  %9287 = vmatpush3.msra.mxu1 %v11200_v59  ;;  %v1791_v58 = vld [vmem:[#allocation10 + $0x150] sm:$0xff]  ;;  %v11551_v59 = vsub.f32 %v1794_v30, %v11532_v37 }
 0x26e   : > { %9245 = vmatprep.subr.mxu0 %v10553_v5  ;;  %9288 = vmatprep.subr.mxu1 %v10553_v5  ;;  %v11564_v39 = vand.u32 4294901760, %v1791_v58 }
 0x26f   : > { %9246 = vmatpush3.msra.mxu0 %v1230_v1  ;;  %9289 = vmatpush3.msra.mxu1 %v11214_v2  ;;  %v1790_v1 = vld [vmem:[#allocation10 + $0x148] sm:$0xff]  ;;  %v1903_v2 = vand.u32 4294901760, %v11537_v41 }
 0x270   : > { %9247 = vmatprep.subr.mxu0 %v10553_v5  ;;  %9290 = vmatprep.subr.mxu1 %v10553_v5  ;;  %v11571_v61 = vand.u32 4294901760, %v1790_v1  ;;  %v11592_v26 = vsub.f32 %v1791_v58, %v11564_v39 }
 0x271   : > { %9248 = vmatpush3.msra.mxu0 %v1237_v31  ;;  %9291 = vmatpush3.msra.mxu1 %v11234_v57  ;;  %v1789_v31 = vld [vmem:[#allocation10 + $0x140] sm:$0xff]  ;;  %v1897_v57 = vsub.f32 %v11527_v32, %v1896_v52 }
 0x272   : > { %9249 = vmatprep.subr.mxu0 %v10553_v5  ;;  %9292 = vmatprep.subr.mxu1 %v10553_v5  ;;  %v11585_v29 = vand.u32 4294901760, %v1789_v31 }
 0x273   : > { %9250 = vmatpush3.msra.mxu0 %v1244_v15  ;;  %9293 = vmatpush3.msra.mxu1 %v11244_v50  ;;  %v1910_v50 = vand.u32 4294901760, %v11551_v59  ;;  %v11578_v15 = vsub.f32 %v1792_v46, %v11553_v60  ;;  %v1781_v46 = vld [vmem:[#allocation10 + $0x100] sm:$0xff] }
 0x274   : > { %9251 = vmatprep.subr.mxu0 %v10553_v5  ;;  %9294 = vmatprep.subr.mxu1 %v10553_v5 }
 0x275   : > { %9252 = vmatpush3.msra.mxu0 %v1251_v20  ;;  %9295 = vmatpush3.msra.mxu1 %v11261_v45  ;;  %v1904_v20 = vsub.f32 %v11537_v41, %v1903_v2  ;;  %v1788_v45 = vld [vmem:[#allocation10 + $0x138] sm:$0xff] }
 0x276   : > { %9253 = vmatprep.subr.mxu0 %v10553_v5  ;;  %9296 = vmatprep.subr.mxu1 %v10553_v5  ;;  %v11607_v35 = vand.u32 4294901760, %v1788_v45 }
 0x277   : > { %9254 = vmatpush3.msra.mxu0 %v1258_v51  ;;  %9297 = vmatpush3.msra.mxu1 %v11274_v55  ;;  %v1917_v51 = vand.u32 4294901760, %v11562_v17  ;;  %v1898_v55 = vand.u32 4294901760, %v1897_v57  ;;  %v11684_v57 = vand.u32 4294901760, %v1782_v53 }
 0x278   : > { %9255 = vmatprep.subr.mxu0 %v10553_v5  ;;  %9298 = vmatprep.subr.mxu1 %v10553_v5  ;;  %v11633_v4 = vsub.f32 %v1788_v45, %v11607_v35 }
 0x279   : > { %9256 = vmatpush3.msra.mxu0 %v1265_v62  ;;  %9299 = vmatpush3.msra.mxu1 %v11287_v11  ;;  %v11598_v62 = vsub.f32 %v1790_v1, %v11571_v61  ;;  %v1911_v11 = vsub.f32 %v11551_v59, %v1910_v50  ;;  %v1918_v63 = vsub.f32 %v11562_v17, %v1917_v51 }
 0x27a   : > { %9257 = vmatprep.subr.mxu0 %v10553_v5  ;;  %9300 = vmatprep.subr.mxu1 %v10553_v5  ;;  %v1952_v3 = vand.u32 4294901760, %v11633_v4  ;;  %v11706_v22 = vsub.f32 %v1782_v53, %v11684_v57 }
 0x27b   : > { %9258 = vmatpush3.msra.mxu0 %v1272_v33  ;;  %9301 = vmatpush3.msra.mxu1 %v11300_v40  ;;  %v1924_v33 = vand.u32 4294901760, %v11578_v15  ;;  %v1905_v40 = vand.u32 4294901760, %v1904_v20  ;;  %v1912_v28 = vand.u32 4294901760, %v1911_v11  ;;  %v1919_v43 = vand.u32 4294901760, %v1918_v63 }
 0x27c   : > { %9259 = vmatprep.subr.mxu0 %v10553_v5  ;;  %9302 = vmatprep.subr.mxu1 %v10553_v5  ;;  %v1953_v58 = vsub.f32 %v11633_v4, %v1952_v3  ;;  %v11696_v11 = vand.u32 4294901760, %v1781_v46 }
 0x27d   : > { %9260 = vmatpush3.msra.mxu0 %v1279_v54  ;;  %9303 = vmatpush3.msra.mxu1 %v11312_v16  ;;  %v11613_v54 = vsub.f32 %v1789_v31, %v11585_v29  ;;  %v1786_v16 = vld [vmem:[#allocation10 + $0x128] sm:$0xff]  ;;  %v11682_v31 = vsub.f32 %v1784_v25, %v11660_v48 }
 0x27e   : > { %9261 = vmatprep.subr.mxu0 %v10553_v5  ;;  %9304 = vmatprep.subr.mxu1 %v10553_v5  ;;  %v11635_v18 = vand.u32 4294901760, %v1786_v16 }
 0x27f   : > { %9262 = vmatpush3.msra.mxu0 %v1286_v23  ;;  %9305 = vmatpush3.msra.mxu1 %v11324_v44  ;;  %v1931_v23 = vand.u32 4294901760, %v11592_v26  ;;  %v11622_v44 = vand.u32 4294901760, %v1787_v9  ;;  %v1945_v24 = vand.u32 4294901760, %v11613_v54  ;;  %v12965_v63 = vand.u32 4294901760, %v11682_v31 }
 0x280   : > { %9306 = vmatprep.mubr.msk.f32.mxu1 %vm10554_vm0, %v10553_v5  ;;  %9263 = vmatprep.subr.mxu0 %v10553_v5  ;;  %v11658_v19 = vsub.f32 %v1786_v16, %v11635_v18 }
 0x281   : > { %9307 = vmatmul.mubr.f32.vlgmr.msra.gmra.mxu1 %v11373_v27  ;;  %9264 = vmatpush3.msra.mxu0 %v1293_v38  ;;  %v1938_v38 = vand.u32 4294901760, %v11598_v62  ;;  %v11646_v56 = vsub.f32 %v1787_v9, %v11622_v44 }
 0x282   : > { %9265 = vmatprep.subr.mxu0 %v10553_v5  ;;  %9271 = vmatprep.mubr.msk.f32.mxu0 %vm10554_vm0, %v10553_v5  ;;  %v1966_v1 = vand.u32 4294901760, %v11658_v19 }
 0x283   : > { %9266 = vmatpush3.msra.mxu0 %v1300_v6  ;;  %9344 = vmatprep.subr.mxu1 %v10553_v5  ;;  %v1925_v6 = vsub.f32 %v11578_v15, %v1924_v33  ;;  %v1939_v7 = vsub.f32 %v11598_v62, %v1938_v38  ;;  %v1959_v8 = vand.u32 4294901760, %v11646_v56 }
 0x284   : > { %9267 = vmatprep.subr.mxu0 %v10553_v5  ;;  %9345 = vmatpush3.msra.mxu1 %v1898_v55  ;;  %v12966_v55 = vand.u32 4294901760, %v11670_v10  ;;  %v1967_v16 = vsub.f32 %v11658_v19, %v1966_v1 }
 0x285   : > { %9268 = vmatpush3.msra.mxu0 %v1307_v42  ;;  %9346 = vmatprep.subr.mxu1 %v10553_v5  ;;  %v1932_v42 = vsub.f32 %v11592_v26, %v1931_v23  ;;  %v1926_v12 = vand.u32 4294901760, %v1925_v6  ;;  %v1940_v36 = vand.u32 4294901760, %v1939_v7  ;;  %v1960_v45 = vsub.f32 %v11646_v56, %v1959_v8 }
 0x286   : > { %9269 = vmatprep.subr.mxu0 %v10553_v5  ;;  %9347 = vmatpush3.msra.mxu1 %v1905_v40  ;;  %v1954_v40 = vand.u32 4294901760, %v1953_v58  ;;  %v1974_v6 = vsub.f32 %v11670_v10, %v12966_v55  ;;  %v1981_v7 = vsub.f32 %v11682_v31, %v12965_v63 }
 0x287   : > { %9270 = vmatpush3.msra.mxu0 %v1314_v34  ;;  %9348 = vmatprep.subr.mxu1 %v10553_v5  ;;  %v1783_v34 = vld [vmem:[#allocation10 + $0x110] sm:$0xff]  ;;  %v1933_v0 = vand.u32 4294901760, %v1932_v42  ;;  %v1968_v42 = vand.u32 4294901760, %v1967_v16 }
 0x288   : > { %9272 = vmatmul.mubr.f32.vlgmr.msra.gmra.mxu0 %v11373_v27  ;;  %9309 = vmatprep.subr.mxu0 %v10553_v5  ;;  %v1946_v27 = vsub.f32 %v11613_v54, %v1945_v24  ;;  %v11672_v30 = vand.u32 4294901760, %v1783_v34 }
 0x289   : > { %9310 = vmatpush3.msra.mxu0 %v11512_v13  ;;  %9349 = vmatpush3.msra.mxu1 %v1912_v28  ;;  %v1961_v28 = vand.u32 4294901760, %v1960_v45 }
 0x28a   : > { %9311 = vmatprep.subr.mxu0 %v10553_v5  ;;  %9350 = vmatprep.subr.mxu1 %v10553_v5  ;;  %v1947_v20 = vand.u32 4294901760, %v1946_v27  ;;  %v11694_v9 = vsub.f32 %v1783_v34, %v11672_v30  ;;  %v12963_v34 = vand.u32 4294901760, %v11706_v22 }
 0x28b   : > { %9312 = vmatpush3.msra.mxu0 %v11519_v14  ;;  %9351 = vmatpush3.msra.mxu1 %v1919_v43  ;;  %v11716_v43 = vsub.f32 %v1781_v46, %v11696_v11 }
 0x28c   : > { %9313 = vmatprep.subr.mxu0 %v10553_v5  ;;  %9352 = vmatprep.subr.mxu1 %v10553_v5  ;;  %v12964_v25 = vand.u32 4294901760, %v11694_v9  ;;  %v1995_v46 = vsub.f32 %v11706_v22, %v12963_v34 }
 0x28d   : > { %9314 = vmatpush3.msra.mxu0 %v11532_v37  ;;  %9353 = vmatpush3.msra.mxu1 %v1926_v12  ;;  %v1975_v12 = vand.u32 4294901760, %v1974_v6  ;;  %v12962_v53 = vand.u32 4294901760, %v11716_v43 }
 0x28e   : > { %9315 = vmatprep.subr.mxu0 %v10553_v5  ;;  %9354 = vmatprep.subr.mxu1 %v10553_v5  ;;  %v1988_v27 = vsub.f32 %v11694_v9, %v12964_v25 }
 0x28f   : > { %9316 = vmatpush3.msra.mxu0 %v11542_v47  ;;  %9355 = vmatpush3.msra.mxu1 %v1933_v0  ;;  %v2002_v45 = vsub.f32 %v11716_v43, %v12962_v53 }
 0x290   : > { %9317 = vmatprep.subr.mxu0 %v10553_v5  ;;  %9356 = vmatprep.subr.mxu1 %v10553_v5 }
 0x291   : > { %9318 = vmatpush3.msra.mxu0 %v11553_v60  ;;  %9357 = vmatpush3.msra.mxu1 %v1940_v36  ;;  %v1982_v36 = vand.u32 4294901760, %v1981_v7  ;;  %v2003_v16 = vand.u32 4294901760, %v2002_v45 }
 0x292   : > { %9319 = vmatprep.subr.mxu0 %v10553_v5  ;;  %9358 = vmatprep.subr.mxu1 %v10553_v5 }
 0x293   : > { %9320 = vmatpush3.msra.mxu0 %v11564_v39  ;;  %9359 = vmatpush3.msra.mxu1 %v1947_v20  ;;  %v1989_v20 = vand.u32 4294901760, %v1988_v27 }
 0x294   : > { %9321 = vmatprep.subr.mxu0 %v10553_v5  ;;  %9360 = vmatprep.subr.mxu1 %v10553_v5 }
 0x295   : > { %9322 = vmatpush3.msra.mxu0 %v11571_v61  ;;  %9361 = vmatpush3.msra.mxu1 %v1954_v40  ;;  %v1996_v40 = vand.u32 4294901760, %v1995_v46 }
 0x296   : > { %9323 = vmatprep.subr.mxu0 %v10553_v5  ;;  %9362 = vmatprep.subr.mxu1 %v10553_v5 }
 0x297   : > { %9324 = vmatpush3.msra.mxu0 %v11585_v29  ;;  %9363 = vmatpush3.msra.mxu1 %v1961_v28 }
 0x298   : > { %v666_v0 = vpop.f32.mrf.mxu1  ;;  %9325 = vmatprep.subr.mxu0 %v10553_v5  ;;  %9364 = vmatprep.subr.mxu1 %v10553_v5 }
 0x299   : > { %9326 = vmatpush3.msra.mxu0 %v11607_v35  ;;  %9365 = vmatpush3.msra.mxu1 %v1968_v42 }
 0x29a   : > { %v8958_v58 = vpop.f32.mrf.mxu1  ;;  %9327 = vmatprep.subr.mxu0 %v10553_v5  ;;  %9366 = vmatprep.subr.mxu1 %v10553_v5 }
 0x29b   : > { %9328 = vmatpush3.msra.mxu0 %v11622_v44  ;;  %9367 = vmatpush3.msra.mxu1 %v1975_v12 }
 0x29c   : > { %9329 = vmatprep.subr.mxu0 %v10553_v5  ;;  %9368 = vmatprep.subr.mxu1 %v10553_v5 }
 0x29d   : > { %9330 = vmatpush3.msra.mxu0 %v11635_v18  ;;  %9369 = vmatpush3.msra.mxu1 %v1982_v36  ;;  %v8225_v36 = vld [vmem:[#allocation8 + $0x8] ss:$0 sm:$0xff] }
 0x29e   : > { %9331 = vmatprep.subr.mxu0 %v10553_v5  ;;  %9370 = vmatprep.subr.mxu1 %v10553_v5 }
 0x29f   : > { %9332 = vmatpush3.msra.mxu0 %v11648_v49  ;;  %9371 = vmatpush3.msra.mxu1 %v1989_v20 }
 0x2a0   : > { %v515_v28 = vpop.f32.mrf.mxu0  ;;  %9333 = vmatprep.subr.mxu0 %v10553_v5  ;;  %9372 = vmatprep.subr.mxu1 %v10553_v5 }
 0x2a1   : > { %9334 = vmatpush3.msra.mxu0 %v11660_v48  ;;  %9373 = vmatpush3.msra.mxu1 %v1996_v40  ;;  %v516_v46 = vadd.f32 %v8225_v36, %v515_v28  ;;  %v8230_v36 = vld [vmem:[#allocation8 + $0x5] ss:$0 sm:$0xff] }
 0x2a2   : > { %v8923_v6 = vpop.f32.mrf.mxu0  ;;  %9335 = vmatprep.subr.mxu0 %v10553_v5  ;;  %9374 = vmatprep.subr.mxu1 %v10553_v5 }
 0x2a3   : > { %9336 = vmatpush3.msra.mxu0 %v11672_v30  ;;  %9375 = vmatpush3.msra.mxu1 %v2003_v16  ;;  %v667_v20 = vadd.f32 %v666_v0, %v516_v46  ;;  %v8229_v0 = vld [vmem:[#allocation8 + $0x4] ss:$0 sm:$0xff] }
 0x2a4   : > { %9337 = vmatprep.subr.mxu0 %v10553_v5  ;;  %9341 = vmatprep.mubr.msk.f32.mxu0 %vm10554_vm0, %v10553_v5 }
 0x2a5   : > { %9338 = vmatpush3.msra.mxu0 %v11684_v57  ;;  %9376 = vmatprep.mubr.msk.f32.mxu1 %vm10554_vm0, %v10553_v5 }
 0x2a6   : > { %9339 = vmatprep.subr.mxu0 %v10553_v5  ;;  %9414 = vmatprep.subr.mxu1 %v10553_v5 }
 0x2a7   : > { %9340 = vmatpush3.msra.mxu0 %v11696_v11 }
 0x2a8   : > { %9379 = vmatprep.subr.mxu0 %v10553_v5 }
 0x2b8   : > { %v859_v42 = vpop.f32.mrf.mxu1 }
 0x2ba   : > { %v9028_v7 = vpop.f32.mrf.mxu1 }
 0x2c1   : > { %v770_v12 = vpop.f32.mrf.mxu0 }
 0x2c2   : > { %v771_v40 = vadd.f32 %v770_v12, %v667_v20 }
 0x2c3   : > { %v8993_v27 = vpop.f32.mrf.mxu0 }
 0x2c4   : > { %v860_v16 = vadd.f32 %v859_v42, %v771_v40 }
 0x2da   : > { %v1065_v58 = vpop.f32.mrf.mxu1 }
 0x2dc   : > { %v9098_v45 = vpop.f32.mrf.mxu1 }
 0x2e3   : > { %v978_v6 = vpop.f32.mrf.mxu0 }
 0x2e4   : > { %v979_v53 = vadd.f32 %v978_v6, %v860_v16 }
 0x2e5   : > { %v9063_v34 = vpop.f32.mrf.mxu0 }
 0x2e6   : > { %v11766_v25 = vadd.f32 %v1065_v58, %v979_v53 }
 0x2e8   : > { %2444 = vrot.lane.b32.xlu0 %v11766_v25, %s10555_s27 }
 0x2ea   : > { %v1765_v63 = vpop.xlane.xlu1 %1764 }
 0x2eb   : > { %v1766_v7 = vmul.f32 0.0078125, %v1765_v63 }
 0x2ed   : > { %v1767_v55 = vadd.f32 1e-05, %v1766_v7 }
 0x2ef   : > { %10285 = vrsqrt.f32 %v1767_v55 }
 0x2fc   : > { %v10286_v27 = vpop.eup %10285  ;;  %v11770_v28 = vpop.f32.mrf.mxu1 }
 0x2fd   : > { %v1769_v12 = vmul.f32 %v10286_v27, %v11455_v21 }
 0x2fe   : > { %v9168_v42 = vpop.f32.mrf.mxu1 }
 0x2ff   : > { %v1774_v46 = vmul.f32 %v8229_v0, %v1769_v12 }
 0x301   : > { %v1779_v34 = vadd.f32 %v8230_v36, %v1774_v46 }
 0x303   : > { %v11773_v53 = vand.u32 4294901760, %v1779_v34 }
 0x305   : > { %v11775_v58 = vpop.f32.mrf.mxu0  ;;  %v11778_v20 = vsub.f32 %v1779_v34, %v11773_v53  ;;  %9377 = vmatmul.mubr.f32.vlgmr.msra.gmra.mxu1 %v11773_v53 }
 0x306   : > { %9415 = vmatpush3.msra.mxu1 %v11512_v13  ;;  %9446 = vmatprep.mubr.msk.f32.mxu1 %vm10554_vm0, %v10553_v5 }
 0x307   : > { %v9133_v55 = vpop.f32.mrf.mxu0  ;;  %v1885_v21 = vand.u32 4294901760, %v11778_v20  ;;  %9416 = vmatprep.subr.mxu1 %v10553_v5 }
 0x308   : > { %9417 = vmatpush3.msra.mxu1 %v11519_v14 }
 0x309   : > { %v1886_v63 = vsub.f32 %v11778_v20, %v1885_v21  ;;  %9418 = vmatprep.subr.mxu1 %v10553_v5 }
 0x30a   : > { %9419 = vmatpush3.msra.mxu1 %v11532_v37 }
 0x30b   : > { %v1887_v45 = vand.u32 4294901760, %v1886_v63  ;;  %9420 = vmatprep.subr.mxu1 %v10553_v5 }
 0x30c   : > { %9421 = vmatpush3.msra.mxu1 %v11542_v47 }
 0x30d   : > { %9342 = vmatmul.mubr.f32.vlgmr.msra.gmra.mxu0 %v1887_v45  ;;  %9422 = vmatprep.subr.mxu1 %v10553_v5 }
 0x30e   : > { %9380 = vmatpush3.msra.mxu0 %v11527_v32  ;;  %9423 = vmatpush3.msra.mxu1 %v11553_v60 }
 0x30f   : > { %9381 = vmatprep.subr.mxu0 %v10553_v5  ;;  %9424 = vmatprep.subr.mxu1 %v10553_v5 }
 0x310   : > { %9382 = vmatpush3.msra.mxu0 %v11537_v41  ;;  %9425 = vmatpush3.msra.mxu1 %v11564_v39 }
 0x311   : > { %9383 = vmatprep.subr.mxu0 %v10553_v5  ;;  %9426 = vmatprep.subr.mxu1 %v10553_v5 }
 0x312   : > { %9384 = vmatpush3.msra.mxu0 %v11551_v59  ;;  %9427 = vmatpush3.msra.mxu1 %v11571_v61  ;;  %v12995_v59 = vand.u32 4294901760, %v11682_v31 }
 0x313   : > { %9385 = vmatprep.subr.mxu0 %v10553_v5  ;;  %9428 = vmatprep.subr.mxu1 %v10553_v5 }
 0x314   : > { %9386 = vmatpush3.msra.mxu0 %v11562_v17  ;;  %9429 = vmatpush3.msra.mxu1 %v11585_v29  ;;  %v12996_v17 = vand.u32 4294901760, %v11694_v9 }
 0x315   : > { %9387 = vmatprep.subr.mxu0 %v10553_v5  ;;  %9430 = vmatprep.subr.mxu1 %v10553_v5 }
 0x316   : > { %9388 = vmatpush3.msra.mxu0 %v11578_v15  ;;  %9431 = vmatpush3.msra.mxu1 %v11607_v35 }
 0x317   : > { %9389 = vmatprep.subr.mxu0 %v10553_v5  ;;  %9432 = vmatprep.subr.mxu1 %v10553_v5 }
 0x318   : > { %9390 = vmatpush3.msra.mxu0 %v11592_v26  ;;  %9433 = vmatpush3.msra.mxu1 %v11622_v44 }
 0x319   : > { %9391 = vmatprep.subr.mxu0 %v10553_v5  ;;  %9434 = vmatprep.subr.mxu1 %v10553_v5 }
 0x31a   : > { %9392 = vmatpush3.msra.mxu0 %v11598_v62  ;;  %9435 = vmatpush3.msra.mxu1 %v11635_v18 }
 0x31b   : > { %9393 = vmatprep.subr.mxu0 %v10553_v5  ;;  %9436 = vmatprep.subr.mxu1 %v10553_v5 }
 0x31c   : > { %9394 = vmatpush3.msra.mxu0 %v11613_v54  ;;  %9437 = vmatpush3.msra.mxu1 %v11648_v49  ;;  %v8231_v54 = vld [vmem:[#allocation8 + $0xa] ss:$0 sm:$0xff] }
 0x31d   : > { %9395 = vmatprep.subr.mxu0 %v10553_v5  ;;  %9438 = vmatprep.subr.mxu1 %v10553_v5 }
 0x31e   : > { %9396 = vmatpush3.msra.mxu0 %v11633_v4  ;;  %v11828_v40 = vpop.f32.mrf.mxu1  ;;  %9439 = vmatpush3.msra.mxu1 %v11660_v48 }
 0x31f   : > { %9397 = vmatprep.subr.mxu0 %v10553_v5  ;;  %9440 = vmatprep.subr.mxu1 %v10553_v5 }
 0x320   : > { %9398 = vmatpush3.msra.mxu0 %v11646_v56  ;;  %v9238_v16 = vpop.f32.mrf.mxu1  ;;  %9441 = vmatpush3.msra.mxu1 %v11672_v30 }
 0x321   : > { %9399 = vmatprep.subr.mxu0 %v10553_v5  ;;  %9442 = vmatprep.subr.mxu1 %v10553_v5 }
 0x322   : > { %9400 = vmatpush3.msra.mxu0 %v11658_v19  ;;  %9443 = vmatpush3.msra.mxu1 %v11684_v57 }
 0x323   : > { %9401 = vmatprep.subr.mxu0 %v10553_v5  ;;  %9444 = vmatprep.subr.mxu1 %v10553_v5 }
 0x324   : > { %9402 = vmatpush3.msra.mxu0 %v11670_v10  ;;  %9445 = vmatpush3.msra.mxu1 %v11696_v11 }
 0x325   : > { %9403 = vmatprep.subr.mxu0 %v10553_v5  ;;  %9411 = vmatprep.mubr.msk.f32.mxu0 %vm10554_vm0, %v10553_v5 }
 0x326   : > { %9404 = vmatpush3.msra.mxu0 %v11682_v31  ;;  %9484 = vmatprep.subr.mxu1 %v10553_v5 }
 0x327   : > { %9405 = vmatprep.subr.mxu0 %v10553_v5  ;;  %v1457_v6 = vpop.f32.mrf.mxu0  ;;  %9447 = vmatmul.mubr.f32.vlgmr.msra.gmra.mxu1 %v1885_v21 }
 0x328   : > { %9406 = vmatpush3.msra.mxu0 %v11694_v9  ;;  %9485 = vmatpush3.msra.mxu1 %v11512_v13  ;;  %v8228_v13 = vld [vmem:[#allocation8 + $0x9] ss:$0 sm:$0xff] }
 0x329   : > { %9407 = vmatprep.subr.mxu0 %v10553_v5  ;;  %v9203_v7 = vpop.f32.mrf.mxu0  ;;  %9486 = vmatprep.subr.mxu1 %v10553_v5 }
 0x32a   : > { %9408 = vmatpush3.msra.mxu0 %v11706_v22  ;;  %9487 = vmatpush3.msra.mxu1 %v11519_v14  ;;  %v1203_v14 = vadd.f32 %v8228_v13, %v11775_v58 }
 0x32b   : > { %9409 = vmatprep.subr.mxu0 %v10553_v5  ;;  %9488 = vmatprep.subr.mxu1 %v10553_v5 }
 0x32c   : > { %9410 = vmatpush3.msra.mxu0 %v11716_v43  ;;  %9489 = vmatpush3.msra.mxu1 %v11532_v37  ;;  %v1354_v32 = vadd.f32 %v11770_v28, %v1203_v14 }
 0x32d   : > { %9449 = vmatprep.subr.mxu0 %v10553_v5  ;;  %9412 = vmatmul.mubr.f32.vlgmr.msra.gmra.mxu0 %v11778_v20 }
 0x32e   : > { %9450 = vmatpush3.msra.mxu0 %v1896_v52  ;;  %9490 = vmatprep.subr.mxu1 %v10553_v5  ;;  %v1458_v41 = vadd.f32 %v1457_v6, %v1354_v32  ;;  %v12994_v52 = vand.u32 4294901760, %v11670_v10  ;;  %v2599_v10 = vsel %vm2598_vm1, %v11766_v25, 0 }
 0x32f   : > { %9451 = vmatprep.subr.mxu0 %v10553_v5  ;;  %9491 = vmatpush3.msra.mxu1 %v11542_v47 }
 0x330   : > { %9452 = vmatpush3.msra.mxu0 %v1903_v2  ;;  %9492 = vmatprep.subr.mxu1 %v10553_v5 }
 0x331   : > { %9453 = vmatprep.subr.mxu0 %v10553_v5  ;;  %9493 = vmatpush3.msra.mxu1 %v11553_v60  ;;  %v1547_v60 = vadd.f32 %v11828_v40, %v1458_v41 }
 0x332   : > { %9454 = vmatpush3.msra.mxu0 %v1910_v50  ;;  %9494 = vmatprep.subr.mxu1 %v10553_v5  ;;  %v12997_v50 = vand.u32 4294901760, %v11706_v22 }
 0x333   : > { %9455 = vmatprep.subr.mxu0 %v10553_v5  ;;  %9495 = vmatpush3.msra.mxu1 %v11564_v39 }
 0x334   : > { %9456 = vmatpush3.msra.mxu0 %v1917_v51  ;;  %9496 = vmatprep.subr.mxu1 %v10553_v5 }
 0x335   : > { %9457 = vmatprep.subr.mxu0 %v10553_v5  ;;  %9497 = vmatpush3.msra.mxu1 %v11571_v61 }
 0x336   : > { %9458 = vmatpush3.msra.mxu0 %v1924_v33  ;;  %9498 = vmatprep.subr.mxu1 %v10553_v5 }
 0x337   : > { %9459 = vmatprep.subr.mxu0 %v10553_v5  ;;  %9499 = vmatpush3.msra.mxu1 %v11585_v29  ;;  %v12998_v29 = vand.u32 4294901760, %v11716_v43 }
 0x338   : > { %9460 = vmatpush3.msra.mxu0 %v1931_v23  ;;  %9500 = vmatprep.subr.mxu1 %v10553_v5 }
 0x339   : > { %9461 = vmatprep.subr.mxu0 %v10553_v5  ;;  %9501 = vmatpush3.msra.mxu1 %v11607_v35 }
 0x33a   : > { %9462 = vmatpush3.msra.mxu0 %v1938_v38  ;;  %9502 = vmatprep.subr.mxu1 %v10553_v5 }
 0x33b   : > { %9463 = vmatprep.subr.mxu0 %v10553_v5  ;;  %9503 = vmatpush3.msra.mxu1 %v11622_v44 }
 0x33c   : > { %9464 = vmatpush3.msra.mxu0 %v1945_v24  ;;  %9504 = vmatprep.subr.mxu1 %v10553_v5 }
 0x33d   : > { %9465 = vmatprep.subr.mxu0 %v10553_v5  ;;  %9505 = vmatpush3.msra.mxu1 %v11635_v18 }
 0x33e   : > { %9466 = vmatpush3.msra.mxu0 %v1952_v3  ;;  %9506 = vmatprep.subr.mxu1 %v10553_v5 }
 0x33f   : > { %9467 = vmatprep.subr.mxu0 %v10553_v5  ;;  %9507 = vmatpush3.msra.mxu1 %v11648_v49 }
 0x340   : > { %9468 = vmatpush3.msra.mxu0 %v1959_v8  ;;  %9508 = vmatprep.subr.mxu1 %v10553_v5 }
 0x341   : > { %v1752_v37 = vpop.f32.mrf.mxu1  ;;  %9469 = vmatprep.subr.mxu0 %v10553_v5  ;;  %9509 = vmatpush3.msra.mxu1 %v11660_v48 }
 0x342   : > { %9470 = vmatpush3.msra.mxu0 %v1966_v1  ;;  %9510 = vmatprep.subr.mxu1 %v10553_v5 }
 0x343   : > { %v9308_v47 = vpop.f32.mrf.mxu1  ;;  %9471 = vmatprep.subr.mxu0 %v10553_v5  ;;  %9511 = vmatpush3.msra.mxu1 %v11672_v30  ;;  %v11960_v30 = vand.u32 4294901760, %v2599_v10 }
 0x344   : > { %9472 = vmatpush3.msra.mxu0 %v12994_v52  ;;  %9512 = vmatprep.subr.mxu1 %v10553_v5 }
 0x345   : > { %9473 = vmatprep.subr.mxu0 %v10553_v5  ;;  %9513 = vmatpush3.msra.mxu1 %v11684_v57  ;;  %v11965_v9 = vsub.f32 %v2599_v10, %v11960_v30 }
 0x346   : > { %9474 = vmatpush3.msra.mxu0 %v12995_v59  ;;  %9514 = vmatprep.subr.mxu1 %v10553_v5 }
 0x347   : > { %9475 = vmatprep.subr.mxu0 %v10553_v5  ;;  %9481 = vmatprep.mubr.msk.f32.mxu0 %vm10554_vm0, %v10553_v5  ;;  %v2672_v0 = vand.u32 4294901760, %v11965_v9 }
 0x348   : > { %v1665_v2 = vpop.f32.mrf.mxu0  ;;  %9476 = vmatpush3.msra.mxu0 %v12996_v17  ;;  %9515 = vmatpush3.msra.mxu1 %v11696_v11 }
 0x349   : > { %v1666_v39 = vadd.f32 %v1665_v2, %v1547_v60  ;;  %9477 = vmatprep.subr.mxu0 %v10553_v5  ;;  %9516 = vmatprep.mubr.msk.f32.mxu1 %vm10554_vm0, %v10553_v5 }
 0x34a   : > { %v9273_v61 = vpop.f32.mrf.mxu0  ;;  %9478 = vmatpush3.msra.mxu0 %v12997_v50  ;;  %9517 = vmatmul.mubr.f32.vlgmr.msra.gmra.mxu1 %v11773_v53 }
 0x34b   : > { %v1753_v15 = vadd.f32 %v1752_v37, %v1666_v39  ;;  %9479 = vmatprep.subr.mxu0 %v10553_v5  ;;  %9530 = vmatprep.subr.mxu1 %v10553_v5 }
 0x34c   : > { %9480 = vmatpush3.msra.mxu0 %v12998_v29  ;;  %9538 = vmatprep.mubr.msk.f32.mxu1 %vm10554_vm0, %v10553_v5 }
 0x34d   : > { %2451 = vrot.lane.b32.xlu0 %v1753_v15, %s10555_s27  ;;  %2454 = vrot.lane.b32.xlu1 %v1753_v15, %s10556_s1 }
 0x34e   : > { %9482 = vmatmul.mubr.f32.vlgmr.msra.gmra.mxu0 %v11773_v53  ;;  %9519 = vmatprep.subr.mxu0 %v10553_v5  ;;  %v2673_v53 = vsub.f32 %v11965_v9, %v2672_v0 }
 0x34f   : > { %9527 = vmatprep.mubr.msk.f32.mxu0 %vm10554_vm0, %v10553_v5 }
 0x351   : > { %2457 = vrot.lane.b32.xlu0 %v1753_v15, %s10557_s15 }
 0x35a   : > { %v11956_v51 = vpop.permute.xlu0 %2444 }
 0x35b   : > { %v3086_v59 = vsel %vm2598_vm1, %v11956_v51, 0 }
 0x35c   : > { %v12051_v60 = vand.u32 4294901760, %v3086_v59 }
 0x35e   : > { %v12054_v17 = vsub.f32 %v3086_v59, %v12051_v60 }
 0x376   : > { %2470 = vxpose.xlu1.b32.start.end [1/1] (short) (narrow) %v1753_v15, 32 }
 0x3a0   : > { %2446 = vrot.lane.b32.xlu1 %v11766_v25, %s10556_s1 }
 0x3bf   : > { %v2452_v26 = vpop.permute.xlu0 %2451  ;;  %v2455_v23 = vpop.permute.xlu1 %2454 }
 0x3c0   : > { %2502 = vxpose.xlu0.b32.start.end [1/1] (short) (narrow) %v2452_v26, 32  ;;  %v3159_v26 = vand.u32 4294901760, %v12054_v17 }
 0x3c3   : > { %v2458_v35 = vpop.permute.xlu0 %2457 }
 0x3c5   : > { %v2040_v62 = vpop.f32.mrf.mxu1 }
 0x3c7   : > { %v9378_v33 = vpop.f32.mrf.mxu1 }
 0x3c9   : > { %2566 = vxpose.xlu1.b32.start.end [1/1] (short) (narrow) %v2458_v35, 32 }
 0x3cd   : > { %2534 = vxpose.xlu0.b32.start.end [1/1] (short) (narrow) %v2455_v23, 32  ;;  %v1889_v44 = vpop.f32.mrf.mxu0 }
 0x3ce   : > { %v1890_v38 = vadd.f32 %v8231_v54, %v1889_v44  ;;  %v3160_v44 = vsub.f32 %v12054_v17, %v3159_v26 }
 0x3cf   : > { %v9343_v4 = vpop.f32.mrf.mxu0 }
 0x3d0   : > { %v2041_v18 = vadd.f32 %v2040_v62, %v1890_v38 }
 0x3e7   : > { %v2233_v24 = vpop.f32.mrf.mxu1 }
 0x3e9   : > { %v9448_v56 = vpop.f32.mrf.mxu1 }
 0x3ed   : > { %v2144_v49 = vpop.f32.mrf.mxu0 }
 0x3ee   : > { %v2145_v3 = vadd.f32 %v2144_v49, %v2041_v18 }
 0x3ef   : > { %v9413_v19 = vpop.f32.mrf.mxu0 }
 0x3f0   : > { %v2234_v48 = vadd.f32 %v2233_v24, %v2145_v3  ;;  %v3161_v3 = vand.u32 4294901760, %v3160_v44 }
 0x3f2   : > { %v2486_v8 = vpop.trf.xlu1 }
 0x3f3   : > { %v11967_v11 = vand.u32 4294901760, %v2486_v8 }
 0x3f5   : > { %v11977_v12 = vsub.f32 %v2486_v8, %v11967_v11 }
 0x3f6   : > { %v2487_v1 = vpop.trf.xlu1 }
 0x3f7   : > { %v11962_v31 = vand.u32 4294901760, %v2487_v1  ;;  %v2728_v58 = vand.u32 4294901760, %v11977_v12 }
 0x3f9   : > { %v11972_v43 = vsub.f32 %v2487_v1, %v11962_v31  ;;  %v2729_v45 = vsub.f32 %v11977_v12, %v2728_v58 }
 0x3fa   : > { %v2488_v57 = vpop.trf.xlu1 }
 0x3fb   : > { %v11969_v22 = vand.u32 4294901760, %v2488_v57  ;;  %v2721_v46 = vand.u32 4294901760, %v11972_v43  ;;  %v2730_v13 = vand.u32 4294901760, %v2729_v45 }
 0x3fd   : > { %v2713_v27 = vsub.f32 %v2488_v57, %v11969_v22  ;;  %v2722_v21 = vsub.f32 %v11972_v43, %v2721_v46 }
 0x3fe   : > { %v2489_v28 = vpop.trf.xlu1 }
 0x3ff   : > { %v2714_v42 = vand.u32 4294901760, %v2713_v27  ;;  %v11979_v36 = vand.u32 4294901760, %v2489_v28  ;;  %v2723_v6 = vand.u32 4294901760, %v2722_v21 }
 0x401   : > { %v2706_v34 = vsub.f32 %v2489_v28, %v11979_v36  ;;  %9520 = vmatpush3.msra.mxu0 %v11979_v36  ;;  %v2715_v20 = vsub.f32 %v2713_v27, %v2714_v42 }
 0x402   : > { %9521 = vmatprep.subr.mxu0 %v10553_v5  ;;  %2448 = vrot.lane.b32.xlu0 %v11766_v25, %s10557_s15  ;;  %v2674_v25 = vand.u32 4294901760, %v2673_v53 }
 0x403   : > { %v2707_v55 = vand.u32 4294901760, %v2706_v34  ;;  %9522 = vmatpush3.msra.mxu0 %v11969_v22  ;;  %v2716_v40 = vand.u32 4294901760, %v2715_v20 }
 0x404   : > { %9523 = vmatprep.subr.mxu0 %v10553_v5 }
 0x405   : > { %v2708_v63 = vsub.f32 %v2706_v34, %v2707_v55  ;;  %9524 = vmatpush3.msra.mxu0 %v11962_v31 }
 0x406   : > { %9525 = vmatprep.subr.mxu0 %v10553_v5 }
 0x407   : > { %v2709_v16 = vand.u32 4294901760, %v2708_v63  ;;  %9526 = vmatpush3.msra.mxu0 %v11967_v11 }
 0x408   : > { %9528 = vmatmul.mubr.f32.vlgmr.msra.gmra.mxu0 %v2674_v25  ;;  %9541 = vmatprep.subr.mxu0 %v10553_v5 }
 0x409   : > { %9531 = vmatpush3.msra.mxu1 %v2709_v16  ;;  %9542 = vmatpush3.msra.mxu0 %v2706_v34 }
 0x40a   : > { %9532 = vmatprep.subr.mxu1 %v10553_v5  ;;  %9543 = vmatprep.subr.mxu0 %v10553_v5  ;;  %v2439_v7 = vpop.f32.mrf.mxu1 }
 0x40b   : > { %9533 = vmatpush3.msra.mxu1 %v2716_v40  ;;  %9544 = vmatpush3.msra.mxu0 %v2713_v27 }
 0x40c   : > { %9534 = vmatprep.subr.mxu1 %v10553_v5  ;;  %9545 = vmatprep.subr.mxu0 %v10553_v5  ;;  %v9518_v14 = vpop.f32.mrf.mxu1 }
 0x40d   : > { %9535 = vmatpush3.msra.mxu1 %v2723_v6  ;;  %9546 = vmatpush3.msra.mxu0 %v11972_v43 }
 0x40e   : > { %v2352_v32 = vpop.f32.mrf.mxu0  ;;  %9536 = vmatprep.subr.mxu1 %v10553_v5  ;;  %9547 = vmatprep.subr.mxu0 %v10553_v5 }
 0x40f   : > { %v2353_v37 = vadd.f32 %v2352_v32, %v2234_v48  ;;  %9537 = vmatpush3.msra.mxu1 %v2730_v13  ;;  %9548 = vmatpush3.msra.mxu0 %v11977_v12 }
 0x410   : > { %v9483_v41 = vpop.f32.mrf.mxu0  ;;  %9549 = vmatprep.mubr.msk.f32.mxu0 %vm10554_vm0, %v10553_v5  ;;  %9539 = vmatmul.mubr.f32.vlgmr.msra.gmra.mxu1 %v11960_v30 }
 0x411   : > { %v12010_v47 = vadd.f32 %v2439_v7, %v2353_v37  ;;  %9550 = vmatmul.mubr.f32.vlgmr.msra.gmra.mxu0 %v11965_v9  ;;  %9552 = vmatprep.subr.mxu1 %v10553_v5 }
 0x412   : > { %9563 = vmatprep.subr.mxu0 %v10553_v5  ;;  %9553 = vmatpush3.msra.mxu1 %v11979_v36  ;;  %v2447_v57 = vpop.permute.xlu1 %2446 }
 0x413   : > { %9564 = vmatpush3.msra.mxu0 %v2707_v55  ;;  %9554 = vmatprep.subr.mxu1 %v10553_v5 }
 0x414   : > { %9565 = vmatprep.subr.mxu0 %v10553_v5  ;;  %9555 = vmatpush3.msra.mxu1 %v11969_v22 }
 0x415   : > { %9566 = vmatpush3.msra.mxu0 %v2714_v42  ;;  %9556 = vmatprep.subr.mxu1 %v10553_v5 }
 0x416   : > { %9567 = vmatprep.subr.mxu0 %v10553_v5  ;;  %9557 = vmatpush3.msra.mxu1 %v11962_v31 }
 0x417   : > { %9568 = vmatpush3.msra.mxu0 %v2721_v46  ;;  %9558 = vmatprep.subr.mxu1 %v10553_v5 }
 0x418   : > { %9569 = vmatprep.subr.mxu0 %v10553_v5  ;;  %9559 = vmatpush3.msra.mxu1 %v11967_v11 }
 0x419   : > { %9560 = vmatprep.mubr.msk.f32.mxu1 %vm10554_vm0, %v10553_v5  ;;  %9570 = vmatpush3.msra.mxu0 %v2728_v58 }
 0x41a   : > { %9571 = vmatprep.mubr.msk.f32.mxu0 %vm10554_vm0, %v10553_v5  ;;  %9561 = vmatmul.mubr.f32.vlgmr.msra.gmra.mxu1 %v2672_v0 }
 0x41b   : > { %9572 = vmatmul.mubr.f32.vlgmr.msra.gmra.mxu0 %v11960_v30  ;;  %9574 = vmatprep.subr.mxu1 %v10553_v5 }
 0x41c   : > { %9575 = vmatpush3.msra.mxu1 %v11979_v36  ;;  %9582 = vmatprep.mubr.msk.f32.mxu1 %vm10554_vm0, %v10553_v5 }
 0x41d   : > { %9576 = vmatprep.subr.mxu1 %v10553_v5  ;;  %9585 = vmatprep.subr.mxu0 %v10553_v5 }
 0x41e   : > { %9577 = vmatpush3.msra.mxu1 %v11969_v22  ;;  %9593 = vmatprep.mubr.msk.f32.mxu0 %vm10554_vm0, %v10553_v5 }
 0x41f   : > { %9578 = vmatprep.subr.mxu1 %v10553_v5 }
 0x420   : > { %9579 = vmatpush3.msra.mxu1 %v11962_v31 }
 0x421   : > { %9580 = vmatprep.subr.mxu1 %v10553_v5 }
 0x422   : > { %9581 = vmatpush3.msra.mxu1 %v11967_v11  ;;  %v3573_v11 = vsel %vm2598_vm1, %v2447_v57, 0 }
 0x423   : > { %9583 = vmatmul.mubr.f32.vlgmr.msra.gmra.mxu1 %v11960_v30  ;;  %9596 = vmatprep.subr.mxu1 %v10553_v5  ;;  %v12106_v43 = vand.u32 4294901760, %v3573_v11 }
 0x424   : > { %9604 = vmatprep.mubr.msk.f32.mxu1 %vm10554_vm0, %v10553_v5 }
 0x425   : > { %v12119_v0 = vsub.f32 %v3573_v11, %v12106_v43 }
 0x427   : > { %v3646_v34 = vand.u32 4294901760, %v12119_v0 }
 0x429   : > { %v3647_v63 = vsub.f32 %v12119_v0, %v3646_v34 }
 0x42b   : > { %v3648_v7 = vand.u32 4294901760, %v3647_v63 }
 0x43c   : > { %v2518_v52 = vpop.trf.xlu0 }
 0x43d   : > { %v12060_v15 = vand.u32 4294901760, %v2518_v52 }
 0x43f   : > { %v12070_v35 = vsub.f32 %v2518_v52, %v12060_v15 }
 0x440   : > { %v2519_v2 = vpop.trf.xlu0 }
 0x441   : > { %v12056_v61 = vand.u32 4294901760, %v2519_v2  ;;  %v3215_v24 = vand.u32 4294901760, %v12070_v35 }
 0x443   : > { %v12065_v51 = vsub.f32 %v2519_v2, %v12056_v61  ;;  %v3216_v10 = vsub.f32 %v12070_v35, %v3215_v24 }
 0x444   : > { %v2520_v39 = vpop.trf.xlu0 }
 0x445   : > { %v12058_v50 = vand.u32 4294901760, %v2520_v39  ;;  %v3208_v4 = vand.u32 4294901760, %v12065_v51  ;;  %v3217_v9 = vand.u32 4294901760, %v3216_v10  ;;  %v12144_v53 = vpop.trf.xlu1 }
 0x447   : > { %v3200_v29 = vsub.f32 %v2520_v39, %v12058_v50  ;;  %v3209_v48 = vsub.f32 %v12065_v51, %v3208_v4 }
 0x448   : > { %v2521_v62 = vpop.trf.xlu0 }
 0x449   : > { %v12067_v33 = vand.u32 4294901760, %v2521_v62  ;;  %v3201_v54 = vand.u32 4294901760, %v3200_v29  ;;  %v3210_v1 = vand.u32 4294901760, %v3209_v48  ;;  %v12172_v40 = vpop.trf.xlu1 }
 0x44b   : > { %v3193_v23 = vsub.f32 %v2521_v62, %v12067_v33  ;;  %9586 = vmatpush3.msra.mxu0 %v12067_v33  ;;  %v3202_v56 = vsub.f32 %v3200_v29, %v3201_v54  ;;  %v12237_v62 = vand.u32 4294901760, %v12144_v53 }
 0x44c   : > { %9587 = vmatprep.subr.mxu0 %v10553_v5  ;;  %v12078_v38 = vpop.trf.xlu0 }
 0x44d   : > { %v3194_v18 = vand.u32 4294901760, %v3193_v23  ;;  %9588 = vmatpush3.msra.mxu0 %v12058_v50  ;;  %v3203_v30 = vand.u32 4294901760, %v3202_v56  ;;  %v12132_v36 = vand.u32 4294901760, %v12078_v38  ;;  %v2584_v41 = vpop.trf.xlu1 }
 0x44e   : > { %9589 = vmatprep.subr.mxu0 %v10553_v5 }
 0x44f   : > { %v3195_v49 = vsub.f32 %v3193_v23, %v3194_v18  ;;  %9590 = vmatpush3.msra.mxu0 %v12056_v61  ;;  %v12156_v55 = vsub.f32 %v12078_v38, %v12132_v36 }
 0x450   : > { %9591 = vmatprep.subr.mxu0 %v10553_v5  ;;  %v2551_v19 = vpop.trf.xlu0 }
 0x451   : > { %v3196_v8 = vand.u32 4294901760, %v3195_v49  ;;  %9592 = vmatpush3.msra.mxu0 %v12060_v15  ;;  %v12122_v12 = vand.u32 4294901760, %v2551_v19  ;;  %v3702_v16 = vand.u32 4294901760, %v12156_v55  ;;  %v2585_v2 = vpop.trf.xlu1 }
 0x452   : > { %9594 = vmatmul.mubr.f32.vlgmr.msra.gmra.mxu0 %v3161_v3  ;;  %9607 = vmatprep.subr.mxu0 %v10553_v5  ;;  %v12212_v39 = vand.u32 4294901760, %v2585_v2 }
 0x453   : > { %9597 = vmatpush3.msra.mxu1 %v3196_v8  ;;  %9608 = vmatpush3.msra.mxu0 %v3193_v23  ;;  %v12147_v58 = vsub.f32 %v2551_v19, %v12122_v12  ;;  %v3703_v32 = vsub.f32 %v12156_v55, %v3702_v16  ;;  %v12262_v23 = vsub.f32 %v12144_v53, %v12237_v62 }
 0x454   : > { %9598 = vmatprep.subr.mxu1 %v10553_v5  ;;  %9609 = vmatprep.subr.mxu0 %v10553_v5  ;;  %v2552_v31 = vpop.trf.xlu0 }
 0x455   : > { %9599 = vmatpush3.msra.mxu1 %v3203_v30  ;;  %9610 = vmatpush3.msra.mxu0 %v3200_v29  ;;  %v12114_v28 = vand.u32 4294901760, %v2552_v31  ;;  %v3695_v25 = vand.u32 4294901760, %v12147_v58  ;;  %v3704_v59 = vand.u32 4294901760, %v3703_v32  ;;  %v12228_v29 = vsub.f32 %v2585_v2, %v12212_v39 }
 0x456   : > { %9600 = vmatprep.subr.mxu1 %v10553_v5  ;;  %9611 = vmatprep.subr.mxu0 %v10553_v5 }
 0x457   : > { %9601 = vmatpush3.msra.mxu1 %v3210_v1  ;;  %9612 = vmatpush3.msra.mxu0 %v12065_v51  ;;  %v12135_v46 = vsub.f32 %v2552_v31, %v12114_v28  ;;  %v3696_v13 = vsub.f32 %v12147_v58, %v3695_v25 }
 0x458   : > { %9602 = vmatprep.subr.mxu1 %v10553_v5  ;;  %9613 = vmatprep.subr.mxu0 %v10553_v5  ;;  %v2553_v22 = vpop.trf.xlu0 }
 0x459   : > { %9603 = vmatpush3.msra.mxu1 %v3217_v9  ;;  %9614 = vmatpush3.msra.mxu0 %v12070_v35  ;;  %v12110_v27 = vand.u32 4294901760, %v2553_v22  ;;  %v3688_v21 = vand.u32 4294901760, %v12135_v46  ;;  %v3697_v52 = vand.u32 4294901760, %v3696_v13  ;;  %v4168_v35 = vand.u32 4294901760, %v12228_v29 }
 0x45a   : > { %9615 = vmatprep.mubr.msk.f32.mxu0 %vm10554_vm0, %v10553_v5  ;;  %9605 = vmatmul.mubr.f32.vlgmr.msra.gmra.mxu1 %v12051_v60 }
 0x45b   : > { %9616 = vmatmul.mubr.f32.vlgmr.msra.gmra.mxu0 %v12054_v17  ;;  %9618 = vmatprep.subr.mxu1 %v10553_v5  ;;  %v12125_v42 = vsub.f32 %v2553_v22, %v12110_v27  ;;  %v3689_v6 = vsub.f32 %v12135_v46, %v3688_v21 }
 0x45c   : > { %9629 = vmatprep.subr.mxu0 %v10553_v5  ;;  %9619 = vmatpush3.msra.mxu1 %v12067_v33 }
 0x45d   : > { %9630 = vmatpush3.msra.mxu0 %v3194_v18  ;;  %9620 = vmatprep.subr.mxu1 %v10553_v5  ;;  %v3681_v20 = vand.u32 4294901760, %v12125_v42  ;;  %v3690_v37 = vand.u32 4294901760, %v3689_v6 }
 0x45e   : > { %9631 = vmatprep.subr.mxu0 %v10553_v5  ;;  %9621 = vmatpush3.msra.mxu1 %v12058_v50 }
 0x45f   : > { %9632 = vmatpush3.msra.mxu0 %v3201_v54  ;;  %9622 = vmatprep.subr.mxu1 %v10553_v5  ;;  %v3682_v45 = vsub.f32 %v12125_v42, %v3681_v20 }
 0x460   : > { %9633 = vmatprep.subr.mxu0 %v10553_v5  ;;  %9623 = vmatpush3.msra.mxu1 %v12056_v61 }
 0x461   : > { %9634 = vmatpush3.msra.mxu0 %v3208_v4  ;;  %9624 = vmatprep.subr.mxu1 %v10553_v5  ;;  %v3683_v14 = vand.u32 4294901760, %v3682_v45  ;;  %v4169_v4 = vsub.f32 %v12228_v29, %v4168_v35 }
 0x462   : > { %9635 = vmatprep.subr.mxu0 %v10553_v5  ;;  %9625 = vmatpush3.msra.mxu1 %v12060_v15 }
 0x463   : > { %9626 = vmatprep.mubr.msk.f32.mxu1 %vm10554_vm0, %v10553_v5  ;;  %9636 = vmatpush3.msra.mxu0 %v3215_v24  ;;  %v4189_v24 = vand.u32 4294901760, %v12262_v23  ;;  %v4170_v3 = vand.u32 4294901760, %v4169_v4 }
 0x464   : > { %9637 = vmatprep.mubr.msk.f32.mxu0 %vm10554_vm0, %v10553_v5  ;;  %9627 = vmatmul.mubr.f32.vlgmr.msra.gmra.mxu1 %v3159_v26 }
 0x465   : > { %9638 = vmatmul.mubr.f32.vlgmr.msra.gmra.mxu0 %v12051_v60  ;;  %9640 = vmatprep.subr.mxu1 %v10553_v5  ;;  %v4190_v48 = vsub.f32 %v12262_v23, %v4189_v24 }
 0x466   : > { %9651 = vmatprep.subr.mxu0 %v10553_v5  ;;  %9641 = vmatpush3.msra.mxu1 %v12067_v33 }
 0x467   : > { %9652 = vmatpush3.msra.mxu0 %v12110_v27  ;;  %9642 = vmatprep.subr.mxu1 %v10553_v5  ;;  %v4191_v30 = vand.u32 4294901760, %v4190_v48 }
 0x468   : > { %9653 = vmatprep.subr.mxu0 %v10553_v5  ;;  %9643 = vmatpush3.msra.mxu1 %v12058_v50  ;;  %v12217_v50 = vand.u32 4294901760, %v2584_v41 }
 0x469   : > { %9654 = vmatpush3.msra.mxu0 %v12114_v28  ;;  %9644 = vmatprep.subr.mxu1 %v10553_v5 }
 0x46a   : > { %9655 = vmatprep.subr.mxu0 %v10553_v5  ;;  %9645 = vmatpush3.msra.mxu1 %v12056_v61  ;;  %v12240_v51 = vsub.f32 %v2584_v41, %v12217_v50 }
 0x46b   : > { %9656 = vmatpush3.msra.mxu0 %v12122_v12  ;;  %9646 = vmatprep.subr.mxu1 %v10553_v5 }
 0x46c   : > { %9657 = vmatprep.subr.mxu0 %v10553_v5  ;;  %9647 = vmatpush3.msra.mxu1 %v12060_v15  ;;  %v12223_v15 = vand.u32 4294901760, %v12172_v40  ;;  %v4175_v44 = vand.u32 4294901760, %v12240_v51 }
 0x46d   : > { %9648 = vmatprep.mubr.msk.f32.mxu1 %vm10554_vm0, %v10553_v5  ;;  %9658 = vmatpush3.msra.mxu0 %v12132_v36 }
 0x46e   : > { %9659 = vmatprep.mubr.msk.f32.mxu0 %vm10554_vm0, %v10553_v5  ;;  %9649 = vmatmul.mubr.f32.vlgmr.msra.gmra.mxu1 %v12051_v60  ;;  %v12250_v33 = vsub.f32 %v12172_v40, %v12223_v15  ;;  %v4176_v56 = vsub.f32 %v12240_v51, %v4175_v44 }
 0x46f   : > { %9660 = vmatmul.mubr.f32.vlgmr.msra.gmra.mxu0 %v3648_v7  ;;  %9662 = vmatprep.subr.mxu1 %v10553_v5 }
 0x470   : > { %9673 = vmatprep.subr.mxu0 %v10553_v5  ;;  %9663 = vmatpush3.msra.mxu1 %v3683_v14  ;;  %v4182_v38 = vand.u32 4294901760, %v12250_v33  ;;  %v4177_v8 = vand.u32 4294901760, %v4176_v56 }
 0x471   : > { %9674 = vmatpush3.msra.mxu0 %v12125_v42  ;;  %9664 = vmatprep.subr.mxu1 %v10553_v5 }
 0x472   : > { %9675 = vmatprep.subr.mxu0 %v10553_v5  ;;  %9665 = vmatpush3.msra.mxu1 %v3690_v37  ;;  %v4183_v49 = vsub.f32 %v12250_v33, %v4182_v38 }
 0x473   : > { %9676 = vmatpush3.msra.mxu0 %v12135_v46  ;;  %9666 = vmatprep.subr.mxu1 %v10553_v5 }
 0x474   : > { %9677 = vmatprep.subr.mxu0 %v10553_v5  ;;  %9667 = vmatpush3.msra.mxu1 %v3697_v52  ;;  %v2449_v60 = vpop.permute.xlu0 %2448  ;;  %v4184_v10 = vand.u32 4294901760, %v4183_v49 }
 0x475   : > { %9678 = vmatpush3.msra.mxu0 %v12147_v58  ;;  %9668 = vmatprep.subr.mxu1 %v10553_v5  ;;  %v4060_v17 = vsel %vm2598_vm1, %v2449_v60, 0 }
 0x476   : > { %9679 = vmatprep.subr.mxu0 %v10553_v5  ;;  %9669 = vmatpush3.msra.mxu1 %v3704_v59  ;;  %v12215_v61 = vand.u32 4294901760, %v4060_v17 }
 0x477   : > { %9670 = vmatprep.mubr.msk.f32.mxu1 %vm10554_vm0, %v10553_v5  ;;  %9680 = vmatpush3.msra.mxu0 %v12156_v55 }
 0x478   : > { %9681 = vmatprep.mubr.msk.f32.mxu0 %vm10554_vm0, %v10553_v5  ;;  %9671 = vmatmul.mubr.f32.vlgmr.msra.gmra.mxu1 %v12106_v43  ;;  %v12231_v26 = vsub.f32 %v4060_v17, %v12215_v61 }
 0x479   : > { %9682 = vmatmul.mubr.f32.vlgmr.msra.gmra.mxu0 %v12119_v0  ;;  %9684 = vmatprep.subr.mxu1 %v10553_v5 }
 0x47a   : > { %9695 = vmatprep.subr.mxu0 %v10553_v5  ;;  %9685 = vmatpush3.msra.mxu1 %v12110_v27  ;;  %v4133_v54 = vand.u32 4294901760, %v12231_v26 }
 0x47b   : > { %9696 = vmatpush3.msra.mxu0 %v3681_v20  ;;  %9686 = vmatprep.subr.mxu1 %v10553_v5 }
 0x47c   : > { %9697 = vmatprep.subr.mxu0 %v10553_v5  ;;  %9687 = vmatpush3.msra.mxu1 %v12114_v28  ;;  %v4134_v18 = vsub.f32 %v12231_v26, %v4133_v54 }
 0x47d   : > { %9698 = vmatpush3.msra.mxu0 %v3688_v21  ;;  %9688 = vmatprep.subr.mxu1 %v10553_v5 }
 0x47e   : > { %9699 = vmatprep.subr.mxu0 %v10553_v5  ;;  %9689 = vmatpush3.msra.mxu1 %v12122_v12  ;;  %v4135_v19 = vand.u32 4294901760, %v4134_v18 }
 0x47f   : > { %9700 = vmatpush3.msra.mxu0 %v3695_v25  ;;  %9690 = vmatprep.subr.mxu1 %v10553_v5 }
 0x480   : > { %9701 = vmatprep.subr.mxu0 %v10553_v5  ;;  %9691 = vmatpush3.msra.mxu1 %v12132_v36 }
 0x481   : > { %9692 = vmatprep.mubr.msk.f32.mxu1 %vm10554_vm0, %v10553_v5  ;;  %9702 = vmatpush3.msra.mxu0 %v3702_v16 }
 0x482   : > { %9703 = vmatprep.mubr.msk.f32.mxu0 %vm10554_vm0, %v10553_v5  ;;  %9693 = vmatmul.mubr.f32.vlgmr.msra.gmra.mxu1 %v3646_v34 }
 0x483   : > { %9704 = vmatmul.mubr.f32.vlgmr.msra.gmra.mxu0 %v12106_v43  ;;  %9706 = vmatprep.subr.mxu1 %v10553_v5 }
 0x484   : > { %9717 = vmatprep.subr.mxu0 %v10553_v5  ;;  %9707 = vmatpush3.msra.mxu1 %v12110_v27 }
 0x485   : > { %9718 = vmatpush3.msra.mxu0 %v12212_v39  ;;  %9708 = vmatprep.subr.mxu1 %v10553_v5 }
 0x486   : > { %9719 = vmatprep.subr.mxu0 %v10553_v5  ;;  %9709 = vmatpush3.msra.mxu1 %v12114_v28 }
 0x487   : > { %9720 = vmatpush3.msra.mxu0 %v12217_v50  ;;  %9710 = vmatprep.subr.mxu1 %v10553_v5 }
 0x488   : > { %9721 = vmatprep.subr.mxu0 %v10553_v5  ;;  %9711 = vmatpush3.msra.mxu1 %v12122_v12 }
 0x489   : > { %9722 = vmatpush3.msra.mxu0 %v12223_v15  ;;  %9712 = vmatprep.subr.mxu1 %v10553_v5 }
 0x48a   : > { %9723 = vmatprep.subr.mxu0 %v10553_v5  ;;  %9713 = vmatpush3.msra.mxu1 %v12132_v36 }
 0x48b   : > { %9714 = vmatprep.mubr.msk.f32.mxu1 %vm10554_vm0, %v10553_v5  ;;  %9724 = vmatpush3.msra.mxu0 %v12237_v62 }
 0x48c   : > { %9725 = vmatprep.mubr.msk.f32.mxu0 %vm10554_vm0, %v10553_v5  ;;  %9715 = vmatmul.mubr.f32.vlgmr.msra.gmra.mxu1 %v12106_v43 }
 0x48d   : > { %9726 = vmatmul.mubr.f32.vlgmr.msra.gmra.mxu0 %v4135_v19  ;;  %9728 = vmatprep.subr.mxu1 %v10553_v5 }
 0x48e   : > { %9739 = vmatprep.subr.mxu0 %v10553_v5  ;;  %9729 = vmatpush3.msra.mxu1 %v4170_v3 }
 0x48f   : > { %9740 = vmatpush3.msra.mxu0 %v12228_v29  ;;  %9730 = vmatprep.subr.mxu1 %v10553_v5 }
 0x490   : > { %9741 = vmatprep.subr.mxu0 %v10553_v5  ;;  %9731 = vmatpush3.msra.mxu1 %v4177_v8 }
 0x491   : > { %9742 = vmatpush3.msra.mxu0 %v12240_v51  ;;  %9732 = vmatprep.subr.mxu1 %v10553_v5 }
 0x492   : > { %9743 = vmatprep.subr.mxu0 %v10553_v5  ;;  %9733 = vmatpush3.msra.mxu1 %v4184_v10 }
 0x493   : > { %9744 = vmatpush3.msra.mxu0 %v12250_v33  ;;  %9734 = vmatprep.subr.mxu1 %v10553_v5 }
 0x494   : > { %9745 = vmatprep.subr.mxu0 %v10553_v5  ;;  %9735 = vmatpush3.msra.mxu1 %v4191_v30 }
 0x495   : > { %9736 = vmatprep.mubr.msk.f32.mxu1 %vm10554_vm0, %v10553_v5  ;;  %9746 = vmatpush3.msra.mxu0 %v12262_v23 }
 0x496   : > { %9747 = vmatprep.mubr.msk.f32.mxu0 %vm10554_vm0, %v10553_v5  ;;  %9737 = vmatmul.mubr.f32.vlgmr.msra.gmra.mxu1 %v12215_v61 }
 0x497   : > { %9748 = vmatmul.mubr.f32.vlgmr.msra.gmra.mxu0 %v12231_v26  ;;  %9750 = vmatprep.subr.mxu1 %v10553_v5 }
 0x498   : > { %9761 = vmatprep.subr.mxu0 %v10553_v5  ;;  %9751 = vmatpush3.msra.mxu1 %v12212_v39 }
 0x499   : > { %9762 = vmatpush3.msra.mxu0 %v4168_v35  ;;  %9752 = vmatprep.subr.mxu1 %v10553_v5 }
 0x49a   : > { %9763 = vmatprep.subr.mxu0 %v10553_v5  ;;  %9753 = vmatpush3.msra.mxu1 %v12217_v50 }
 0x49b   : > { %9764 = vmatpush3.msra.mxu0 %v4175_v44  ;;  %9754 = vmatprep.subr.mxu1 %v10553_v5 }
 0x49c   : > { %9765 = vmatprep.subr.mxu0 %v10553_v5  ;;  %9755 = vmatpush3.msra.mxu1 %v12223_v15 }
 0x49d   : > { %9766 = vmatpush3.msra.mxu0 %v4182_v38  ;;  %9756 = vmatprep.subr.mxu1 %v10553_v5 }
 0x49e   : > { %9767 = vmatprep.subr.mxu0 %v10553_v5  ;;  %9757 = vmatpush3.msra.mxu1 %v12237_v62 }
 0x49f   : > { %9758 = vmatprep.mubr.msk.f32.mxu1 %vm10554_vm0, %v10553_v5  ;;  %9768 = vmatpush3.msra.mxu0 %v4189_v24 }
 0x4a0   : > { %9769 = vmatprep.mubr.msk.f32.mxu0 %vm10554_vm0, %v10553_v5  ;;  %9759 = vmatmul.mubr.f32.vlgmr.msra.gmra.mxu1 %v4133_v54 }
 0x4a1   : > { %9770 = vmatmul.mubr.f32.vlgmr.msra.gmra.mxu0 %v12215_v61  ;;  %9772 = vmatprep.subr.mxu1 %v10553_v5 }
 0x4a2   : > { %9773 = vmatpush3.msra.mxu1 %v12212_v39  ;;  %9780 = vmatprep.mubr.msk.f32.mxu1 %vm10554_vm0, %v10553_v5 }
 0x4a3   : > { %9774 = vmatprep.subr.mxu1 %v10553_v5 }
 0x4a4   : > { %9775 = vmatpush3.msra.mxu1 %v12217_v50 }
 0x4a5   : > { %9776 = vmatprep.subr.mxu1 %v10553_v5 }
 0x4a6   : > { %9777 = vmatpush3.msra.mxu1 %v12223_v15 }
 0x4a7   : > { %9778 = vmatprep.subr.mxu1 %v10553_v5 }
 0x4a8   : > { %9779 = vmatpush3.msra.mxu1 %v12237_v62 }
 0x4a9   : > { %9781 = vmatmul.mubr.f32.vlgmr.msra.gmra.mxu1 %v12215_v61 }
 0x4c8   : > { %v2676_v1 = vpop.f32.mrf.mxu0 }
 0x4ca   : > { %v9529_v31 = vpop.f32.mrf.mxu0 }
 0x4d0   : > { %v2767_v57 = vpop.f32.mrf.mxu1 }
 0x4d1   : > { %v2847_v9 = vpop.f32.mrf.mxu0  ;;  %v2768_v43 = vadd.f32 %v2767_v57, %v2676_v1 }
 0x4d2   : > { %v9540_v11 = vpop.f32.mrf.mxu1 }
 0x4d3   : > { %v9551_v22 = vpop.f32.mrf.mxu0  ;;  %v2848_v0 = vadd.f32 %v2847_v9, %v2768_v43 }
 0x4da   : > { %v2924_v27 = vpop.f32.mrf.mxu1 }
 0x4db   : > { %v3007_v28 = vpop.f32.mrf.mxu0  ;;  %v2925_v36 = vadd.f32 %v2924_v27, %v2848_v0 }
 0x4dc   : > { %v9562_v12 = vpop.f32.mrf.mxu1 }
 0x4dd   : > { %v9573_v42 = vpop.f32.mrf.mxu0  ;;  %v3008_v46 = vadd.f32 %v3007_v28, %v2925_v36 }
 0x4e3   : > { %v3082_v34 = vpop.f32.mrf.mxu1 }
 0x4e4   : > { %v3083_v53 = vadd.f32 %v3082_v34, %v3008_v46 }
 0x4e5   : > { %v9584_v58 = vpop.f32.mrf.mxu1 }
 0x4e6   : > { %v4548_v20 = vsel %vm4547_vm2, %v3083_v53, -inf }
 0x4e7   : > { %4549 = vmax.xlane.f32.xlu0 %v4548_v20 }
 0x512   : > { %v3163_v55 = vpop.f32.mrf.mxu0 }
 0x514   : > { %v9595_v21 = vpop.f32.mrf.mxu0 }
 0x51a   : > { %v3254_v63 = vpop.f32.mrf.mxu1 }
 0x51b   : > { %v3334_v25 = vpop.f32.mrf.mxu0  ;;  %v3255_v16 = vadd.f32 %v3254_v63, %v3163_v55 }
 0x51c   : > { %v9606_v45 = vpop.f32.mrf.mxu1 }
 0x51d   : > { %v9617_v40 = vpop.f32.mrf.mxu0  ;;  %v3335_v14 = vadd.f32 %v3334_v25, %v3255_v16 }
 0x524   : > { %v3411_v6 = vpop.f32.mrf.mxu1 }
 0x525   : > { %v3494_v7 = vpop.f32.mrf.mxu0  ;;  %v3412_v37 = vadd.f32 %v3411_v6, %v3335_v14 }
 0x526   : > { %v9628_v13 = vpop.f32.mrf.mxu1 }
 0x527   : > { %v9639_v32 = vpop.f32.mrf.mxu0  ;;  %v3495_v41 = vadd.f32 %v3494_v7, %v3412_v37 }
 0x52e   : > { %v3569_v52 = vpop.f32.mrf.mxu1 }
 0x52f   : > { %v3570_v59 = vadd.f32 %v3569_v52, %v3495_v41  ;;  %v3650_v60 = vpop.f32.mrf.mxu0 }
 0x530   : > { %v9650_v2 = vpop.f32.mrf.mxu1 }
 0x531   : > { %v9661_v17 = vpop.f32.mrf.mxu0  ;;  %v4551_v39 = vsel %vm4547_vm2, %v3570_v59, -inf }
 0x532   : > { %4552 = vmax.xlane.f32.xlu1 %v4551_v39 }
 0x538   : > { %v3741_v61 = vpop.f32.mrf.mxu1 }
 0x539   : > { %v3821_v50 = vpop.f32.mrf.mxu0  ;;  %v3742_v26 = vadd.f32 %v3741_v61, %v3650_v60 }
 0x53a   : > { %v9672_v15 = vpop.f32.mrf.mxu1 }
 0x53b   : > { %v9683_v29 = vpop.f32.mrf.mxu0  ;;  %v3822_v35 = vadd.f32 %v3821_v50, %v3742_v26 }
 0x542   : > { %v3898_v62 = vpop.f32.mrf.mxu1 }
 0x543   : > { %v3981_v51 = vpop.f32.mrf.mxu0  ;;  %2464 = vrot.lane.b32.xlu1 %v12010_v47, %s10556_s1  ;;  %v3899_v23 = vadd.f32 %v3898_v62, %v3822_v35 }
 0x544   : > { %v9694_v33 = vpop.f32.mrf.mxu1 }
 0x545   : > { %v9705_v54 = vpop.f32.mrf.mxu0  ;;  %v3982_v44 = vadd.f32 %v3981_v51, %v3899_v23 }
 0x54c   : > { %v4056_v38 = vpop.f32.mrf.mxu1 }
 0x54d   : > { %v4057_v4 = vadd.f32 %v4056_v38, %v3982_v44  ;;  %v4137_v18 = vpop.f32.mrf.mxu0 }
 0x54e   : > { %v9716_v24 = vpop.f32.mrf.mxu1 }
 0x54f   : > { %v9727_v56 = vpop.f32.mrf.mxu0  ;;  %v4554_v49 = vsel %vm4547_vm2, %v4057_v4, -inf }
 0x550   : > { %4555 = vmax.xlane.f32.xlu0 %v4554_v49 }
 0x556   : > { %v4228_v3 = vpop.f32.mrf.mxu1 }
 0x557   : > { %v4308_v19 = vpop.f32.mrf.mxu0  ;;  %v4229_v27 = vadd.f32 %v4228_v3, %v4137_v18 }
 0x558   : > { %v9738_v48 = vpop.f32.mrf.mxu1 }
 0x559   : > { %v9749_v8 = vpop.f32.mrf.mxu0  ;;  %v4309_v28 = vadd.f32 %v4308_v19, %v4229_v27 }
 0x560   : > { %v4385_v10 = vpop.f32.mrf.mxu1 }
 0x561   : > { %v4468_v30 = vpop.f32.mrf.mxu0  ;;  %v4386_v0 = vadd.f32 %v4385_v10, %v4309_v28 }
 0x562   : > { %v9760_v1 = vpop.f32.mrf.mxu1 }
 0x563   : > { %v9771_v31 = vpop.f32.mrf.mxu0  ;;  %v4469_v12 = vadd.f32 %v4468_v30, %v4386_v0 }
 0x569   : > { %v4543_v57 = vpop.f32.mrf.mxu1 }
 0x56a   : > { %v4544_v36 = vadd.f32 %v4543_v57, %v4469_v12 }
 0x56b   : > { %v9782_v9 = vpop.f32.mrf.mxu1 }
 0x56c   : > { %v4557_v34 = vsel %vm4547_vm2, %v4544_v36, -inf }
 0x570   : > { %v4550_v11 = vpop.xlane.xlu0 %4549 }
 0x571   : > { %v4560_v22 = vsub.f32 %v3083_v53, %v4550_v11 }
 0x573   : > { %v4564_v43 = vmul.f32 1.442695, %v4560_v22 }
 0x575   : > { %10287 = vpow2.f32 %v4564_v43 }
 0x582   : > { %v10288_v42 = vpop.eup %10287 }
 0x583   : > { %v4572_v46 = vsel %vm4547_vm2, %v10288_v42, 0.0 }
 0x584   : > { %4573 = vadd.xlane.f32.xlu0 %v4572_v46 }
 0x588   : > { %4558 = vmax.xlane.f32.xlu0 %v4557_v34 }
 0x59e   : > { %2461 = vrot.lane.b32.xlu0 %v12010_v47, %s10555_s27 }
 0x5bb   : > { %v4553_v58 = vpop.xlane.xlu1 %4552 }
 0x5bc   : > { %v4561_v20 = vsub.f32 %v3570_v59, %v4553_v58 }
 0x5be   : > { %v4566_v53 = vmul.f32 1.442695, %v4561_v20 }
 0x5bf   : > { %v2465_v2 = vpop.permute.xlu1 %2464 }
 0x5c0   : > { %10289 = vpow2.f32 %v4566_v53 }
 0x5cd   : > { %v10290_v55 = vpop.eup %10289 }
 0x5ce   : > { %v4575_v21 = vsel %vm4547_vm2, %v10290_v55, 0.0 }
 0x5cf   : > { %4576 = vadd.xlane.f32.xlu0 %v4575_v21 }
 0x5d9   : > { %v4556_v63 = vpop.xlane.xlu0 %4555 }
 0x5da   : > { %v4562_v25 = vsub.f32 %v4057_v4, %v4556_v63 }
 0x5dc   : > { %v4568_v45 = vmul.f32 1.442695, %v4562_v25 }
 0x5de   : > { %10291 = vpow2.f32 %v4568_v45 }
 0x5eb   : > { %v12352_v40 = vpop.eup %10291 }
 0x5ec   : > { %v4578_v16 = vsel %vm4547_vm2, %v12352_v40, 0.0 }
 0x5ed   : > { %4579 = vadd.xlane.f32.xlu1 %v4578_v16 }
 0x5fc   : > { %4592 = vxpose.xlu0.b32.start.end [1/1] (short) (narrow) %v12010_v47, 32 }
 0x5fe   : > { %2467 = vrot.lane.b32.xlu1 %v12010_v47, %s10557_s15 }
 0x60d   : > { %v4574_v6 = vpop.xlane.xlu0 %4573 }
 0x60e   : > { %10293 = vrcp.f32 %v4574_v6 }
 0x611   : > { %v4559_v7 = vpop.xlane.xlu0 %4558 }
 0x612   : > { %v4563_v13 = vsub.f32 %v4544_v36, %v4559_v7 }
 0x614   : > { %v4570_v14 = vmul.f32 1.442695, %v4563_v13 }
 0x615   : > { %v2462_v32 = vpop.permute.xlu0 %2461 }
 0x616   : > { %10295 = vpow2.f32 %v4570_v14  ;;  %4624 = vxpose.xlu0.b32.start.end [1/1] (short) (narrow) %v2462_v32, 32 }
 0x61b   : > { %v10294_v37 = vpop.eup %10293 }
 0x61c   : > { %v4585_v41 = vmul.f32 %v10294_v37, %v10288_v42 }
 0x61e   : > { %v4733_v52 = vsel %vm4547_vm2, %v4585_v41, 0 }
 0x61f   : > { %v12360_v59 = vand.u32 4294901760, %v4733_v52 }
 0x621   : > { %9783 = vmatprep.subr.mxu0 %v12360_v59  ;;  %v4873_v60 = vsub.f32 %v4733_v52, %v12360_v59 }
 0x622   : > { %9784 = vmatpush3.xpose.msra.mxu0 %v12360_v59 }
 0x623   : > { %v12365_v47 = vpop.eup %10295  ;;  %9799 = vmatprep.subr.mxu0 %v4873_v60  ;;  %4656 = vxpose.xlu0.b32.start.end [1/1] (short) (narrow) %v2465_v2, 32  ;;  %v12367_v17 = vand.u32 4294901760, %v4873_v60 }
 0x624   : > { %v4581_v39 = vsel %vm4547_vm2, %v12365_v47, 0.0 }
 0x625   : > { %4582 = vadd.xlane.f32.xlu1 %v4581_v39  ;;  %v4875_v61 = vsub.f32 %v4873_v60, %v12367_v17 }
 0x627   : > { %v4876_v50 = vand.u32 4294901760, %v4875_v61 }
 0x629   : > { %9791 = vmatprep.subr.mxu1 %v4876_v50 }
 0x62a   : > { %9792 = vmatpush3.xpose.msra.mxu1 %v4876_v50 }
 0x62b   : > { %9807 = vmatprep.subr.mxu1 %v12360_v59 }
 0x658   : > { %v4577_v15 = vpop.xlane.xlu0 %4576 }
 0x659   : > { %10297 = vrcp.f32 %v4577_v15 }
 0x666   : > { %v10298_v29 = vpop.eup %10297 }
 0x667   : > { %v4587_v26 = vmul.f32 %v10298_v29, %v10290_v55 }
 0x669   : > { %v5323_v35 = vsel %vm4547_vm2, %v4587_v26, 0 }
 0x66a   : > { %v12379_v4 = vand.u32 4294901760, %v5323_v35 }
 0x66c   : > { %v12387_v48 = vsub.f32 %v5323_v35, %v12379_v4 }
 0x66e   : > { %v12397_v11 = vand.u32 4294901760, %v12387_v48 }
 0x670   : > { %v5465_v12 = vsub.f32 %v12387_v48, %v12397_v11 }
 0x672   : > { %v5466_v58 = vand.u32 4294901760, %v5465_v12 }
 0x676   : > { %v4580_v62 = vpop.xlane.xlu1 %4579 }
 0x677   : > { %10299 = vrcp.f32 %v4580_v62 }
 0x678   : > { %v4608_v51 = vpop.trf.xlu0 }
 0x679   : > { %v4721_v33 = vsel %vm4547_vm2, %v4608_v51, 0 }
 0x67a   : > { %v2468_v54 = vpop.permute.xlu1 %2467  ;;  %v12375_v23 = vand.u32 4294901760, %v4721_v33 }
 0x67b   : > { %4688 = vxpose.xlu0.b32.start.end [1/1] (short) (narrow) %v2468_v54, 32 }
 0x67c   : > { %v4802_v44 = vsub.f32 %v4721_v33, %v12375_v23  ;;  %v4609_v38 = vpop.trf.xlu0  ;;  %9793 = vmatprep.mubr.f32.mxu1 %v12375_v23 }
 0x67d   : > { %v4724_v18 = vsel %vm4547_vm2, %v4609_v38, 0 }
 0x67e   : > { %v4803_v24 = vand.u32 4294901760, %v4802_v44  ;;  %v12382_v56 = vand.u32 4294901760, %v4724_v18 }
 0x680   : > { %v4812_v49 = vsub.f32 %v4724_v18, %v12382_v56  ;;  %9794 = vmatmul.mubr.f32.vlgmr.msra.gmra.mxu1 %v12382_v56  ;;  %v4610_v3 = vpop.trf.xlu0  ;;  %v4804_v19 = vsub.f32 %v4802_v44, %v4803_v24 }
 0x681   : > { %9808 = vmatpush3.xpose.msra.mxu1 %v12360_v59  ;;  %v4727_v8 = vsel %vm4547_vm2, %v4610_v3, 0 }
 0x682   : > { %v4813_v10 = vand.u32 4294901760, %v4812_v49  ;;  %v12391_v30 = vand.u32 4294901760, %v4727_v8  ;;  %9823 = vmatprep.subr.mxu1 %v12360_v59  ;;  %v4805_v1 = vand.u32 4294901760, %v4804_v19 }
 0x684   : > { %v4814_v31 = vsub.f32 %v4812_v49, %v4813_v10  ;;  %v4822_v57 = vsub.f32 %v4727_v8, %v12391_v30  ;;  %v4611_v9 = vpop.trf.xlu0  ;;  %9785 = vmatprep.mubr.f32.mxu0 %v4805_v1  ;;  %9796 = vmatprep.mubr.f32.mxu1 %v12391_v30  ;;  %v10300_v34 = vpop.eup %10299 }
 0x685   : > { %v4730_v22 = vsel %vm4547_vm2, %v4611_v9, 0  ;;  %v4589_v55 = vmul.f32 %v10300_v34, %v12352_v40 }
 0x686   : > { %v4815_v43 = vand.u32 4294901760, %v4814_v31  ;;  %v4823_v27 = vand.u32 4294901760, %v4822_v57  ;;  %v12400_v28 = vand.u32 4294901760, %v4730_v22 }
 0x687   : > { %v5913_v25 = vsel %vm4547_vm2, %v4589_v55, 0 }
 0x688   : > { %v4832_v0 = vsub.f32 %v4730_v22, %v12400_v28  ;;  %9786 = vmatmul.mubr.f32.vlgmr.msra.gmra.mxu0 %v4815_v43  ;;  %9797 = vmatmul.mubr.f32.gmra.mxu1 %v12400_v28  ;;  %v4824_v42 = vsub.f32 %v4822_v57, %v4823_v27  ;;  %v12421_v6 = vand.u32 4294901760, %v5913_v25 }
 0x689   : > { %9800 = vmatpush3.xpose.msra.mxu0 %v4873_v60  ;;  %9809 = vmatprep.mubr.f32.mxu1 %v4803_v24 }
 0x68a   : > { %v4833_v36 = vand.u32 4294901760, %v4832_v0  ;;  %9815 = vmatprep.subr.mxu0 %v12367_v17  ;;  %v4825_v46 = vand.u32 4294901760, %v4824_v42  ;;  %v12434_v52 = vsub.f32 %v5913_v25, %v12421_v6 }
 0x68c   : > { %9810 = vmatmul.mubr.f32.vlgmr.msra.gmra.mxu1 %v4813_v10  ;;  %9788 = vmatprep.mubr.f32.mxu0 %v4825_v46  ;;  %v4834_v20 = vsub.f32 %v4832_v0, %v4833_v36  ;;  %v12447_v15 = vand.u32 4294901760, %v12434_v52 }
 0x68d   : > { %9824 = vmatpush3.xpose.msra.mxu1 %v12360_v59  ;;  %9812 = vmatprep.mubr.f32.mxu1 %v4823_v27 }
 0x68e   : > { %9839 = vmatprep.subr.mxu1 %v5466_v58  ;;  %v4835_v53 = vand.u32 4294901760, %v4834_v20  ;;  %v6055_v35 = vsub.f32 %v12434_v52, %v12447_v15 }
 0x690   : > { %9789 = vmatmul.mubr.f32.gmra.mxu0 %v4835_v53  ;;  %9813 = vmatmul.mubr.f32.gmra.mxu1 %v4833_v36  ;;  %v6056_v24 = vand.u32 4294901760, %v6055_v35 }
 0x691   : > { %9801 = vmatprep.mubr.f32.mxu0 %v4802_v44  ;;  %9825 = vmatprep.mubr.f32.mxu1 %v12375_v23 }
 0x692   : > { %v4640_v21 = vpop.trf.xlu0 }
 0x693   : > { %v5311_v63 = vsel %vm4547_vm2, %v4640_v21, 0 }
 0x694   : > { %v12412_v45 = vand.u32 4294901760, %v5311_v63  ;;  %9802 = vmatmul.mubr.f32.vlgmr.msra.gmra.mxu0 %v4812_v49  ;;  %9826 = vmatmul.mubr.f32.vlgmr.msra.gmra.mxu1 %v12382_v56 }
 0x695   : > { %9816 = vmatpush3.xpose.msra.mxu0 %v12367_v17  ;;  %9840 = vmatpush3.xpose.msra.mxu1 %v5466_v58 }
 0x696   : > { %v12417_v40 = vsub.f32 %v5311_v63, %v12412_v45  ;;  %9831 = vmatprep.subr.mxu0 %v12379_v4  ;;  %9855 = vmatprep.subr.mxu1 %v12379_v4  ;;  %v4641_v16 = vpop.trf.xlu0 }
 0x697   : > { %9804 = vmatprep.mubr.f32.mxu0 %v4822_v57  ;;  %9828 = vmatprep.mubr.f32.mxu1 %v12391_v30  ;;  %v5314_v7 = vsel %vm4547_vm2, %v4641_v16, 0 }
 0x698   : > { %v5393_v13 = vand.u32 4294901760, %v12417_v40  ;;  %v12426_v14 = vand.u32 4294901760, %v5314_v7  ;;  %9805 = vmatmul.mubr.f32.gmra.mxu0 %v4832_v0  ;;  %9829 = vmatmul.mubr.f32.gmra.mxu1 %v12400_v28 }
 0x699   : > { %9817 = vmatprep.mubr.f32.mxu0 %v12375_v23  ;;  %9841 = vmatprep.mubr.f32.mxu1 %v12412_v45 }
 0x69a   : > { %v5402_v32 = vsub.f32 %v5314_v7, %v12426_v14  ;;  %v4642_v37 = vpop.trf.xlu0  ;;  %v5394_v41 = vsub.f32 %v12417_v40, %v5393_v13 }
 0x69b   : > { %v5317_v59 = vsel %vm4547_vm2, %v4642_v37, 0 }
 0x69c   : > { %v5403_v60 = vand.u32 4294901760, %v5402_v32  ;;  %v12437_v2 = vand.u32 4294901760, %v5317_v59  ;;  %9818 = vmatmul.mubr.f32.vlgmr.msra.gmra.mxu0 %v12382_v56  ;;  %9842 = vmatmul.mubr.f32.vlgmr.msra.gmra.mxu1 %v12426_v14  ;;  %v5395_v17 = vand.u32 4294901760, %v5394_v41 }
 0x69d   : > { %9832 = vmatpush3.xpose.msra.mxu0 %v12379_v4  ;;  %9856 = vmatpush3.xpose.msra.mxu1 %v12379_v4 }
 0x69e   : > { %v5404_v39 = vsub.f32 %v5402_v32, %v5403_v60  ;;  %v5412_v61 = vsub.f32 %v5317_v59, %v12437_v2  ;;  %9847 = vmatprep.subr.mxu0 %v12387_v48  ;;  %9871 = vmatprep.subr.mxu1 %v12379_v4  ;;  %v4643_v50 = vpop.trf.xlu0 }
 0x69f   : > { %9820 = vmatprep.mubr.f32.mxu0 %v12391_v30  ;;  %v5320_v29 = vsel %vm4547_vm2, %v4643_v50, 0  ;;  %9844 = vmatprep.mubr.f32.mxu1 %v12437_v2 }
 0x6a0   : > { %v5405_v26 = vand.u32 4294901760, %v5404_v39  ;;  %v5413_v62 = vand.u32 4294901760, %v5412_v61  ;;  %v12452_v51 = vand.u32 4294901760, %v5320_v29  ;;  %9821 = vmatmul.mubr.f32.gmra.mxu0 %v12400_v28 }
 0x6a1   : > { %9833 = vmatprep.mubr.f32.mxu0 %v5395_v17 }
 0x6a2   : > { %v5422_v33 = vsub.f32 %v5320_v29, %v12452_v51  ;;  %9845 = vmatmul.mubr.f32.gmra.mxu1 %v12452_v51  ;;  %v5414_v54 = vsub.f32 %v5412_v61, %v5413_v62  ;;  %v4672_v23 = vpop.trf.xlu0 }
 0x6a3   : > { %9857 = vmatprep.mubr.f32.mxu1 %v5393_v13  ;;  %v5901_v18 = vsel %vm4547_vm2, %v4672_v23, 0 }
 0x6a4   : > { %v5423_v44 = vand.u32 4294901760, %v5422_v33  ;;  %9834 = vmatmul.mubr.f32.vlgmr.msra.gmra.mxu0 %v5405_v26  ;;  %v5415_v38 = vand.u32 4294901760, %v5414_v54  ;;  %v12463_v3 = vand.u32 4294901760, %v5901_v18 }
 0x6a5   : > { %9848 = vmatpush3.xpose.msra.mxu0 %v12387_v48 }
 0x6a6   : > { %9863 = vmatprep.subr.mxu0 %v12397_v11  ;;  %9858 = vmatmul.mubr.f32.vlgmr.msra.gmra.mxu1 %v5403_v60  ;;  %v5424_v56 = vsub.f32 %v5422_v33, %v5423_v44  ;;  %v4673_v49 = vpop.trf.xlu0  ;;  %v12469_v30 = vsub.f32 %v5901_v18, %v12463_v3 }
 0x6a7   : > { %9872 = vmatpush3.xpose.msra.mxu1 %v12379_v4  ;;  %9836 = vmatprep.mubr.f32.mxu0 %v5415_v38  ;;  %v5904_v19 = vsel %vm4547_vm2, %v4673_v49, 0 }
 0x6a8   : > { %9887 = vmatprep.subr.mxu1 %v6056_v24  ;;  %9860 = vmatprep.mubr.f32.mxu1 %v5413_v62  ;;  %v5425_v8 = vand.u32 4294901760, %v5424_v56  ;;  %v12466_v10 = vand.u32 4294901760, %v5904_v19  ;;  %v5983_v22 = vand.u32 4294901760, %v12469_v30 }
 0x6aa   : > { %9837 = vmatmul.mubr.f32.gmra.mxu0 %v5425_v8  ;;  %9861 = vmatmul.mubr.f32.gmra.mxu1 %v5423_v44  ;;  %v4674_v48 = vpop.trf.xlu0  ;;  %v5992_v57 = vsub.f32 %v5904_v19, %v12466_v10  ;;  %v5984_v12 = vsub.f32 %v12469_v30, %v5983_v22 }
 0x6ab   : > { %9849 = vmatprep.mubr.f32.mxu0 %v12417_v40  ;;  %9873 = vmatprep.mubr.f32.mxu1 %v12412_v45  ;;  %v5907_v4 = vsel %vm4547_vm2, %v4674_v48, 0 }
 0x6ac   : > { %v12474_v1 = vand.u32 4294901760, %v5907_v4  ;;  %v5993_v0 = vand.u32 4294901760, %v5992_v57  ;;  %v5985_v34 = vand.u32 4294901760, %v5984_v12 }
 0x6ae   : > { %v4583_v31 = vpop.xlane.xlu1 %4582  ;;  %9850 = vmatmul.mubr.f32.vlgmr.msra.gmra.mxu0 %v5402_v32  ;;  %9874 = vmatmul.mubr.f32.vlgmr.msra.gmra.mxu1 %v12426_v14  ;;  %v4675_v9 = vpop.trf.xlu0  ;;  %v6002_v27 = vsub.f32 %v5907_v4, %v12474_v1  ;;  %v5994_v36 = vsub.f32 %v5992_v57, %v5993_v0 }
 0x6af   : > { %10301 = vrcp.f32 %v4583_v31  ;;  %9864 = vmatpush3.xpose.msra.mxu0 %v12397_v11  ;;  %9888 = vmatpush3.xpose.msra.mxu1 %v6056_v24  ;;  %v5910_v43 = vsel %vm4547_vm2, %v4675_v9, 0 }
 0x6b0   : > { %9879 = vmatprep.subr.mxu0 %v12421_v6  ;;  %9903 = vmatprep.subr.mxu1 %v12421_v6  ;;  %v12484_v28 = vand.u32 4294901760, %v5910_v43  ;;  %v6003_v42 = vand.u32 4294901760, %v6002_v27  ;;  %v5995_v20 = vand.u32 4294901760, %v5994_v36 }
 0x6b1   : > { %9852 = vmatprep.mubr.f32.mxu0 %v5412_v61  ;;  %9876 = vmatprep.mubr.f32.mxu1 %v12437_v2 }
 0x6b2   : > { %9853 = vmatmul.mubr.f32.gmra.mxu0 %v5422_v33  ;;  %9877 = vmatmul.mubr.f32.gmra.mxu1 %v12452_v51  ;;  %v6012_v11 = vsub.f32 %v5910_v43, %v12484_v28  ;;  %v6004_v58 = vsub.f32 %v6002_v27, %v6003_v42 }
 0x6b3   : > { %9865 = vmatprep.mubr.f32.mxu0 %v12412_v45  ;;  %9889 = vmatprep.mubr.f32.mxu1 %v12463_v3 }
 0x6b4   : > { %v6013_v46 = vand.u32 4294901760, %v6012_v11  ;;  %v6005_v21 = vand.u32 4294901760, %v6004_v58 }
 0x6b6   : > { %9866 = vmatmul.mubr.f32.vlgmr.msra.gmra.mxu0 %v12426_v14  ;;  %9890 = vmatmul.mubr.f32.vlgmr.msra.gmra.mxu1 %v12466_v10  ;;  %v6014_v53 = vsub.f32 %v6012_v11, %v6013_v46 }
 0x6b7   : > { %9880 = vmatpush3.xpose.msra.mxu0 %v12421_v6  ;;  %9904 = vmatpush3.xpose.msra.mxu1 %v12421_v6 }
 0x6b8   : > { %9895 = vmatprep.subr.mxu0 %v12434_v52  ;;  %9919 = vmatprep.subr.mxu1 %v12421_v6  ;;  %v6015_v25 = vand.u32 4294901760, %v6014_v53 }
 0x6b9   : > { %9868 = vmatprep.mubr.f32.mxu0 %v12437_v2  ;;  %9892 = vmatprep.mubr.f32.mxu1 %v12474_v1 }
 0x6ba   : > { %9869 = vmatmul.mubr.f32.gmra.mxu0 %v12452_v51  ;;  %9893 = vmatmul.mubr.f32.gmra.mxu1 %v12484_v28 }
 0x6bb   : > { %9881 = vmatprep.mubr.f32.mxu0 %v5985_v34  ;;  %9905 = vmatprep.mubr.f32.mxu1 %v5983_v22 }
 0x6bc   : > { %v10302_v55 = vpop.eup %10301 }
 0x6bd   : > { %v4591_v63 = vmul.f32 %v10302_v55, %v12365_v47 }
 0x6be   : > { %9882 = vmatmul.mubr.f32.vlgmr.msra.gmra.mxu0 %v5995_v20  ;;  %9906 = vmatmul.mubr.f32.vlgmr.msra.gmra.mxu1 %v5993_v0 }
 0x6bf   : > { %v6503_v45 = vsel %vm4547_vm2, %v4591_v63, 0  ;;  %9896 = vmatpush3.xpose.msra.mxu0 %v12434_v52  ;;  %9920 = vmatpush3.xpose.msra.mxu1 %v12421_v6 }
 0x6c0   : > { %v12506_v40 = vand.u32 4294901760, %v6503_v45  ;;  %9911 = vmatprep.subr.mxu0 %v12447_v15  ;;  %9884 = vmatprep.mubr.f32.mxu0 %v6005_v21 }
 0x6c1   : > { %9908 = vmatprep.mubr.f32.mxu1 %v6003_v42 }
 0x6c2   : > { %9885 = vmatmul.mubr.f32.gmra.mxu0 %v6015_v25  ;;  %9909 = vmatmul.mubr.f32.gmra.mxu1 %v6013_v46  ;;  %v6643_v16 = vsub.f32 %v6503_v45, %v12506_v40 }
 0x6c3   : > { %9897 = vmatprep.mubr.f32.mxu0 %v12469_v30  ;;  %9921 = vmatprep.mubr.f32.mxu1 %v12463_v3 }
 0x6c4   : > { %v12512_v47 = vand.u32 4294901760, %v6643_v16 }
 0x6c6   : > { %9898 = vmatmul.mubr.f32.vlgmr.msra.gmra.mxu0 %v5992_v57  ;;  %v6645_v7 = vsub.f32 %v6643_v16, %v12512_v47  ;;  %9922 = vmatmul.mubr.f32.vlgmr.msra.gmra.mxu1 %v12466_v10 }
 0x6c7   : > { %9912 = vmatpush3.xpose.msra.mxu0 %v12447_v15  ;;  %9900 = vmatprep.mubr.f32.mxu0 %v6002_v27 }
 0x6c8   : > { %9927 = vmatprep.subr.mxu0 %v12506_v40  ;;  %v6646_v6 = vand.u32 4294901760, %v6645_v7  ;;  %9924 = vmatprep.mubr.f32.mxu1 %v12474_v1 }
 0x6ca   : > { %9901 = vmatmul.mubr.f32.gmra.mxu0 %v6012_v11  ;;  %9935 = vmatprep.subr.mxu1 %v6646_v6 }
 0x6cb   : > { %9936 = vmatpush3.xpose.msra.mxu1 %v6646_v6  ;;  %9913 = vmatprep.mubr.f32.mxu0 %v12463_v3 }
 0x6cc   : > { %9951 = vmatprep.subr.mxu1 %v12506_v40  ;;  %9925 = vmatmul.mubr.f32.gmra.mxu1 %v12484_v28 }
 0x6ce   : > { %9914 = vmatmul.mubr.f32.vlgmr.msra.gmra.mxu0 %v12466_v10 }
 0x6cf   : > { %9928 = vmatpush3.xpose.msra.mxu0 %v12506_v40  ;;  %9916 = vmatprep.mubr.f32.mxu0 %v12474_v1 }
 0x6d0   : > { %9943 = vmatprep.subr.mxu0 %v6643_v16 }
 0x6d2   : > { %9917 = vmatmul.mubr.f32.gmra.mxu0 %v12484_v28 }
 0x6f7   : > { %v4704_v13 = vpop.trf.xlu0 }
 0x6f8   : > { %v6491_v14 = vsel %vm4547_vm2, %v4704_v13, 0 }
 0x6f9   : > { %v6571_v32 = vand.u32 4294901760, %v6491_v14 }
 0x6fb   : > { %v6572_v37 = vsub.f32 %v6491_v14, %v6571_v32  ;;  %9937 = vmatprep.mubr.f32.mxu1 %v6571_v32  ;;  %v4705_v41 = vpop.trf.xlu0 }
 0x6fc   : > { %v6494_v52 = vsel %vm4547_vm2, %v4705_v41, 0 }
 0x6fd   : > { %v6573_v59 = vand.u32 4294901760, %v6572_v37  ;;  %v6581_v60 = vand.u32 4294901760, %v6494_v52 }
 0x6ff   : > { %v6582_v2 = vsub.f32 %v6494_v52, %v6581_v60  ;;  %9938 = vmatmul.mubr.f32.vlgmr.msra.gmra.mxu1 %v6581_v60  ;;  %v4706_v17 = vpop.trf.xlu0  ;;  %v6574_v39 = vsub.f32 %v6572_v37, %v6573_v59 }
 0x700   : > { %9952 = vmatpush3.xpose.msra.mxu1 %v12506_v40  ;;  %v6497_v61 = vsel %vm4547_vm2, %v4706_v17, 0 }
 0x701   : > { %v6583_v50 = vand.u32 4294901760, %v6582_v2  ;;  %v6591_v15 = vand.u32 4294901760, %v6497_v61  ;;  %9967 = vmatprep.subr.mxu1 %v12506_v40  ;;  %v6575_v29 = vand.u32 4294901760, %v6574_v39 }
 0x703   : > { %v6584_v26 = vsub.f32 %v6582_v2, %v6583_v50  ;;  %v6592_v62 = vsub.f32 %v6497_v61, %v6591_v15  ;;  %9929 = vmatprep.mubr.f32.mxu0 %v6575_v29  ;;  %9940 = vmatprep.mubr.f32.mxu1 %v6591_v15  ;;  %v4707_v51 = vpop.trf.xlu0 }
 0x704   : > { %v6500_v33 = vsel %vm4547_vm2, %v4707_v51, 0 }
 0x705   : > { %v6585_v35 = vand.u32 4294901760, %v6584_v26  ;;  %v6593_v54 = vand.u32 4294901760, %v6592_v62  ;;  %v6601_v23 = vand.u32 4294901760, %v6500_v33 }
 0x707   : > { %v6602_v44 = vsub.f32 %v6500_v33, %v6601_v23  ;;  %9930 = vmatmul.mubr.f32.vlgmr.msra.gmra.mxu0 %v6585_v35  ;;  %9941 = vmatmul.mubr.f32.gmra.mxu1 %v6601_v23  ;;  %v6594_v38 = vsub.f32 %v6592_v62, %v6593_v54 }
 0x708   : > { %9944 = vmatpush3.xpose.msra.mxu0 %v6643_v16  ;;  %9953 = vmatprep.mubr.f32.mxu1 %v6573_v59 }
 0x709   : > { %v6603_v18 = vand.u32 4294901760, %v6602_v44  ;;  %9959 = vmatprep.subr.mxu0 %v12512_v47  ;;  %v6595_v24 = vand.u32 4294901760, %v6594_v38 }
 0x70b   : > { %9932 = vmatprep.mubr.f32.mxu0 %v6595_v24  ;;  %9954 = vmatmul.mubr.f32.vlgmr.msra.gmra.mxu1 %v6583_v50  ;;  %v6604_v56 = vsub.f32 %v6602_v44, %v6603_v18 }
 0x70c   : > { %9968 = vmatpush3.xpose.msra.mxu1 %v12506_v40  ;;  %9956 = vmatprep.mubr.f32.mxu1 %v6593_v54 }
 0x70d   : > { %v6605_v49 = vand.u32 4294901760, %v6604_v56  ;;  %10010 = vmatprep.subr.mxu1 %v10553_v5 }
 0x70f   : > { %9933 = vmatmul.mubr.f32.gmra.mxu0 %v6605_v49  ;;  %9957 = vmatmul.mubr.f32.gmra.mxu1 %v6603_v18 }
 0x710   : > { %9945 = vmatprep.mubr.f32.mxu0 %v6572_v37  ;;  %9969 = vmatprep.mubr.f32.mxu1 %v6571_v32 }
 0x713   : > { %9946 = vmatmul.mubr.f32.vlgmr.msra.gmra.mxu0 %v6582_v2  ;;  %9970 = vmatmul.mubr.f32.vlgmr.msra.gmra.mxu1 %v6581_v60 }
 0x714   : > { %9960 = vmatpush3.xpose.msra.mxu0 %v12512_v47  ;;  %9948 = vmatprep.mubr.f32.mxu0 %v6592_v62 }
 0x715   : > { %9972 = vmatprep.mubr.f32.mxu1 %v6591_v15  ;;  %9975 = vmatprep.subr.mxu0 %v10553_v5 }
 0x717   : > { %9949 = vmatmul.mubr.f32.gmra.mxu0 %v6602_v44  ;;  %9973 = vmatmul.mubr.f32.gmra.mxu1 %v6601_v23 }
 0x718   : > { %9961 = vmatprep.mubr.f32.mxu0 %v6571_v32  ;;  %10042 = vmatprep.mubr.msk.f32.mxu1 %vm10554_vm0, %v10553_v5 }
 0x71b   : > { %9962 = vmatmul.mubr.f32.vlgmr.msra.gmra.mxu0 %v6581_v60 }
 0x71c   : > { %9964 = vmatprep.mubr.f32.mxu0 %v6591_v15 }
 0x71f   : > { %9965 = vmatmul.mubr.f32.gmra.mxu0 %v6601_v23 }
 0x720   : > { %10007 = vmatprep.mubr.msk.f32.mxu0 %vm10554_vm0, %v10553_v5 }
 0x740   : > { %v9795_v3 = vpop.f32.mrf.mxu1 }
 0x742   : > { %v4913_v19 = vpop.f32.mrf.mxu1 }
 0x748   : > { %v9787_v8 = vpop.f32.mrf.mxu0  ;;  %v9798_v10 = vpop.f32.mrf.mxu1 }
 0x749   : > { %v4920_v43 = vadd.f32 %v9795_v3, %v9787_v8 }
 0x74a   : > { %v4925_v48 = vpop.f32.mrf.mxu1  ;;  %v4807_v30 = vpop.f32.mrf.mxu0 }
 0x74b   : > { %v4914_v27 = vadd.f32 %v4913_v19, %v4807_v30 }
 0x74c   : > { %v9811_v4 = vpop.f32.mrf.mxu1 }
 0x74e   : > { %v5100_v1 = vpop.f32.mrf.mxu1 }
 0x750   : > { %v9790_v31 = vpop.f32.mrf.mxu0  ;;  %v9814_v57 = vpop.f32.mrf.mxu1 }
 0x751   : > { %v4932_v55 = vadd.f32 %v9798_v10, %v9790_v31 }
 0x752   : > { %v4827_v9 = vpop.f32.mrf.mxu0  ;;  %v5116_v22 = vpop.f32.mrf.mxu1 }
 0x753   : > { %v4926_v42 = vadd.f32 %v4925_v48, %v4827_v9 }
 0x754   : > { %v9803_v28 = vpop.f32.mrf.mxu0  ;;  %v9827_v0 = vpop.f32.mrf.mxu1 }
 0x755   : > { %v5013_v36 = vadd.f32 %v9803_v28, %v4920_v43 }
 0x756   : > { %v5005_v11 = vpop.f32.mrf.mxu0  ;;  %v5288_v12 = vpop.f32.mrf.mxu1 }
 0x757   : > { %v5006_v46 = vadd.f32 %v5005_v11, %v4914_v27  ;;  %v5109_v21 = vadd.f32 %v9811_v4, %v5013_v36 }
 0x758   : > { %v9806_v34 = vpop.f32.mrf.mxu0  ;;  %v9830_v58 = vpop.f32.mrf.mxu1 }
 0x759   : > { %v5101_v63 = vadd.f32 %v5100_v1, %v5006_v46  ;;  %v5027_v7 = vadd.f32 %v9806_v34, %v4932_v55 }
 0x75a   : > { %v5019_v20 = vpop.f32.mrf.mxu0  ;;  %v5300_v53 = vpop.f32.mrf.mxu1 }
 0x75b   : > { %v5020_v25 = vadd.f32 %v5019_v20, %v4926_v42  ;;  %v5125_v59 = vadd.f32 %v9814_v57, %v5027_v7 }
 0x75c   : > { %v9819_v45 = vpop.f32.mrf.mxu0  ;;  %v9843_v40 = vpop.f32.mrf.mxu1 }
 0x75d   : > { %v5117_v6 = vadd.f32 %v5116_v22, %v5020_v25  ;;  %v5205_v13 = vadd.f32 %v9819_v45, %v5109_v21 }
 0x75e   : > { %v5198_v16 = vpop.f32.mrf.mxu0  ;;  %v5503_v47 = vpop.f32.mrf.mxu1 }
 0x75f   : > { %v5199_v14 = vadd.f32 %v5198_v16, %v5101_v63  ;;  %v5295_v60 = vadd.f32 %v9827_v0, %v5205_v13 }
 0x760   : > { %v9822_v32 = vpop.f32.mrf.mxu0 }
 0x761   : > { %v5289_v37 = vadd.f32 %v5288_v12, %v5199_v14  ;;  %v5217_v15 = vadd.f32 %v9822_v32, %v5125_v59 }
 0x762   : > { %v5210_v41 = vpop.f32.mrf.mxu0  ;;  %v9846_v52 = vpop.f32.mrf.mxu1 }
 0x763   : > { %v5211_v2 = vadd.f32 %v5210_v41, %v5117_v6  ;;  %7080 = vxpose.xlu1.b32.start [1/4] (short) (narrow) %v5289_v37, 8  ;;  %v5307_v33 = vadd.f32 %v9830_v58, %v5217_v15 }
 0x764   : > { %v9835_v17 = vpop.f32.mrf.mxu0  ;;  %v5515_v39 = vpop.f32.mrf.mxu1 }
 0x765   : > { %v5301_v29 = vadd.f32 %v5300_v53, %v5211_v2  ;;  %v5510_v23 = vadd.f32 %v9843_v40, %v9835_v17 }
 0x766   : > { %v5397_v61 = vpop.f32.mrf.mxu0  ;;  %v9859_v50 = vpop.f32.mrf.mxu1 }
 0x767   : > { %7081 = vxpose.xlu1.b32.cont [2/4] (short) (narrow) %v5295_v60, 8  ;;  %v5504_v44 = vadd.f32 %v5503_v47, %v5397_v61 }
 0x768   : > { %v5690_v26 = vpop.f32.mrf.mxu1 }
 0x76a   : > { %v9838_v62 = vpop.f32.mrf.mxu0  ;;  %v9862_v51 = vpop.f32.mrf.mxu1 }
 0x76b   : > { %7082 = vxpose.xlu1.b32.cont [3/4] (short) (narrow) %v5301_v29, 8  ;;  %v5522_v4 = vadd.f32 %v9846_v52, %v9838_v62 }
 0x76c   : > { %v5417_v35 = vpop.f32.mrf.mxu0  ;;  %v5706_v54 = vpop.f32.mrf.mxu1 }
 0x76d   : > { %v5516_v49 = vadd.f32 %v5515_v39, %v5417_v35 }
 0x76e   : > { %v9851_v38 = vpop.f32.mrf.mxu0  ;;  %v9875_v18 = vpop.f32.mrf.mxu1 }
 0x76f   : > { %7083 = vxpose.xlu1.b32.end [4/4] (short) (narrow) %v5307_v33, 8  ;;  %v5603_v3 = vadd.f32 %v9851_v38, %v5510_v23 }
 0x770   : > { %v5595_v24 = vpop.f32.mrf.mxu0  ;;  %v5878_v56 = vpop.f32.mrf.mxu1 }
 0x771   : > { %v5596_v19 = vadd.f32 %v5595_v24, %v5504_v44  ;;  %v5699_v1 = vadd.f32 %v9859_v50, %v5603_v3 }
 0x772   : > { %v9854_v8 = vpop.f32.mrf.mxu0  ;;  %v9878_v10 = vpop.f32.mrf.mxu1 }
 0x773   : > { %v5691_v31 = vadd.f32 %v5690_v26, %v5596_v19  ;;  %v5617_v28 = vadd.f32 %v9854_v8, %v5522_v4 }
 0x774   : > { %v5609_v48 = vpop.f32.mrf.mxu0  ;;  %v5890_v30 = vpop.f32.mrf.mxu1 }
 0x775   : > { %v5610_v57 = vadd.f32 %v5609_v48, %v5516_v49  ;;  %v5715_v20 = vadd.f32 %v9862_v51, %v5617_v28 }
 0x776   : > { %v9867_v9 = vpop.f32.mrf.mxu0  ;;  %v9891_v22 = vpop.f32.mrf.mxu1 }
 0x777   : > { %v5707_v0 = vadd.f32 %v5706_v54, %v5610_v57  ;;  %v5795_v11 = vadd.f32 %v9867_v9, %v5699_v1 }
 0x778   : > { %v5788_v43 = vpop.f32.mrf.mxu0  ;;  %v6093_v27 = vpop.f32.mrf.mxu1 }
 0x779   : > { %v5789_v12 = vadd.f32 %v5788_v43, %v5691_v31  ;;  %v5885_v53 = vadd.f32 %v9875_v18, %v5795_v11 }
 0x77a   : > { %v9870_v42 = vpop.f32.mrf.mxu0  ;;  %v9894_v36 = vpop.f32.mrf.mxu1 }
 0x77b   : > { %v5879_v46 = vadd.f32 %v5878_v56, %v5789_v12  ;;  %v5807_v40 = vadd.f32 %v9870_v42, %v5715_v20 }
 0x77c   : > { %v5800_v34 = vpop.f32.mrf.mxu0  ;;  %v6105_v58 = vpop.f32.mrf.mxu1 }
 0x77d   : > { %v5801_v55 = vadd.f32 %v5800_v34, %v5707_v0  ;;  %7112 = vxpose.xlu0.b32.start [1/4] (short) (narrow) %v5879_v46, 8  ;;  %v5897_v13 = vadd.f32 %v9878_v10, %v5807_v40 }
 0x77e   : > { %v9883_v21 = vpop.f32.mrf.mxu0  ;;  %v9907_v63 = vpop.f32.mrf.mxu1 }
 0x77f   : > { %v5891_v16 = vadd.f32 %v5890_v30, %v5801_v55  ;;  %v6100_v14 = vadd.f32 %v9891_v22, %v9883_v21 }
 0x780   : > { %v5987_v25 = vpop.f32.mrf.mxu0  ;;  %v6280_v45 = vpop.f32.mrf.mxu1 }
 0x781   : > { %7113 = vxpose.xlu0.b32.cont [2/4] (short) (narrow) %v5885_v53, 8  ;;  %v6094_v32 = vadd.f32 %v6093_v27, %v5987_v25 }
 0x782   : > { %v9886_v47 = vpop.f32.mrf.mxu0  ;;  %v9910_v6 = vpop.f32.mrf.mxu1 }
 0x783   : > { %v6112_v50 = vadd.f32 %v9894_v36, %v9886_v47 }
 0x784   : > { %v6007_v7 = vpop.f32.mrf.mxu0  ;;  %v6296_v52 = vpop.f32.mrf.mxu1 }
 0x785   : > { %7114 = vxpose.xlu0.b32.cont [3/4] (short) (narrow) %v5891_v16, 8  ;;  %v6106_v59 = vadd.f32 %v6105_v58, %v6007_v7 }
 0x786   : > { %v9899_v37 = vpop.f32.mrf.mxu0  ;;  %v9923_v61 = vpop.f32.mrf.mxu1 }
 0x787   : > { %v6193_v60 = vadd.f32 %v9899_v37, %v6100_v14 }
 0x788   : > { %v6185_v41 = vpop.f32.mrf.mxu0  ;;  %v6468_v33 = vpop.f32.mrf.mxu1 }
 0x789   : > { %v6186_v2 = vadd.f32 %v6185_v41, %v6094_v32  ;;  %7115 = vxpose.xlu0.b32.end [4/4] (short) (narrow) %v5897_v13, 8  ;;  %v6289_v15 = vadd.f32 %v9907_v63, %v6193_v60 }
 0x78a   : > { %v9902_v17 = vpop.f32.mrf.mxu0 }
 0x78b   : > { %v6281_v29 = vadd.f32 %v6280_v45, %v6186_v2  ;;  %v6207_v35 = vadd.f32 %v9902_v17, %v6112_v50 }
 0x78c   : > { %v6199_v39 = vpop.f32.mrf.mxu0  ;;  %v9926_v18 = vpop.f32.mrf.mxu1 }
 0x78d   : > { %v6200_v26 = vadd.f32 %v6199_v39, %v6106_v59  ;;  %v6305_v49 = vadd.f32 %v9910_v6, %v6207_v35 }
 0x78e   : > { %v9915_v62 = vpop.f32.mrf.mxu0  ;;  %v6480_v8 = vpop.f32.mrf.mxu1 }
 0x78f   : > { %v6297_v54 = vadd.f32 %v6296_v52, %v6200_v26  ;;  %v6385_v23 = vadd.f32 %v9915_v62, %v6289_v15  ;;  %v10558_v62 = vmov 1983009808  }
 0x790   : > { %v6378_v51 = vpop.f32.mrf.mxu0 }
 0x791   : > { %v6379_v44 = vadd.f32 %v6378_v51, %v6281_v29  ;;  %v6475_v3 = vadd.f32 %v9923_v61, %v6385_v23  ;;  %v7211_v51 = vunpack.c.l.s4 %v10558_v62 }
 0x792   : > { %v9918_v38 = vpop.f32.mrf.mxu0 }
 0x793   : > { %v6469_v24 = vadd.f32 %v6468_v33, %v6379_v44  ;;  %v6397_v10 = vadd.f32 %v9918_v38, %v6305_v49  ;;  %v7213_v33 = vlaneseq  ;;  %v7212_v44 = vunpack.c.0.s8 %v7211_v51 }
 0x794   : > { %v6390_v56 = vpop.f32.mrf.mxu0 }
 0x795   : > { %7144 = vxpose.xlu0.b32.start [1/4] (short) (narrow) %v6469_v24, 8  ;;  %v6391_v19 = vadd.f32 %v6390_v56, %v6297_v54  ;;  %v6487_v30 = vadd.f32 %v9926_v18, %v6397_v10  ;;  %v10559_v54 = vmov 1934713408   ;;  %v7214_v38 = vshrl.u32 %v7213_v33, 7 }
 0x796   : > { %v7243_v23 = vunpack.c.l.s4 %v10559_v54 }
 0x797   : > { %v6481_v48 = vadd.f32 %v6480_v8, %v6391_v19  ;;  %v7215_v56 = vsub.s32 %v7212_v44, %v7214_v38 }
 0x798   : > { %v7244_v24 = vunpack.c.0.s8 %v7243_v23 }
 0x799   : > { %7145 = vxpose.xlu0.b32.cont [2/4] (short) (narrow) %v6475_v3, 8 }
 0x79d   : > { %7146 = vxpose.xlu0.b32.cont [3/4] (short) (narrow) %v6481_v48, 8  ;;  %v7247_v48 = vsub.s32 %v7244_v24, %v7214_v38 }
 0x7a1   : > { %7147 = vxpose.xlu0.b32.end [4/4] (short) (narrow) %v6487_v30, 8 }
 0x7bf   : > { %v9939_v4 = vpop.f32.mrf.mxu1 }
 0x7c1   : > { %v6683_v1 = vpop.f32.mrf.mxu1 }
 0x7c7   : > { %v9942_v31 = vpop.f32.mrf.mxu1  ;;  %v9931_v57 = vpop.f32.mrf.mxu0 }
 0x7c8   : > { %v6690_v58 = vadd.f32 %v9939_v4, %v9931_v57 }
 0x7c9   : > { %v6695_v9 = vpop.f32.mrf.mxu1  ;;  %v6577_v43 = vpop.f32.mrf.mxu0 }
 0x7ca   : > { %v6684_v36 = vadd.f32 %v6683_v1, %v6577_v43 }
 0x7cb   : > { %v9955_v22 = vpop.f32.mrf.mxu1 }
 0x7cd   : > { %v6870_v27 = vpop.f32.mrf.mxu1 }
 0x7cf   : > { %v9934_v28 = vpop.f32.mrf.mxu0  ;;  %v9958_v11 = vpop.f32.mrf.mxu1 }
 0x7d0   : > { %v6702_v14 = vadd.f32 %v9942_v31, %v9934_v28 }
 0x7d1   : > { %v6597_v0 = vpop.f32.mrf.mxu0  ;;  %v6886_v46 = vpop.f32.mrf.mxu1 }
 0x7d2   : > { %v6696_v25 = vadd.f32 %v6695_v9, %v6597_v0 }
 0x7d3   : > { %v9947_v12 = vpop.f32.mrf.mxu0  ;;  %v9971_v21 = vpop.f32.mrf.mxu1 }
 0x7d4   : > { %v6783_v55 = vadd.f32 %v9947_v12, %v6690_v58 }
 0x7d5   : > { %v6775_v42 = vpop.f32.mrf.mxu0  ;;  %v7058_v6 = vpop.f32.mrf.mxu1 }
 0x7d6   : > { %v6776_v20 = vadd.f32 %v6775_v42, %v6684_v36  ;;  %v6879_v47 = vadd.f32 %v9955_v22, %v6783_v55 }
 0x7d7   : > { %v9950_v34 = vpop.f32.mrf.mxu0  ;;  %v9974_v60 = vpop.f32.mrf.mxu1 }
 0x7d8   : > { %v6871_v45 = vadd.f32 %v6870_v27, %v6776_v20  ;;  %v6797_v52 = vadd.f32 %v9950_v34, %v6702_v14 }
 0x7d9   : > { %v6789_v53 = vpop.f32.mrf.mxu0  ;;  %v7070_v61 = vpop.f32.mrf.mxu1 }
 0x7da   : > { %v6790_v16 = vadd.f32 %v6789_v53, %v6696_v25  ;;  %v6895_v39 = vadd.f32 %v9958_v11, %v6797_v52 }
 0x7db   : > { %v9963_v63 = vpop.f32.mrf.mxu0 }
 0x7dc   : > { %v6975_v32 = vadd.f32 %v9963_v63, %v6879_v47  ;;  %v6887_v59 = vadd.f32 %v6886_v46, %v6790_v16 }
 0x7dd   : > { %v6968_v40 = vpop.f32.mrf.mxu0 }
 0x7de   : > { %v6969_v7 = vadd.f32 %v6968_v40, %v6871_v45  ;;  %v7065_v2 = vadd.f32 %v9971_v21, %v6975_v32 }
 0x7df   : > { %v9966_v13 = vpop.f32.mrf.mxu0  ;;  %v7096_v18 = vpop.trf.xlu1 }
 0x7e0   : > { %v7059_v37 = vadd.f32 %v7058_v6, %v6969_v7  ;;  %v6987_v50 = vadd.f32 %v9966_v13, %v6895_v39  ;;  %v7397_v39 = vld [vmem:[#allocation11 + $0x68] sm:$0xff] }
 0x7e1   : > { %v6980_v41 = vpop.f32.mrf.mxu0 }
 0x7e2   : > { %7176 = vxpose.xlu0.b32.start [1/4] (short) (narrow) %v7059_v37, 8  ;;  %v6981_v17 = vadd.f32 %v6980_v41, %v6887_v59  ;;  %v7077_v29 = vadd.f32 %v9974_v60, %v6987_v50 }
 0x7e4   : > { %v7071_v15 = vadd.f32 %v7070_v61, %v6981_v17  ;;  %v7398_v17 = vld [vmem:[#allocation11 + $0x70] sm:$0xff] }
 0x7e5   : > { %v12547_v50 = vand.u32 4294901760, %v7398_v17 }
 0x7e6   : > { %7177 = vxpose.xlu0.b32.cont [2/4] (short) (narrow) %v7065_v2, 8  ;;  %v7399_v2 = vld [vmem:[#allocation11 + $0x78] sm:$0xff] }
 0x7e7   : > { %v12545_v61 = vand.u32 4294901760, %v7399_v2 }
 0x7e9   : > { %9976 = vmatpush3.msra.mxu0 %v12545_v61 }
 0x7ea   : > { %7178 = vxpose.xlu0.b32.cont [3/4] (short) (narrow) %v7071_v15, 8  ;;  %v12549_v15 = vand.u32 4294901760, %v7397_v39  ;;  %9977 = vmatprep.subr.mxu0 %v10553_v5 }
 0x7eb   : > { %9978 = vmatpush3.msra.mxu0 %v12547_v50 }
 0x7ec   : > { %v12558_v62 = vsub.f32 %v7397_v39, %v12549_v15  ;;  %9979 = vmatprep.subr.mxu0 %v10553_v5 }
 0x7ed   : > { %9980 = vmatpush3.msra.mxu0 %v12549_v15 }
 0x7ee   : > { %7179 = vxpose.xlu0.b32.end [4/4] (short) (narrow) %v7077_v29, 8  ;;  %v12552_v29 = vsub.f32 %v7399_v2, %v12545_v61  ;;  %9981 = vmatprep.subr.mxu0 %v10553_v5 }
 0x7f0   : > { %v7499_v51 = vand.u32 4294901760, %v12552_v29 }
 0x7f2   : > { %v7500_v54 = vsub.f32 %v12552_v29, %v7499_v51 }
 0x7f4   : > { %v7501_v38 = vand.u32 4294901760, %v7500_v54  ;;  %v7387_v54 = vld [vmem:[#allocation11 + $0x18] sm:$0xff] }
 0x7f6   : > { %10011 = vmatpush3.msra.mxu1 %v7501_v38 }
 0x7f7   : > { %10012 = vmatprep.subr.mxu1 %v10553_v5 }
 0x7f9   : > { %v7128_v26 = vpop.trf.xlu0 }
 0x811   : > { %v7160_v35 = vpop.trf.xlu0 }
 0x812   : > { %v7208_v49 = vcombine.low %v7096_v18, %v7160_v35  ;;  %v7209_v3 = vcombine.high %v7096_v18, %v7160_v35  ;;  %v7513_v35 = vand.u32 4294901760, %v12558_v62 }
 0x814   : > { %v7216_v30 = vrot.slane %v7208_v49, %v7215_v56  ;;  %v7223_v4 = vrot.slane %v7209_v3, %v7215_v56  ;;  %v7514_v44 = vsub.f32 %v12558_v62, %v7513_v35 }
 0x816   : > { %v7515_v24 = vand.u32 4294901760, %v7514_v44 }
 0x85e   : > { %v7192_v19 = vpop.trf.xlu0 }
 0x85f   : > { %v7224_v8 = vcombine.low %v7128_v26, %v7192_v19  ;;  %v7225_v10 = vcombine.high %v7128_v26, %v7192_v19  ;;  %v12555_v26 = vsub.f32 %v7398_v17, %v12547_v50 }
 0x861   : > { %v7232_v1 = vrot.slane %v7224_v8, %v7215_v56  ;;  %v7239_v31 = vrot.slane %v7225_v10, %v7215_v56  ;;  %v7506_v33 = vand.u32 4294901760, %v12555_v26  ;;  %v7396_v8 = vld [vmem:[#allocation11 + $0x60] sm:$0xff] }
 0x862   : > { %v12585_v10 = vand.u32 4294901760, %v7396_v8 }
 0x863   : > { %v7240_v57 = vcombine.low %v7216_v30, %v7232_v1  ;;  %v7241_v9 = vcombine.high %v7216_v30, %v7232_v1  ;;  %v7256_v22 = vcombine.low %v7223_v4, %v7239_v31  ;;  %v7257_v43 = vcombine.high %v7223_v4, %v7239_v31  ;;  %v7394_v1 = vld [vmem:[#allocation11 + $0x50] sm:$0xff] }
 0x864   : > { %v7507_v23 = vsub.f32 %v12555_v26, %v7506_v33  ;;  %v12588_v30 = vsub.f32 %v7396_v8, %v12585_v10  ;;  %9982 = vmatpush3.msra.mxu0 %v12585_v10 }
 0x865   : > { %v7248_v27 = vrot.slane %v7240_v57, %v7247_v48  ;;  %v7255_v28 = vrot.slane %v7241_v9, %v7247_v48  ;;  %v7264_v0 = vrot.slane %v7256_v22, %v7247_v48  ;;  %v7271_v11 = vrot.slane %v7257_v43, %v7247_v48  ;;  %9983 = vmatprep.subr.mxu0 %v10553_v5  ;;  %v7393_v22 = vld [vmem:[#allocation11 + $0x48] sm:$0xff] }
 0x866   : > { %v7508_v18 = vand.u32 4294901760, %v7507_v23  ;;  %v7520_v31 = vand.u32 4294901760, %v12588_v30  ;;  %v12598_v9 = vand.u32 4294901760, %v7394_v1 }
 0x867   : > { %v7276_v12 = vcombine.low %v7248_v27, %v7255_v28  ;;  %v8232_v42 = vcombine.high %v7248_v27, %v7255_v28  ;;  %v7292_v36 = vcombine.low %v7264_v0, %v7271_v11  ;;  %v8233_v46 = vcombine.high %v7264_v0, %v7271_v11  ;;  %v7392_v11 = vld [vmem:[#allocation11 + $0x40] sm:$0xff] }
 0x868   : > { %10013 = vmatpush3.msra.mxu1 %v7508_v18  ;;  %v7521_v43 = vsub.f32 %v12588_v30, %v7520_v31  ;;  %v12607_v28 = vsub.f32 %v7394_v1, %v12598_v9  ;;  %v12609_v0 = vand.u32 4294901760, %v7393_v22 }
 0x869   : > { %v7283_v34 = vrot.slane %v7276_v12, %v7215_v56  ;;  %v7291_v58 = vrot.slane %v8232_v42, %v7215_v56  ;;  %v7299_v20 = vrot.slane %v7292_v36, %v7215_v56  ;;  %v7307_v53 = vrot.slane %v8233_v46, %v7215_v56  ;;  %10014 = vmatprep.subr.mxu1 %v10553_v5 }
 0x86a   : > { %10015 = vmatpush3.msra.mxu1 %v7515_v24  ;;  %v7522_v12 = vand.u32 4294901760, %v7521_v43  ;;  %v7534_v36 = vand.u32 4294901760, %v12607_v28  ;;  %v12618_v46 = vsub.f32 %v7393_v22, %v12609_v0  ;;  %v12679_v24 = vand.u32 4294901760, %v7387_v54  ;;  %v7385_v22 = vld [vmem:[#allocation11 + $0x8] sm:$0xff] }
 0x86b   : > { %v7309_v55 = vcombine.high %v7283_v34, %v7291_v58  ;;  %v7325_v21 = vcombine.high %v7299_v20, %v7307_v53  ;;  %v7308_v63 = vcombine.low %v7283_v34, %v7291_v58  ;;  %v7324_v25 = vcombine.low %v7299_v20, %v7307_v53  ;;  %10016 = vmatprep.subr.mxu1 %v10553_v5  ;;  %v7391_v58 = vld [vmem:[#allocation11 + $0x38] sm:$0xff] }
 0x86c   : > { %v12621_v34 = vand.u32 4294901760, %v7392_v11  ;;  %10017 = vmatpush3.msra.mxu1 %v7522_v12  ;;  %v7535_v53 = vsub.f32 %v12607_v28, %v7534_v36  ;;  %v12691_v1 = vsub.f32 %v7387_v54, %v12679_v24 }
 0x86d   : > { %v7323_v45 = vrot.slane %v7309_v55, %v7247_v48  ;;  %v7339_v40 = vrot.slane %v7325_v21, %v7247_v48  ;;  %v7316_v16 = vrot.slane %v7308_v63, %v7247_v48  ;;  %v7332_v47 = vrot.slane %v7324_v25, %v7247_v48  ;;  %v7395_v48 = vld [vmem:[#allocation11 + $0x58] sm:$0xff]  ;;  %10018 = vmatprep.subr.mxu1 %v10553_v5  ;;  %v7390_v25 = vld [vmem:[#allocation11 + $0x30] sm:$0xff] }
 0x86e   : > { %v12590_v4 = vand.u32 4294901760, %v7395_v48  ;;  %v7541_v55 = vand.u32 4294901760, %v12618_v46  ;;  %v12628_v21 = vand.u32 4294901760, %v7391_v58  ;;  %v12632_v63 = vsub.f32 %v7392_v11, %v12621_v34 }
 0x86f   : > { %v7342_v7 = vcombine.low %v7323_v45, %v7339_v40  ;;  %v7341_v6 = vcombine.high %v7316_v16, %v7332_v47  ;;  %v7340_v13 = vcombine.low %v7316_v16, %v7332_v47  ;;  %v7343_v14 = vcombine.high %v7323_v45, %v7339_v40 }
 0x870   : > { %v12596_v57 = vsub.f32 %v7395_v48, %v12590_v4  ;;  %9984 = vmatpush3.msra.mxu0 %v12590_v4  ;;  %v7536_v45 = vand.u32 4294901760, %v7535_v53  ;;  %v7542_v40 = vsub.f32 %v12618_v46, %v7541_v55  ;;  %v12639_v16 = vsub.f32 %v7391_v58, %v12628_v21 }
 0x871   : > { %7349 = vrot.lane.b32.xlu0 %v7342_v7, %s10556_s1  ;;  %7345 = vrot.lane.b32.xlu1 %v7341_v6, %s10557_s15  ;;  %v12641_v47 = vand.u32 4294901760, %v7390_v25  ;;  %v7548_v7 = vand.u32 4294901760, %v12632_v63  ;;  %v7389_v6 = vld [vmem:[#allocation11 + $0x28] sm:$0xff]  ;;  %v7583_v58 = vand.u32 4294901760, %v12691_v1 }
 0x872   : > { %9985 = vmatprep.subr.mxu0 %v10553_v5  ;;  %v7527_v27 = vand.u32 4294901760, %v12596_v57 }
 0x873   : > { %9986 = vmatpush3.msra.mxu0 %v12598_v9 }
 0x874   : > { %9987 = vmatprep.subr.mxu0 %v10553_v5  ;;  %v7528_v42 = vsub.f32 %v12596_v57, %v7527_v27 }
 0x875   : > { %7353 = vrot.lane.b32.xlu1 %v7343_v14, %s10555_s27  ;;  %9988 = vmatpush3.msra.mxu0 %v12609_v0  ;;  %v7555_v14 = vand.u32 4294901760, %v12639_v16 }
 0x876   : > { %9989 = vmatprep.subr.mxu0 %v10553_v5  ;;  %v7529_v20 = vand.u32 4294901760, %v7528_v42  ;;  %v12701_v42 = vand.u32 4294901760, %v7385_v22 }
 0x877   : > { %9990 = vmatpush3.msra.mxu0 %v12621_v34 }
 0x878   : > { %10019 = vmatpush3.msra.mxu1 %v7529_v20  ;;  %9991 = vmatprep.subr.mxu0 %v10553_v5  ;;  %v7384_v20 = vld [vmem:[#allocation11] sm:$0xff] }
 0x879   : > { %10020 = vmatprep.subr.mxu1 %v10553_v5  ;;  %9992 = vmatpush3.msra.mxu0 %v12628_v21 }
 0x87a   : > { %10021 = vmatpush3.msra.mxu1 %v7536_v45  ;;  %9993 = vmatprep.subr.mxu0 %v10553_v5  ;;  %v12709_v45 = vsub.f32 %v7385_v22, %v12701_v42 }
 0x87b   : > { %10022 = vmatprep.subr.mxu1 %v10553_v5  ;;  %9994 = vmatpush3.msra.mxu0 %v12641_v47 }
 0x87c   : > { %9995 = vmatprep.subr.mxu0 %v10553_v5 }
 0x8e3   : > { %v7346_v32 = vpop.permute.xlu1 %7345  ;;  %v7350_v37 = vpop.permute.xlu0 %7349 }
 0x8e4   : > { %v7356_v41 = vsel %vm2598_vm1, %v7340_v13, %v7346_v32  ;;  %v7543_v13 = vand.u32 4294901760, %v7542_v40  ;;  %v12649_v32 = vsub.f32 %v7390_v25, %v12641_v47  ;;  %v12711_v40 = vand.u32 4294901760, %v7384_v20 }
 0x8e5   : > { %v7358_v59 = vsel %vm7357_vm3, %v7356_v41, %v7350_v37  ;;  %v12651_v37 = vand.u32 4294901760, %v7389_v6  ;;  %v7549_v41 = vsub.f32 %v12632_v63, %v7548_v7 }
 0x8e6   : > { %10023 = vmatpush3.msra.mxu1 %v7543_v13 }
 0x8e7   : > { %v7354_v52 = vpop.permute.xlu1 %7353  ;;  %v12664_v2 = vsub.f32 %v7389_v6, %v12651_v37  ;;  %10024 = vmatprep.subr.mxu1 %v10553_v5  ;;  %v7550_v39 = vand.u32 4294901760, %v7549_v41  ;;  %9996 = vmatpush3.msra.mxu0 %v12651_v37  ;;  %v7584_v6 = vsub.f32 %v12691_v1, %v7583_v58  ;;  %v7597_v41 = vand.u32 4294901760, %v12709_v45 }
 0x8e8   : > { %v7360_v60 = vsel %vm7359_vm4, %v7358_v59, %v7354_v52  ;;  %v7388_v52 = vld [vmem:[#allocation11 + $0x20] sm:$0xff]  ;;  %v7556_v59 = vsub.f32 %v12639_v16, %v7555_v14  ;;  %9997 = vmatprep.subr.mxu0 %v10553_v5 }
 0x8e9   : > { %7363 = vadd.xlane.f32.xlu1 %v7360_v60  ;;  %v12666_v17 = vand.u32 4294901760, %v7388_v52  ;;  %v7569_v38 = vand.u32 4294901760, %v12664_v2  ;;  %10025 = vmatpush3.msra.mxu1 %v7550_v39  ;;  %v7598_v54 = vsub.f32 %v12709_v45, %v7597_v41 }
 0x8ea   : > { %v7557_v23 = vand.u32 4294901760, %v7556_v59  ;;  %10026 = vmatprep.subr.mxu1 %v10553_v5  ;;  %v7585_v59 = vand.u32 4294901760, %v7584_v6  ;;  %v8235_v6 = vld [vmem:[#allocation8 + $0x7] ss:$0 sm:$0xff] }
 0x8eb   : > { %v12676_v18 = vsub.f32 %v7388_v52, %v12666_v17  ;;  %9998 = vmatpush3.msra.mxu0 %v12666_v17  ;;  %v12724_v52 = vsub.f32 %v7384_v20, %v12711_v40  ;;  %v8234_v20 = vld [vmem:[#allocation8 + $0x6] ss:$0 sm:$0xff] }
 0x8ec   : > { %9999 = vmatprep.subr.mxu0 %v10553_v5  ;;  %10027 = vmatpush3.msra.mxu1 %v7557_v23 }
 0x8ed   : > { %v7576_v8 = vand.u32 4294901760, %v12676_v18  ;;  %10000 = vmatpush3.msra.mxu0 %v12679_v24  ;;  %10028 = vmatprep.subr.mxu1 %v10553_v5  ;;  %v7604_v23 = vand.u32 4294901760, %v12724_v52 }
 0x8ee   : > { %10001 = vmatprep.subr.mxu0 %v10553_v5 }
 0x8ef   : > { %v7577_v11 = vsub.f32 %v12676_v18, %v7576_v8 }
 0x8f1   : > { %v7578_v53 = vand.u32 4294901760, %v7577_v11 }
 0x972   : > { %v7364_v56 = vpop.xlane.xlu1 %7363 }
 0x973   : > { %v7365_v49 = vmul.f32 0.0078125, %v7364_v56  ;;  %v7386_v56 = vld [vmem:[#allocation11 + $0x10] sm:$0xff] }
 0x974   : > { %v12687_v48 = vand.u32 4294901760, %v7386_v56 }
 0x975   : > { %v12581_v3 = vsub.f32 %v7360_v60, %v7365_v49  ;;  %v7562_v60 = vand.u32 4294901760, %v12649_v32 }
 0x976   : > { %v12699_v12 = vsub.f32 %v7386_v56, %v12687_v48  ;;  %10002 = vmatpush3.msra.mxu0 %v12687_v48  ;;  %v7605_v56 = vsub.f32 %v12724_v52, %v7604_v23 }
 0x977   : > { %v7367_v19 = vmul.f32 %v12581_v3, %v12581_v3  ;;  %v7563_v44 = vsub.f32 %v12649_v32, %v7562_v60  ;;  %10003 = vmatprep.subr.mxu0 %v10553_v5 }
 0x978   : > { %v7590_v25 = vand.u32 4294901760, %v12699_v12  ;;  %10004 = vmatpush3.msra.mxu0 %v12701_v42 }
 0x979   : > { %7368 = vadd.xlane.f32.xlu0 %v7367_v19  ;;  %v7564_v49 = vand.u32 4294901760, %v7563_v44  ;;  %v7570_v19 = vsub.f32 %v12664_v2, %v7569_v38  ;;  %10005 = vmatprep.subr.mxu0 %v10553_v5  ;;  %v7599_v44 = vand.u32 4294901760, %v7598_v54 }
 0x97a   : > { %v7591_v13 = vsub.f32 %v12699_v12, %v7590_v25  ;;  %10006 = vmatpush3.msra.mxu0 %v12711_v40 }
 0x97b   : > { %v7571_v43 = vand.u32 4294901760, %v7570_v19  ;;  %10029 = vmatpush3.msra.mxu1 %v7564_v49  ;;  %10045 = vmatprep.subr.mxu0 %v10553_v5  ;;  %v7606_v49 = vand.u32 4294901760, %v7605_v56 }
 0x97c   : > { %10030 = vmatprep.subr.mxu1 %v10553_v5  ;;  %v7592_v39 = vand.u32 4294901760, %v7591_v13 }
 0x97d   : > { %10031 = vmatpush3.msra.mxu1 %v7571_v43 }
 0x97e   : > { %10032 = vmatprep.subr.mxu1 %v10553_v5 }
 0x97f   : > { %10033 = vmatpush3.msra.mxu1 %v7578_v53 }
 0x980   : > { %10034 = vmatprep.subr.mxu1 %v10553_v5 }
 0x981   : > { %10035 = vmatpush3.msra.mxu1 %v7585_v59 }
 0x982   : > { %10036 = vmatprep.subr.mxu1 %v10553_v5 }
 0x983   : > { %10037 = vmatpush3.msra.mxu1 %v7592_v39 }
 0x984   : > { %10038 = vmatprep.subr.mxu1 %v10553_v5 }
 0x985   : > { %10039 = vmatpush3.msra.mxu1 %v7599_v44 }
 0x986   : > { %10040 = vmatprep.subr.mxu1 %v10553_v5 }
 0x987   : > { %10041 = vmatpush3.msra.mxu1 %v7606_v49 }
 0x988   : > { %10080 = vmatprep.subr.mxu1 %v10553_v5 }
 0xa02   : > { %v7369_v19 = vpop.xlane.xlu0 %7368 }
 0xa03   : > { %v7370_v22 = vmul.f32 0.0078125, %v7369_v19 }
 0xa05   : > { %v7371_v43 = vadd.f32 1e-05, %v7370_v22 }
 0xa07   : > { %10303 = vrsqrt.f32 %v7371_v43 }
 0xa14   : > { %v10304_v11 = vpop.eup %10303 }
 0xa15   : > { %v7373_v53 = vmul.f32 %v10304_v11, %v12581_v3 }
 0xa17   : > { %v7378_v13 = vmul.f32 %v8234_v20, %v7373_v53 }
 0xa19   : > { %v7383_v59 = vadd.f32 %v8235_v6, %v7378_v13 }
 0xa1b   : > { %v12742_v39 = vand.u32 4294901760, %v7383_v59 }
 0xa1d   : > { %v12745_v54 = vsub.f32 %v7383_v59, %v12742_v39  ;;  %10043 = vmatmul.mubr.f32.vlgmr.msra.gmra.mxu1 %v12742_v39 }
 0xa1e   : > { %10081 = vmatpush3.msra.mxu1 %v12545_v61  ;;  %10112 = vmatprep.mubr.msk.f32.mxu1 %vm10554_vm0, %v10553_v5 }
 0xa1f   : > { %10082 = vmatprep.subr.mxu1 %v10553_v5  ;;  %v7488_v44 = vand.u32 4294901760, %v12745_v54 }
 0xa20   : > { %10083 = vmatpush3.msra.mxu1 %v12547_v50 }
 0xa21   : > { %10084 = vmatprep.subr.mxu1 %v10553_v5  ;;  %v7489_v3 = vsub.f32 %v12745_v54, %v7488_v44 }
 0xa22   : > { %10085 = vmatpush3.msra.mxu1 %v12549_v15 }
 0xa23   : > { %10086 = vmatprep.subr.mxu1 %v10553_v5  ;;  %v7490_v56 = vand.u32 4294901760, %v7489_v3 }
 0xa24   : > { %10087 = vmatpush3.msra.mxu1 %v12585_v10 }
 0xa25   : > { %10088 = vmatprep.subr.mxu1 %v10553_v5  ;;  %10008 = vmatmul.mubr.f32.vlgmr.msra.gmra.mxu0 %v7490_v56 }
 0xa26   : > { %10046 = vmatpush3.msra.mxu0 %v12552_v29  ;;  %10089 = vmatpush3.msra.mxu1 %v12590_v4 }
 0xa27   : > { %10047 = vmatprep.subr.mxu0 %v10553_v5  ;;  %10090 = vmatprep.subr.mxu1 %v10553_v5 }
 0xa28   : > { %10048 = vmatpush3.msra.mxu0 %v12555_v26  ;;  %10091 = vmatpush3.msra.mxu1 %v12598_v9 }
 0xa29   : > { %10049 = vmatprep.subr.mxu0 %v10553_v5  ;;  %10092 = vmatprep.subr.mxu1 %v10553_v5 }
 0xa2a   : > { %10050 = vmatpush3.msra.mxu0 %v12558_v62  ;;  %10093 = vmatpush3.msra.mxu1 %v12609_v0 }
 0xa2b   : > { %10051 = vmatprep.subr.mxu0 %v10553_v5  ;;  %10094 = vmatprep.subr.mxu1 %v10553_v5 }
 0xa2c   : > { %10052 = vmatpush3.msra.mxu0 %v12588_v30  ;;  %10095 = vmatpush3.msra.mxu1 %v12621_v34 }
 0xa2d   : > { %10053 = vmatprep.subr.mxu0 %v10553_v5  ;;  %10096 = vmatprep.subr.mxu1 %v10553_v5 }
 0xa2e   : > { %10054 = vmatpush3.msra.mxu0 %v12596_v57  ;;  %10097 = vmatpush3.msra.mxu1 %v12628_v21 }
 0xa2f   : > { %10055 = vmatprep.subr.mxu0 %v10553_v5  ;;  %10098 = vmatprep.subr.mxu1 %v10553_v5 }
 0xa30   : > { %10056 = vmatpush3.msra.mxu0 %v12607_v28  ;;  %10099 = vmatpush3.msra.mxu1 %v12641_v47 }
 0xa31   : > { %10057 = vmatprep.subr.mxu0 %v10553_v5  ;;  %10100 = vmatprep.subr.mxu1 %v10553_v5 }
 0xa32   : > { %10058 = vmatpush3.msra.mxu0 %v12618_v46  ;;  %10101 = vmatpush3.msra.mxu1 %v12651_v37 }
 0xa33   : > { %10059 = vmatprep.subr.mxu0 %v10553_v5  ;;  %10102 = vmatprep.subr.mxu1 %v10553_v5 }
 0xa34   : > { %10060 = vmatpush3.msra.mxu0 %v12632_v63  ;;  %10103 = vmatpush3.msra.mxu1 %v12666_v17 }
 0xa35   : > { %10061 = vmatprep.subr.mxu0 %v10553_v5  ;;  %10104 = vmatprep.subr.mxu1 %v10553_v5 }
 0xa36   : > { %10062 = vmatpush3.msra.mxu0 %v12639_v16  ;;  %10105 = vmatpush3.msra.mxu1 %v12679_v24 }
 0xa37   : > { %10063 = vmatprep.subr.mxu0 %v10553_v5  ;;  %10106 = vmatprep.subr.mxu1 %v10553_v5 }
 0xa38   : > { %10064 = vmatpush3.msra.mxu0 %v12649_v32  ;;  %10107 = vmatpush3.msra.mxu1 %v12687_v48 }
 0xa39   : > { %10065 = vmatprep.subr.mxu0 %v10553_v5  ;;  %10108 = vmatprep.subr.mxu1 %v10553_v5 }
 0xa3a   : > { %10066 = vmatpush3.msra.mxu0 %v12664_v2  ;;  %10109 = vmatpush3.msra.mxu1 %v12701_v42 }
 0xa3b   : > { %10067 = vmatprep.subr.mxu0 %v10553_v5  ;;  %10110 = vmatprep.subr.mxu1 %v10553_v5 }
 0xa3c   : > { %10068 = vmatpush3.msra.mxu0 %v12676_v18  ;;  %10111 = vmatpush3.msra.mxu1 %v12711_v40 }
 0xa3d   : > { %10069 = vmatprep.subr.mxu0 %v10553_v5  ;;  %10113 = vmatmul.mubr.f32.vlgmr.msra.gmra.mxu1 %v7488_v44 }
 0xa3e   : > { %10150 = vmatprep.subr.mxu1 %v10553_v5  ;;  %10070 = vmatpush3.msra.mxu0 %v12691_v1 }
 0xa3f   : > { %10151 = vmatpush3.msra.mxu1 %v12545_v61  ;;  %10071 = vmatprep.subr.mxu0 %v10553_v5 }
 0xa40   : > { %10152 = vmatprep.subr.mxu1 %v10553_v5  ;;  %10072 = vmatpush3.msra.mxu0 %v12699_v12 }
 0xa41   : > { %10153 = vmatpush3.msra.mxu1 %v12547_v50  ;;  %10073 = vmatprep.subr.mxu0 %v10553_v5 }
 0xa42   : > { %10154 = vmatprep.subr.mxu1 %v10553_v5  ;;  %10074 = vmatpush3.msra.mxu0 %v12709_v45 }
 0xa43   : > { %10155 = vmatpush3.msra.mxu1 %v12549_v15  ;;  %10075 = vmatprep.subr.mxu0 %v10553_v5 }
 0xa44   : > { %10156 = vmatprep.subr.mxu1 %v10553_v5  ;;  %10076 = vmatpush3.msra.mxu0 %v12724_v52 }
 0xa45   : > { %10077 = vmatprep.mubr.msk.f32.mxu0 %vm10554_vm0, %v10553_v5  ;;  %10157 = vmatpush3.msra.mxu1 %v12585_v10 }
 0xa46   : > { %10078 = vmatmul.mubr.f32.vlgmr.msra.gmra.mxu0 %v12745_v54  ;;  %10115 = vmatprep.subr.mxu0 %v10553_v5 }
 0xa47   : > { %10158 = vmatprep.subr.mxu1 %v10553_v5  ;;  %10116 = vmatpush3.msra.mxu0 %v7499_v51 }
 0xa48   : > { %10159 = vmatpush3.msra.mxu1 %v12590_v4  ;;  %10117 = vmatprep.subr.mxu0 %v10553_v5 }
 0xa49   : > { %10160 = vmatprep.subr.mxu1 %v10553_v5  ;;  %10118 = vmatpush3.msra.mxu0 %v7506_v33 }
 0xa4a   : > { %10161 = vmatpush3.msra.mxu1 %v12598_v9  ;;  %10119 = vmatprep.subr.mxu0 %v10553_v5 }
 0xa4b   : > { %10162 = vmatprep.subr.mxu1 %v10553_v5  ;;  %10120 = vmatpush3.msra.mxu0 %v7513_v35  ;;  %v8236_v35 = vld [vmem:[#allocation8 + $0xb] ss:$0 sm:$0xff] }
 0xa4c   : > { %10163 = vmatpush3.msra.mxu1 %v12609_v0  ;;  %10121 = vmatprep.subr.mxu0 %v10553_v5 }
 0xa4d   : > { %10164 = vmatprep.subr.mxu1 %v10553_v5  ;;  %10122 = vmatpush3.msra.mxu0 %v7520_v31 }
 0xa4e   : > { %10165 = vmatpush3.msra.mxu1 %v12621_v34  ;;  %10123 = vmatprep.subr.mxu0 %v10553_v5 }
 0xa4f   : > { %10166 = vmatprep.subr.mxu1 %v10553_v5  ;;  %10124 = vmatpush3.msra.mxu0 %v7527_v27 }
 0xa50   : > { %10167 = vmatpush3.msra.mxu1 %v12628_v21  ;;  %10125 = vmatprep.subr.mxu0 %v10553_v5 }
 0xa51   : > { %10168 = vmatprep.subr.mxu1 %v10553_v5  ;;  %10126 = vmatpush3.msra.mxu0 %v7534_v36 }
 0xa52   : > { %10169 = vmatpush3.msra.mxu1 %v12641_v47  ;;  %10127 = vmatprep.subr.mxu0 %v10553_v5 }
 0xa53   : > { %10170 = vmatprep.subr.mxu1 %v10553_v5  ;;  %10128 = vmatpush3.msra.mxu0 %v7541_v55 }
 0xa54   : > { %10171 = vmatpush3.msra.mxu1 %v12651_v37  ;;  %10129 = vmatprep.subr.mxu0 %v10553_v5 }
 0xa55   : > { %10172 = vmatprep.subr.mxu1 %v10553_v5  ;;  %10130 = vmatpush3.msra.mxu0 %v7548_v7 }
 0xa56   : > { %10173 = vmatpush3.msra.mxu1 %v12666_v17  ;;  %10131 = vmatprep.subr.mxu0 %v10553_v5 }
 0xa57   : > { %10174 = vmatprep.subr.mxu1 %v10553_v5  ;;  %10132 = vmatpush3.msra.mxu0 %v7555_v14 }
 0xa58   : > { %10175 = vmatpush3.msra.mxu1 %v12679_v24  ;;  %10133 = vmatprep.subr.mxu0 %v10553_v5 }
 0xa59   : > { %10176 = vmatprep.subr.mxu1 %v10553_v5  ;;  %10134 = vmatpush3.msra.mxu0 %v7562_v60 }
 0xa5a   : > { %10177 = vmatpush3.msra.mxu1 %v12687_v48  ;;  %10135 = vmatprep.subr.mxu0 %v10553_v5 }
 0xa5b   : > { %10178 = vmatprep.subr.mxu1 %v10553_v5  ;;  %10136 = vmatpush3.msra.mxu0 %v7569_v38 }
 0xa5c   : > { %10179 = vmatpush3.msra.mxu1 %v12701_v42  ;;  %10137 = vmatprep.subr.mxu0 %v10553_v5 }
 0xa5d   : > { %10180 = vmatprep.subr.mxu1 %v10553_v5  ;;  %10138 = vmatpush3.msra.mxu0 %v7576_v8 }
 0xa5e   : > { %10181 = vmatpush3.msra.mxu1 %v12711_v40  ;;  %10182 = vmatprep.mubr.msk.f32.mxu1 %vm10554_vm0, %v10553_v5 }
 0xa5f   : > { %10139 = vmatprep.subr.mxu0 %v10553_v5  ;;  %10183 = vmatmul.mubr.f32.vlgmr.msra.gmra.mxu1 %v12742_v39 }
 0xa60   : > { %10140 = vmatpush3.msra.mxu0 %v7583_v58  ;;  %10147 = vmatprep.mubr.msk.f32.mxu0 %vm10554_vm0, %v10553_v5 }
 0xa61   : > { %10141 = vmatprep.subr.mxu0 %v10553_v5 }
 0xa62   : > { %10142 = vmatpush3.msra.mxu0 %v7590_v25 }
 0xa63   : > { %10143 = vmatprep.subr.mxu0 %v10553_v5 }
 0xa64   : > { %10144 = vmatpush3.msra.mxu0 %v7597_v41 }
 0xa65   : > { %10145 = vmatprep.subr.mxu0 %v10553_v5 }
 0xa66   : > { %10146 = vmatpush3.msra.mxu0 %v7604_v23 }
 0xa67   : > { %10148 = vmatmul.mubr.f32.vlgmr.msra.gmra.mxu0 %v12742_v39 }
 0xadd   : > { %v7643_v61 = vpop.f32.mrf.mxu1 }
 0xadf   : > { %v10044_v50 = vpop.f32.mrf.mxu1 }
 0xae5   : > { %v7492_v15 = vpop.f32.mrf.mxu0 }
 0xae6   : > { %v7493_v10 = vadd.f32 %v8236_v35, %v7492_v15 }
 0xae7   : > { %v10009_v29 = vpop.f32.mrf.mxu0 }
 0xae8   : > { %v7644_v5 = vadd.f32 %v7643_v61, %v7493_v10 }
 0xafd   : > { %v7836_v26 = vpop.f32.mrf.mxu1 }
 0xaff   : > { %v10114_v62 = vpop.f32.mrf.mxu1 }
 0xb06   : > { %v7747_v51 = vpop.f32.mrf.mxu0 }
 0xb07   : > { %v7748_v31 = vadd.f32 %v7747_v51, %v7644_v5 }
 0xb08   : > { %v10079_v33 = vpop.f32.mrf.mxu0 }
 0xb09   : > { %v7837_v57 = vadd.f32 %v7836_v26, %v7748_v31 }
 0xb1f   : > { %v8042_v30 = vpop.f32.mrf.mxu1 }
 0xb21   : > { %v10184_v4 = vpop.f32.mrf.mxu1 }
 0xb27   : > { %v7955_v9 = vpop.f32.mrf.mxu0 }
 0xb28   : > { %v7956_v27 = vadd.f32 %v7955_v9, %v7837_v57 }
 0xb29   : > { %v10149_v28 = vpop.f32.mrf.mxu0 }
 0xb2a   : > { %v8043_v0 = vadd.f32 %v8042_v30, %v7956_v27 }
 0xb2c   : > { %8046 = vst [vmem:[%s381_s24] sm:$0xff] %v8043_v0 }
 0xb2d   : > { %10480 = shalt.err (!%p10477_p11)
}
 0xb2e   : > { %s10481_s8 = scalar_lea.hbm %s8059_s20, 128  ;;  %s10485_s12 = scalar_lea.hbm %s12945_s6, 256 }
 0xb2f   : > { %p10482_p5 = scmp.ne.s32.totalorder %s8059_s20, %s10481_s8  ;;  %p10486_p2 = scmp.lt.s32.totalorder %s8059_s20, %s12945_s6 }
 0xb30   : > { %p10487_p13 = scmp.lt.s32.totalorder %s10485_s12, %s10481_s8 }
 0xb31   : > { %p10483_p10 = pnand %p10482_p5, %p12999_p7 }
 0xb32   : > { %p10488_p1 = por %p10487_p13, %p10486_p2 }
 0xb33   : > { %p10484_p9 = pneg %p10483_p10 }
 0xb35   : > { %p10489_p12 = pnand %p10488_p1, %p10484_p9 }
 0xb37   : > { %10492 = shalt.err (!%p10489_p12)
}
 0xb38   : > { %10203 = dma.vmem_to_hbm [thread:$0]  (%p12999_p7), %s8062_s28, 128, %s8059_s20, %s8048_s26  }
 0xb39 PF: > { %s13000_s30 = sld [smem:[#allocation20_spill]]  ;;  %s8073_s27 = sand.u32 1, %s10531_s21  }
 0xb3a   : > { %s13001_s16 = sld [smem:[#allocation19_spill]]  ;;  %s8074_s1 = scalar_lea.sflag [#allocation4], %s8073_s27 }
 0xb3f   : > { %p13002_p0 = scmp.ne.s32.totalorder %s13000_s30, 0 }
 0xb40   : > { %p13003_p3 = scmp.ge.s32.totalorder %s13001_s16, 2 }
 0xb42   : > { %p10226_p6 = pnand %p13003_p3, %p13002_p0 }
 0xb44   : > { %p10227_p4 = pneg %p10226_p6 }
 0xb46   : > { %10526 = dma.done.wait (%p10227_p4), %s8074_s1, 128  }
 0xb47   : > { %10528 = vsyncadd (%p10227_p4), %s8074_s1, 4294967168  ;;  %s13004_s24 = sld [smem:[#allocation21_spill]]  ;;  %s13006_s21 = smov %s10535_s22 }
 0xb48   : > { %s13005_s15 = sld [smem:[#allocation22_spill]]  ;;  %s13007_s22 = smov %s10539_s23 }
 0xb4d   : > { %p24_p8 = scmp.ge.s32.totalorder %s13004_s24, 4  }
 0xb4e   : > { %s13008_s23 = smov %s13005_s15 }
 0xb4f   :  { %26 = sbr.rel (!%p24_p8) target bundleno = 12 (0xc), region = 127 }
 0xb54   :  { %8079 = vsyncpa [#allocation3], 1 }
 0xb55   :  { %8081 = vsyncpa [#allocation3 + $0x1], 1 }
 0xb56   :  { %8082 = vsyncpa [#allocation6], 1 }
 0xb57   :  { %8084 = vsyncpa [#allocation6 + $0x1], 1 }
 0xb58   :  { %8085 = vsyncpa [#allocation9], 1 }
 0xb59   :  { %8086 = vsyncpa [#allocation12], 1 }
 0xb5a   :  { %8087 = vsyncpa [#allocation4], 1 }
 0xb5b   :  { %8089 = vsyncpa [#allocation4 + $0x1], 1 }

</bundles_post_ra>
